<compile_context>
chip_gen: v7x
topology: tpu7x:2x2x1
jax: 0.10.0
libtpu: 0.0.40
codegen_flags: <defaults>
</compile_context>

<pallas_src>
import functools

import jax
import jax.numpy as jnp
from jax.experimental import pallas as pl
from jax.experimental.pallas import tpu as pltpu


# ----------------------------- Pallas kernel ------------------------------- #

def classifier_kernel(x_ref, wih_ref, whh_ref, bih_ref, bhh_ref,
                      wfc_ref, bfc_ref, out_ref, *, B, S, H):
    """Fused GRU (1 layer, zero init hidden) + final Linear.

    x_ref  : (S*B, Din)  time-major flattened input; timestep t = rows [t*B, (t+1)*B)
    wih_ref: (Din, 3H)   W_ih^T  (gate order r, z, n -- PyTorch layout)
    whh_ref: (H, 3H)     W_hh^T
    bih_ref: (1, 3H)     b_ih
    bhh_ref: (1, 3H)     b_hh   (kept separate: b_hn sits inside the r * (.) term)
    wfc_ref: (H, n_c)    fc1 weight^T
    bfc_ref: (1, n_c)    fc1 bias
    out_ref: (B, n_c)
    """
    # Hoisted input projection: one big matmul instead of S tiny ones on the
    # serial critical path.  (S*B, 3H)
    xproj = (jnp.dot(x_ref[...], wih_ref[...],
                     preferred_element_type=jnp.float32) + bih_ref[...])

    whh = whh_ref[...]
    bhh = bhh_ref[...]

    h = jnp.zeros((B, H), dtype=jnp.float32)

    # S is small and static -> fully unrolled loop (scheduler visibility across
    # steps); only the (B, H) x (H, 3H) recurrence matmul remains per step.
    for t in range(S):
        xp = xproj[t * B:(t + 1) * B, :]                                # (B, 3H)
        hp = jnp.dot(h, whh, preferred_element_type=jnp.float32) + bhh  # (B, 3H)
        r = jax.nn.sigmoid(xp[:, 0:H] + hp[:, 0:H])
        z = jax.nn.sigmoid(xp[:, H:2 * H] + hp[:, H:2 * H])
        n = jnp.tanh(xp[:, 2 * H:3 * H] + r * hp[:, 2 * H:3 * H])
        h = (1.0 - z) * n + z * h

    # fc1(h_0.reshape(B, -1)); single store at the end.
    out = jnp.dot(h, wfc_ref[...], preferred_element_type=jnp.float32) + bfc_ref[...]
    out_ref[...] = out.astype(out_ref.dtype)


# ------------------------------ JAX wrapper --------------------------------- #

_VMEM_SPEC = pl.BlockSpec(memory_space=pltpu.MemorySpace.VMEM)


def classifier_forward(x, prepped_params):
    """x: (B, S, n_in) batch-first, like nn.GRU(batch_first=True)."""
    B, S, Din = x.shape
    wih_t, whh_t, b_ih, b_hh, wfc_t, b_fc = prepped_params
    H = whh_t.shape[0]
    n_c = wfc_t.shape[1]

    # Time-major flatten so each timestep is a contiguous (B, n_in) row block
    # (done once by XLA outside the kernel; avoids in-kernel relayouts).
    x_tm = jnp.transpose(x, (1, 0, 2)).reshape(S * B, Din).astype(jnp.float32)

    kernel = functools.partial(classifier_kernel, B=B, S=S, H=H)
    return pl.pallas_call(
        kernel,
        out_shape=jax.ShapeDtypeStruct((B, n_c), jnp.float32),
        in_specs=[_VMEM_SPEC] * 7,
        out_specs=_VMEM_SPEC,
        compiler_params=pltpu.CompilerParams(vmem_limit_bytes=32 * 1024 * 1024),
    )(x_tm, wih_t, whh_t, b_ih, b_hh, wfc_t, b_fc)


# ------------------------- Parameter init / prep ----------------------------- #

def init_params(key, n_in, n_c, hidden=256):
    """PyTorch-layout parameters (same shapes/init ranges as nn.GRU / nn.Linear)."""
    H = hidden
    k = 1.0 / jnp.sqrt(H)
    key, k1, k2, k3, k4, k5, k6 = jax.random.split(key, 7)
    w_ih = jax.random.uniform(k1, (3 * H, n_in), minval=-k, maxval=k)
    w_hh = jax.random.uniform(k2, (3 * H, H), minval=-k, maxval=k)
    b_ih = jax.random.uniform(k3, (3 * H,), minval=-k, maxval=k)
    b_hh = jax.random.uniform(k4, (3 * H,), minval=-k, maxval=k)
    kf = 1.0 / jnp.sqrt(H)
    w_fc = jax.random.uniform(k5, (n_c, H), minval=-kf, maxval=kf)
    b_fc = jax.random.uniform(k6, (n_c,), minval=-kf, maxval=kf)
    return (w_ih, w_hh, b_ih, b_hh, w_fc, b_fc)


def prepare_params(raw):
    """One-time transposes / reshapes so no per-forward weight prep is needed."""
    w_ih, w_hh, b_ih, b_hh, w_fc, b_fc = raw
    return (jnp.asarray(w_ih.T, jnp.float32),        # (n_in, 3H)
            jnp.asarray(w_hh.T, jnp.float32),        # (H, 3H)
            jnp.asarray(b_ih[None, :], jnp.float32),  # (1, 3H)
            jnp.asarray(b_hh[None, :], jnp.float32),  # (1, 3H)
            jnp.asarray(w_fc.T, jnp.float32),        # (H, n_c)
            jnp.asarray(b_fc[None, :], jnp.float32))  # (1, n_c)


# ----------------------------- Pure-JAX reference ---------------------------- #

def reference_forward(x, raw_params):
    w_ih, w_hh, b_ih, b_hh, w_fc, b_fc = raw_params
    B, S, _ = x.shape
    H = w_hh.shape[1]
    x = x.astype(jnp.float32)
    h = jnp.zeros((B, H), jnp.float32)
    for t in range(S):
        gi = x[:, t, :] @ w_ih.T + b_ih
        gh = h @ w_hh.T + b_hh
        r = jax.nn.sigmoid(gi[:, :H] + gh[:, :H])
        z = jax.nn.sigmoid(gi[:, H:2 * H] + gh[:, H:2 * H])
        n = jnp.tanh(gi[:, 2 * H:] + r * gh[:, 2 * H:])
        h = (1.0 - z) * n + z * h
    return h @ w_fc.T + b_fc


# ----------------------------------- Main ------------------------------------ #

if __name__ == "__main__":
    n_in, n_c = 16, 10        # input features, number of classes
    hidden = 256              # fixed by the module (self.dim = 256)
    B, S = 2, 8               # batch, sequence length (batch_first)

    key = jax.random.PRNGKey(0)
    key_x, key_p = jax.random.split(key)
    x = jax.random.normal(key_x, (B, S, n_in), dtype=jnp.float32)

    raw_params = init_params(key_p, n_in, n_c, hidden)
    prepped = prepare_params(raw_params)

    out = classifier_forward(x, prepped)
    out = jax.block_until_ready(out)

    ref = reference_forward(x, raw_params)
    assert out.shape == (B, n_c), out.shape
    assert jnp.allclose(out, ref, rtol=1e-3, atol=1e-3), \
        f"max abs err {jnp.max(jnp.abs(out - ref))}"

    print("KERNEL_OK")
</pallas_src>

<mosaic_0001>
module attributes {stable_mosaic.version = 11 : i64} {
  func.func @classifier_kernel(%arg0: memref<16x16xf32, #tpu.memory_space<vmem>>, %arg1: memref<16x768xf32, #tpu.memory_space<vmem>>, %arg2: memref<256x768xf32, #tpu.memory_space<vmem>>, %arg3: memref<1x768xf32, #tpu.memory_space<vmem>>, %arg4: memref<1x768xf32, #tpu.memory_space<vmem>>, %arg5: memref<256x10xf32, #tpu.memory_space<vmem>>, %arg6: memref<1x10xf32, #tpu.memory_space<vmem>>, %arg7: memref<2x10xf32, #tpu.memory_space<vmem>>) attributes {dimension_semantics = [], scalar_prefetch = 0 : i64, scratch_operands = 0 : i64, tpu.core_type = #tpu.core_type<tc>} {
    %c0 = arith.constant 0 : index
    %c0_0 = arith.constant 0 : index
    %0 = vector.load %arg0[%c0, %c0_0] : memref<16x16xf32, #tpu.memory_space<vmem>>, vector<16x16xf32>
    %c0_1 = arith.constant 0 : index
    %c0_2 = arith.constant 0 : index
    %1 = vector.load %arg1[%c0_1, %c0_2] : memref<16x768xf32, #tpu.memory_space<vmem>>, vector<16x768xf32>
    %cst = arith.constant dense<0.000000e+00> : vector<16x768xf32>
    %2 = tpu.matmul %0, %1, %cst {dimension_numbers = #tpu.dot_dimension_numbers<[1], [0], [0], [1], [0, 0, 1, 1], [], []>} : vector<16x16xf32>, vector<16x768xf32>, vector<16x768xf32> -> vector<16x768xf32>
    %c0_3 = arith.constant 0 : index
    %c0_4 = arith.constant 0 : index
    %3 = vector.load %arg3[%c0_3, %c0_4] : memref<1x768xf32, #tpu.memory_space<vmem>>, vector<1x768xf32>
    %4 = vector.broadcast %3 : vector<1x768xf32> to vector<16x768xf32>
    %5 = arith.addf %2, %4 : vector<16x768xf32>
    %c0_5 = arith.constant 0 : index
    %c0_6 = arith.constant 0 : index
    %6 = vector.load %arg2[%c0_5, %c0_6] : memref<256x768xf32, #tpu.memory_space<vmem>>, vector<256x768xf32>
    %c0_7 = arith.constant 0 : index
    %c0_8 = arith.constant 0 : index
    %7 = vector.load %arg4[%c0_7, %c0_8] : memref<1x768xf32, #tpu.memory_space<vmem>>, vector<1x768xf32>
    %cst_9 = arith.constant 0.000000e+00 : f32
    %8 = vector.broadcast %cst_9 : f32 to vector<2x256xf32>
    %9 = vector.extract_strided_slice %5 {offsets = [0, 0], sizes = [2, 768], strides = [1, 1]} : vector<16x768xf32> to vector<2x768xf32>
    %cst_10 = arith.constant dense<0.000000e+00> : vector<2x768xf32>
    %10 = tpu.matmul %8, %6, %cst_10 {dimension_numbers = #tpu.dot_dimension_numbers<[1], [0], [0], [1], [0, 0, 1, 1], [], []>} : vector<2x256xf32>, vector<256x768xf32>, vector<2x768xf32> -> vector<2x768xf32>
    %11 = vector.broadcast %7 : vector<1x768xf32> to vector<2x768xf32>
    %12 = arith.addf %10, %11 : vector<2x768xf32>
    %13 = vector.extract_strided_slice %9 {offsets = [0, 0], sizes = [2, 256], strides = [1, 1]} : vector<2x768xf32> to vector<2x256xf32>
    %14 = vector.extract_strided_slice %12 {offsets = [0, 0], sizes = [2, 256], strides = [1, 1]} : vector<2x768xf32> to vector<2x256xf32>
    %15 = arith.addf %13, %14 : vector<2x256xf32>
    %16 = arith.negf %15 : vector<2x256xf32>
    %17 = math.exp %16 : vector<2x256xf32>
    %cst_11 = arith.constant 1.000000e+00 : f32
    %18 = vector.broadcast %cst_11 : f32 to vector<2x256xf32>
    %19 = arith.addf %18, %17 : vector<2x256xf32>
    %20 = arith.divf %18, %19 : vector<2x256xf32>
    %21 = vector.extract_strided_slice %9 {offsets = [0, 256], sizes = [2, 256], strides = [1, 1]} : vector<2x768xf32> to vector<2x256xf32>
    %22 = vector.extract_strided_slice %12 {offsets = [0, 256], sizes = [2, 256], strides = [1, 1]} : vector<2x768xf32> to vector<2x256xf32>
    %23 = arith.addf %21, %22 : vector<2x256xf32>
    %24 = arith.negf %23 : vector<2x256xf32>
    %25 = math.exp %24 : vector<2x256xf32>
    %cst_12 = arith.constant 1.000000e+00 : f32
    %26 = vector.broadcast %cst_12 : f32 to vector<2x256xf32>
    %27 = arith.addf %26, %25 : vector<2x256xf32>
    %28 = arith.divf %26, %27 : vector<2x256xf32>
    %29 = vector.extract_strided_slice %9 {offsets = [0, 512], sizes = [2, 256], strides = [1, 1]} : vector<2x768xf32> to vector<2x256xf32>
    %30 = vector.extract_strided_slice %12 {offsets = [0, 512], sizes = [2, 256], strides = [1, 1]} : vector<2x768xf32> to vector<2x256xf32>
    %31 = arith.mulf %20, %30 : vector<2x256xf32>
    %32 = arith.addf %29, %31 : vector<2x256xf32>
    %33 = math.tanh %32 : vector<2x256xf32>
    %cst_13 = arith.constant 1.000000e+00 : f32
    %34 = vector.broadcast %cst_13 : f32 to vector<2x256xf32>
    %35 = arith.subf %34, %28 : vector<2x256xf32>
    %36 = arith.mulf %35, %33 : vector<2x256xf32>
    %37 = arith.mulf %28, %8 : vector<2x256xf32>
    %38 = arith.addf %36, %37 : vector<2x256xf32>
    %39 = vector.extract_strided_slice %5 {offsets = [2, 0], sizes = [2, 768], strides = [1, 1]} : vector<16x768xf32> to vector<2x768xf32>
    %cst_14 = arith.constant dense<0.000000e+00> : vector<2x768xf32>
    %40 = tpu.matmul %38, %6, %cst_14 {dimension_numbers = #tpu.dot_dimension_numbers<[1], [0], [0], [1], [0, 0, 1, 1], [], []>} : vector<2x256xf32>, vector<256x768xf32>, vector<2x768xf32> -> vector<2x768xf32>
    %41 = vector.broadcast %7 : vector<1x768xf32> to vector<2x768xf32>
    %42 = arith.addf %40, %41 : vector<2x768xf32>
    %43 = vector.extract_strided_slice %39 {offsets = [0, 0], sizes = [2, 256], strides = [1, 1]} : vector<2x768xf32> to vector<2x256xf32>
    %44 = vector.extract_strided_slice %42 {offsets = [0, 0], sizes = [2, 256], strides = [1, 1]} : vector<2x768xf32> to vector<2x256xf32>
    %45 = arith.addf %43, %44 : vector<2x256xf32>
    %46 = arith.negf %45 : vector<2x256xf32>
    %47 = math.exp %46 : vector<2x256xf32>
    %cst_15 = arith.constant 1.000000e+00 : f32
    %48 = vector.broadcast %cst_15 : f32 to vector<2x256xf32>
    %49 = arith.addf %48, %47 : vector<2x256xf32>
    %50 = arith.divf %48, %49 : vector<2x256xf32>
    %51 = vector.extract_strided_slice %39 {offsets = [0, 256], sizes = [2, 256], strides = [1, 1]} : vector<2x768xf32> to vector<2x256xf32>
    %52 = vector.extract_strided_slice %42 {offsets = [0, 256], sizes = [2, 256], strides = [1, 1]} : vector<2x768xf32> to vector<2x256xf32>
    %53 = arith.addf %51, %52 : vector<2x256xf32>
    %54 = arith.negf %53 : vector<2x256xf32>
    %55 = math.exp %54 : vector<2x256xf32>
    %cst_16 = arith.constant 1.000000e+00 : f32
    %56 = vector.broadcast %cst_16 : f32 to vector<2x256xf32>
    %57 = arith.addf %56, %55 : vector<2x256xf32>
    %58 = arith.divf %56, %57 : vector<2x256xf32>
    %59 = vector.extract_strided_slice %39 {offsets = [0, 512], sizes = [2, 256], strides = [1, 1]} : vector<2x768xf32> to vector<2x256xf32>
    %60 = vector.extract_strided_slice %42 {offsets = [0, 512], sizes = [2, 256], strides = [1, 1]} : vector<2x768xf32> to vector<2x256xf32>
    %61 = arith.mulf %50, %60 : vector<2x256xf32>
    %62 = arith.addf %59, %61 : vector<2x256xf32>
    %63 = math.tanh %62 : vector<2x256xf32>
    %cst_17 = arith.constant 1.000000e+00 : f32
    %64 = vector.broadcast %cst_17 : f32 to vector<2x256xf32>
    %65 = arith.subf %64, %58 : vector<2x256xf32>
    %66 = arith.mulf %65, %63 : vector<2x256xf32>
    %67 = arith.mulf %58, %38 : vector<2x256xf32>
    %68 = arith.addf %66, %67 : vector<2x256xf32>
    %69 = vector.extract_strided_slice %5 {offsets = [4, 0], sizes = [2, 768], strides = [1, 1]} : vector<16x768xf32> to vector<2x768xf32>
    %cst_18 = arith.constant dense<0.000000e+00> : vector<2x768xf32>
    %70 = tpu.matmul %68, %6, %cst_18 {dimension_numbers = #tpu.dot_dimension_numbers<[1], [0], [0], [1], [0, 0, 1, 1], [], []>} : vector<2x256xf32>, vector<256x768xf32>, vector<2x768xf32> -> vector<2x768xf32>
    %71 = vector.broadcast %7 : vector<1x768xf32> to vector<2x768xf32>
    %72 = arith.addf %70, %71 : vector<2x768xf32>
    %73 = vector.extract_strided_slice %69 {offsets = [0, 0], sizes = [2, 256], strides = [1, 1]} : vector<2x768xf32> to vector<2x256xf32>
    %74 = vector.extract_strided_slice %72 {offsets = [0, 0], sizes = [2, 256], strides = [1, 1]} : vector<2x768xf32> to vector<2x256xf32>
    %75 = arith.addf %73, %74 : vector<2x256xf32>
    %76 = arith.negf %75 : vector<2x256xf32>
    %77 = math.exp %76 : vector<2x256xf32>
    %cst_19 = arith.constant 1.000000e+00 : f32
    %78 = vector.broadcast %cst_19 : f32 to vector<2x256xf32>
    %79 = arith.addf %78, %77 : vector<2x256xf32>
    %80 = arith.divf %78, %79 : vector<2x256xf32>
    %81 = vector.extract_strided_slice %69 {offsets = [0, 256], sizes = [2, 256], strides = [1, 1]} : vector<2x768xf32> to vector<2x256xf32>
    %82 = vector.extract_strided_slice %72 {offsets = [0, 256], sizes = [2, 256], strides = [1, 1]} : vector<2x768xf32> to vector<2x256xf32>
    %83 = arith.addf %81, %82 : vector<2x256xf32>
    %84 = arith.negf %83 : vector<2x256xf32>
    %85 = math.exp %84 : vector<2x256xf32>
    %cst_20 = arith.constant 1.000000e+00 : f32
    %86 = vector.broadcast %cst_20 : f32 to vector<2x256xf32>
    %87 = arith.addf %86, %85 : vector<2x256xf32>
    %88 = arith.divf %86, %87 : vector<2x256xf32>
    %89 = vector.extract_strided_slice %69 {offsets = [0, 512], sizes = [2, 256], strides = [1, 1]} : vector<2x768xf32> to vector<2x256xf32>
    %90 = vector.extract_strided_slice %72 {offsets = [0, 512], sizes = [2, 256], strides = [1, 1]} : vector<2x768xf32> to vector<2x256xf32>
    %91 = arith.mulf %80, %90 : vector<2x256xf32>
    %92 = arith.addf %89, %91 : vector<2x256xf32>
    %93 = math.tanh %92 : vector<2x256xf32>
    %cst_21 = arith.constant 1.000000e+00 : f32
    %94 = vector.broadcast %cst_21 : f32 to vector<2x256xf32>
    %95 = arith.subf %94, %88 : vector<2x256xf32>
    %96 = arith.mulf %95, %93 : vector<2x256xf32>
    %97 = arith.mulf %88, %68 : vector<2x256xf32>
    %98 = arith.addf %96, %97 : vector<2x256xf32>
    %99 = vector.extract_strided_slice %5 {offsets = [6, 0], sizes = [2, 768], strides = [1, 1]} : vector<16x768xf32> to vector<2x768xf32>
    %cst_22 = arith.constant dense<0.000000e+00> : vector<2x768xf32>
    %100 = tpu.matmul %98, %6, %cst_22 {dimension_numbers = #tpu.dot_dimension_numbers<[1], [0], [0], [1], [0, 0, 1, 1], [], []>} : vector<2x256xf32>, vector<256x768xf32>, vector<2x768xf32> -> vector<2x768xf32>
    %101 = vector.broadcast %7 : vector<1x768xf32> to vector<2x768xf32>
    %102 = arith.addf %100, %101 : vector<2x768xf32>
    %103 = vector.extract_strided_slice %99 {offsets = [0, 0], sizes = [2, 256], strides = [1, 1]} : vector<2x768xf32> to vector<2x256xf32>
    %104 = vector.extract_strided_slice %102 {offsets = [0, 0], sizes = [2, 256], strides = [1, 1]} : vector<2x768xf32> to vector<2x256xf32>
    %105 = arith.addf %103, %104 : vector<2x256xf32>
    %106 = arith.negf %105 : vector<2x256xf32>
    %107 = math.exp %106 : vector<2x256xf32>
    %cst_23 = arith.constant 1.000000e+00 : f32
    %108 = vector.broadcast %cst_23 : f32 to vector<2x256xf32>
    %109 = arith.addf %108, %107 : vector<2x256xf32>
    %110 = arith.divf %108, %109 : vector<2x256xf32>
    %111 = vector.extract_strided_slice %99 {offsets = [0, 256], sizes = [2, 256], strides = [1, 1]} : vector<2x768xf32> to vector<2x256xf32>
    %112 = vector.extract_strided_slice %102 {offsets = [0, 256], sizes = [2, 256], strides = [1, 1]} : vector<2x768xf32> to vector<2x256xf32>
    %113 = arith.addf %111, %112 : vector<2x256xf32>
    %114 = arith.negf %113 : vector<2x256xf32>
    %115 = math.exp %114 : vector<2x256xf32>
    %cst_24 = arith.constant 1.000000e+00 : f32
    %116 = vector.broadcast %cst_24 : f32 to vector<2x256xf32>
    %117 = arith.addf %116, %115 : vector<2x256xf32>
    %118 = arith.divf %116, %117 : vector<2x256xf32>
    %119 = vector.extract_strided_slice %99 {offsets = [0, 512], sizes = [2, 256], strides = [1, 1]} : vector<2x768xf32> to vector<2x256xf32>
    %120 = vector.extract_strided_slice %102 {offsets = [0, 512], sizes = [2, 256], strides = [1, 1]} : vector<2x768xf32> to vector<2x256xf32>
    %121 = arith.mulf %110, %120 : vector<2x256xf32>
    %122 = arith.addf %119, %121 : vector<2x256xf32>
    %123 = math.tanh %122 : vector<2x256xf32>
    %cst_25 = arith.constant 1.000000e+00 : f32
    %124 = vector.broadcast %cst_25 : f32 to vector<2x256xf32>
    %125 = arith.subf %124, %118 : vector<2x256xf32>
    %126 = arith.mulf %125, %123 : vector<2x256xf32>
    %127 = arith.mulf %118, %98 : vector<2x256xf32>
    %128 = arith.addf %126, %127 : vector<2x256xf32>
    %129 = vector.extract_strided_slice %5 {offsets = [8, 0], sizes = [2, 768], strides = [1, 1]} : vector<16x768xf32> to vector<2x768xf32>
    %cst_26 = arith.constant dense<0.000000e+00> : vector<2x768xf32>
    %130 = tpu.matmul %128, %6, %cst_26 {dimension_numbers = #tpu.dot_dimension_numbers<[1], [0], [0], [1], [0, 0, 1, 1], [], []>} : vector<2x256xf32>, vector<256x768xf32>, vector<2x768xf32> -> vector<2x768xf32>
    %131 = vector.broadcast %7 : vector<1x768xf32> to vector<2x768xf32>
    %132 = arith.addf %130, %131 : vector<2x768xf32>
    %133 = vector.extract_strided_slice %129 {offsets = [0, 0], sizes = [2, 256], strides = [1, 1]} : vector<2x768xf32> to vector<2x256xf32>
    %134 = vector.extract_strided_slice %132 {offsets = [0, 0], sizes = [2, 256], strides = [1, 1]} : vector<2x768xf32> to vector<2x256xf32>
    %135 = arith.addf %133, %134 : vector<2x256xf32>
    %136 = arith.negf %135 : vector<2x256xf32>
    %137 = math.exp %136 : vector<2x256xf32>
    %cst_27 = arith.constant 1.000000e+00 : f32
    %138 = vector.broadcast %cst_27 : f32 to vector<2x256xf32>
    %139 = arith.addf %138, %137 : vector<2x256xf32>
    %140 = arith.divf %138, %139 : vector<2x256xf32>
    %141 = vector.extract_strided_slice %129 {offsets = [0, 256], sizes = [2, 256], strides = [1, 1]} : vector<2x768xf32> to vector<2x256xf32>
    %142 = vector.extract_strided_slice %132 {offsets = [0, 256], sizes = [2, 256], strides = [1, 1]} : vector<2x768xf32> to vector<2x256xf32>
    %143 = arith.addf %141, %142 : vector<2x256xf32>
    %144 = arith.negf %143 : vector<2x256xf32>
    %145 = math.exp %144 : vector<2x256xf32>
    %cst_28 = arith.constant 1.000000e+00 : f32
    %146 = vector.broadcast %cst_28 : f32 to vector<2x256xf32>
    %147 = arith.addf %146, %145 : vector<2x256xf32>
    %148 = arith.divf %146, %147 : vector<2x256xf32>
    %149 = vector.extract_strided_slice %129 {offsets = [0, 512], sizes = [2, 256], strides = [1, 1]} : vector<2x768xf32> to vector<2x256xf32>
    %150 = vector.extract_strided_slice %132 {offsets = [0, 512], sizes = [2, 256], strides = [1, 1]} : vector<2x768xf32> to vector<2x256xf32>
    %151 = arith.mulf %140, %150 : vector<2x256xf32>
    %152 = arith.addf %149, %151 : vector<2x256xf32>
    %153 = math.tanh %152 : vector<2x256xf32>
    %cst_29 = arith.constant 1.000000e+00 : f32
    %154 = vector.broadcast %cst_29 : f32 to vector<2x256xf32>
    %155 = arith.subf %154, %148 : vector<2x256xf32>
    %156 = arith.mulf %155, %153 : vector<2x256xf32>
    %157 = arith.mulf %148, %128 : vector<2x256xf32>
    %158 = arith.addf %156, %157 : vector<2x256xf32>
    %159 = vector.extract_strided_slice %5 {offsets = [10, 0], sizes = [2, 768], strides = [1, 1]} : vector<16x768xf32> to vector<2x768xf32>
    %cst_30 = arith.constant dense<0.000000e+00> : vector<2x768xf32>
    %160 = tpu.matmul %158, %6, %cst_30 {dimension_numbers = #tpu.dot_dimension_numbers<[1], [0], [0], [1], [0, 0, 1, 1], [], []>} : vector<2x256xf32>, vector<256x768xf32>, vector<2x768xf32> -> vector<2x768xf32>
    %161 = vector.broadcast %7 : vector<1x768xf32> to vector<2x768xf32>
    %162 = arith.addf %160, %161 : vector<2x768xf32>
    %163 = vector.extract_strided_slice %159 {offsets = [0, 0], sizes = [2, 256], strides = [1, 1]} : vector<2x768xf32> to vector<2x256xf32>
    %164 = vector.extract_strided_slice %162 {offsets = [0, 0], sizes = [2, 256], strides = [1, 1]} : vector<2x768xf32> to vector<2x256xf32>
    %165 = arith.addf %163, %164 : vector<2x256xf32>
    %166 = arith.negf %165 : vector<2x256xf32>
    %167 = math.exp %166 : vector<2x256xf32>
    %cst_31 = arith.constant 1.000000e+00 : f32
    %168 = vector.broadcast %cst_31 : f32 to vector<2x256xf32>
    %169 = arith.addf %168, %167 : vector<2x256xf32>
    %170 = arith.divf %168, %169 : vector<2x256xf32>
    %171 = vector.extract_strided_slice %159 {offsets = [0, 256], sizes = [2, 256], strides = [1, 1]} : vector<2x768xf32> to vector<2x256xf32>
    %172 = vector.extract_strided_slice %162 {offsets = [0, 256], sizes = [2, 256], strides = [1, 1]} : vector<2x768xf32> to vector<2x256xf32>
    %173 = arith.addf %171, %172 : vector<2x256xf32>
    %174 = arith.negf %173 : vector<2x256xf32>
    %175 = math.exp %174 : vector<2x256xf32>
    %cst_32 = arith.constant 1.000000e+00 : f32
    %176 = vector.broadcast %cst_32 : f32 to vector<2x256xf32>
    %177 = arith.addf %176, %175 : vector<2x256xf32>
    %178 = arith.divf %176, %177 : vector<2x256xf32>
    %179 = vector.extract_strided_slice %159 {offsets = [0, 512], sizes = [2, 256], strides = [1, 1]} : vector<2x768xf32> to vector<2x256xf32>
    %180 = vector.extract_strided_slice %162 {offsets = [0, 512], sizes = [2, 256], strides = [1, 1]} : vector<2x768xf32> to vector<2x256xf32>
    %181 = arith.mulf %170, %180 : vector<2x256xf32>
    %182 = arith.addf %179, %181 : vector<2x256xf32>
    %183 = math.tanh %182 : vector<2x256xf32>
    %cst_33 = arith.constant 1.000000e+00 : f32
    %184 = vector.broadcast %cst_33 : f32 to vector<2x256xf32>
    %185 = arith.subf %184, %178 : vector<2x256xf32>
    %186 = arith.mulf %185, %183 : vector<2x256xf32>
    %187 = arith.mulf %178, %158 : vector<2x256xf32>
    %188 = arith.addf %186, %187 : vector<2x256xf32>
    %189 = vector.extract_strided_slice %5 {offsets = [12, 0], sizes = [2, 768], strides = [1, 1]} : vector<16x768xf32> to vector<2x768xf32>
    %cst_34 = arith.constant dense<0.000000e+00> : vector<2x768xf32>
    %190 = tpu.matmul %188, %6, %cst_34 {dimension_numbers = #tpu.dot_dimension_numbers<[1], [0], [0], [1], [0, 0, 1, 1], [], []>} : vector<2x256xf32>, vector<256x768xf32>, vector<2x768xf32> -> vector<2x768xf32>
    %191 = vector.broadcast %7 : vector<1x768xf32> to vector<2x768xf32>
    %192 = arith.addf %190, %191 : vector<2x768xf32>
    %193 = vector.extract_strided_slice %189 {offsets = [0, 0], sizes = [2, 256], strides = [1, 1]} : vector<2x768xf32> to vector<2x256xf32>
    %194 = vector.extract_strided_slice %192 {offsets = [0, 0], sizes = [2, 256], strides = [1, 1]} : vector<2x768xf32> to vector<2x256xf32>
    %195 = arith.addf %193, %194 : vector<2x256xf32>
    %196 = arith.negf %195 : vector<2x256xf32>
    %197 = math.exp %196 : vector<2x256xf32>
    %cst_35 = arith.constant 1.000000e+00 : f32
    %198 = vector.broadcast %cst_35 : f32 to vector<2x256xf32>
    %199 = arith.addf %198, %197 : vector<2x256xf32>
    %200 = arith.divf %198, %199 : vector<2x256xf32>
    %201 = vector.extract_strided_slice %189 {offsets = [0, 256], sizes = [2, 256], strides = [1, 1]} : vector<2x768xf32> to vector<2x256xf32>
    %202 = vector.extract_strided_slice %192 {offsets = [0, 256], sizes = [2, 256], strides = [1, 1]} : vector<2x768xf32> to vector<2x256xf32>
    %203 = arith.addf %201, %202 : vector<2x256xf32>
    %204 = arith.negf %203 : vector<2x256xf32>
    %205 = math.exp %204 : vector<2x256xf32>
    %cst_36 = arith.constant 1.000000e+00 : f32
    %206 = vector.broadcast %cst_36 : f32 to vector<2x256xf32>
    %207 = arith.addf %206, %205 : vector<2x256xf32>
    %208 = arith.divf %206, %207 : vector<2x256xf32>
    %209 = vector.extract_strided_slice %189 {offsets = [0, 512], sizes = [2, 256], strides = [1, 1]} : vector<2x768xf32> to vector<2x256xf32>
    %210 = vector.extract_strided_slice %192 {offsets = [0, 512], sizes = [2, 256], strides = [1, 1]} : vector<2x768xf32> to vector<2x256xf32>
    %211 = arith.mulf %200, %210 : vector<2x256xf32>
    %212 = arith.addf %209, %211 : vector<2x256xf32>
    %213 = math.tanh %212 : vector<2x256xf32>
    %cst_37 = arith.constant 1.000000e+00 : f32
    %214 = vector.broadcast %cst_37 : f32 to vector<2x256xf32>
    %215 = arith.subf %214, %208 : vector<2x256xf32>
    %216 = arith.mulf %215, %213 : vector<2x256xf32>
    %217 = arith.mulf %208, %188 : vector<2x256xf32>
    %218 = arith.addf %216, %217 : vector<2x256xf32>
    %219 = vector.extract_strided_slice %5 {offsets = [14, 0], sizes = [2, 768], strides = [1, 1]} : vector<16x768xf32> to vector<2x768xf32>
    %cst_38 = arith.constant dense<0.000000e+00> : vector<2x768xf32>
    %220 = tpu.matmul %218, %6, %cst_38 {dimension_numbers = #tpu.dot_dimension_numbers<[1], [0], [0], [1], [0, 0, 1, 1], [], []>} : vector<2x256xf32>, vector<256x768xf32>, vector<2x768xf32> -> vector<2x768xf32>
    %221 = vector.broadcast %7 : vector<1x768xf32> to vector<2x768xf32>
    %222 = arith.addf %220, %221 : vector<2x768xf32>
    %223 = vector.extract_strided_slice %219 {offsets = [0, 0], sizes = [2, 256], strides = [1, 1]} : vector<2x768xf32> to vector<2x256xf32>
    %224 = vector.extract_strided_slice %222 {offsets = [0, 0], sizes = [2, 256], strides = [1, 1]} : vector<2x768xf32> to vector<2x256xf32>
    %225 = arith.addf %223, %224 : vector<2x256xf32>
    %226 = arith.negf %225 : vector<2x256xf32>
    %227 = math.exp %226 : vector<2x256xf32>
    %cst_39 = arith.constant 1.000000e+00 : f32
    %228 = vector.broadcast %cst_39 : f32 to vector<2x256xf32>
    %229 = arith.addf %228, %227 : vector<2x256xf32>
    %230 = arith.divf %228, %229 : vector<2x256xf32>
    %231 = vector.extract_strided_slice %219 {offsets = [0, 256], sizes = [2, 256], strides = [1, 1]} : vector<2x768xf32> to vector<2x256xf32>
    %232 = vector.extract_strided_slice %222 {offsets = [0, 256], sizes = [2, 256], strides = [1, 1]} : vector<2x768xf32> to vector<2x256xf32>
    %233 = arith.addf %231, %232 : vector<2x256xf32>
    %234 = arith.negf %233 : vector<2x256xf32>
    %235 = math.exp %234 : vector<2x256xf32>
    %cst_40 = arith.constant 1.000000e+00 : f32
    %236 = vector.broadcast %cst_40 : f32 to vector<2x256xf32>
    %237 = arith.addf %236, %235 : vector<2x256xf32>
    %238 = arith.divf %236, %237 : vector<2x256xf32>
    %239 = vector.extract_strided_slice %219 {offsets = [0, 512], sizes = [2, 256], strides = [1, 1]} : vector<2x768xf32> to vector<2x256xf32>
    %240 = vector.extract_strided_slice %222 {offsets = [0, 512], sizes = [2, 256], strides = [1, 1]} : vector<2x768xf32> to vector<2x256xf32>
    %241 = arith.mulf %230, %240 : vector<2x256xf32>
    %242 = arith.addf %239, %241 : vector<2x256xf32>
    %243 = math.tanh %242 : vector<2x256xf32>
    %cst_41 = arith.constant 1.000000e+00 : f32
    %244 = vector.broadcast %cst_41 : f32 to vector<2x256xf32>
    %245 = arith.subf %244, %238 : vector<2x256xf32>
    %246 = arith.mulf %245, %243 : vector<2x256xf32>
    %247 = arith.mulf %238, %218 : vector<2x256xf32>
    %248 = arith.addf %246, %247 : vector<2x256xf32>
    %c0_42 = arith.constant 0 : index
    %c0_43 = arith.constant 0 : index
    %249 = vector.load %arg5[%c0_42, %c0_43] : memref<256x10xf32, #tpu.memory_space<vmem>>, vector<256x10xf32>
    %cst_44 = arith.constant dense<0.000000e+00> : vector<2x10xf32>
    %250 = tpu.matmul %248, %249, %cst_44 {dimension_numbers = #tpu.dot_dimension_numbers<[1], [0], [0], [1], [0, 0, 1, 1], [], []>} : vector<2x256xf32>, vector<256x10xf32>, vector<2x10xf32> -> vector<2x10xf32>
    %c0_45 = arith.constant 0 : index
    %c0_46 = arith.constant 0 : index
    %251 = vector.load %arg6[%c0_45, %c0_46] : memref<1x10xf32, #tpu.memory_space<vmem>>, vector<1x10xf32>
    %252 = vector.broadcast %251 : vector<1x10xf32> to vector<2x10xf32>
    %253 = arith.addf %250, %252 : vector<2x10xf32>
    %c0_47 = arith.constant 0 : index
    %c0_48 = arith.constant 0 : index
    %254 = vector.load %arg7[%c0_47, %c0_48] : memref<2x10xf32, #tpu.memory_space<vmem>>, vector<2x10xf32>
    tpu.vector_store %arg7[%c0_47, %c0_48], %253 {strides = array<i32>} : memref<2x10xf32, #tpu.memory_space<vmem>>, vector<2x10xf32>,
    return
  }
}

</mosaic_0001>

<bundles_post_ra>
// kernel: tpu_custom_call.1
= control target key start
LH: loop header
LB: loop body
LE: loop exit
PB: predicated region body
PF: predicated region fallthrough
CT: control target
= control target key end

     0   :  { %12 = vsyncpa [#allocation3], 0  ;;  %s6181_s0 = inlined_call_operand.vmem [shape: f32[16,16], index: 0, kind: input, shape index: {}]   ;;  %s6182_s1 = inlined_call_operand.vmem [shape: f32[16,768], index: 1, kind: input, shape index: {}]   ;;  %s6183_s2 = inlined_call_operand.hbm [shape: f32[256,768], index: 2, kind: input, shape index: {}]   ;;  %s6184_s3 = inlined_call_operand.vmem [shape: f32[1,768], index: 3, kind: input, shape index: {}]   ;;  %s6185_s4 = inlined_call_operand.vmem [shape: f32[1,768], index: 4, kind: input, shape index: {}]   ;;  %s6186_s5 = inlined_call_operand.vmem [shape: f32[256,10], index: 5, kind: input, shape index: {}]   ;;  %s6187_s6 = inlined_call_operand.vmem [shape: f32[1,10], index: 6, kind: input, shape index: {}]   ;;  %s6188_s7 = inlined_call_operand.hbm [shape: f32[2,10], index: 7, kind: output, shape index: {}]  }
   0x1   :  { %13 = vsyncpa [#allocation4], 0  ;;  %s4754_s24 = smov [#allocation2]   ;;  %s4706_s28 = scalar_lea.hbm %s6183_s2, 24576 }
   0x2   :  { %s23_s25 = sshll.u32 %s4754_s24, 4  ;;  %p4707_p0 = scmp.ne.s32.totalorder %s6183_s2, %s4706_s28  ;;  %s24_s25 = int_to_ptr.vmem [resolvable:$true] %s23_s25 }
   0x3   :  { %p4710_p1 = scmp.lt.u32.totalorder %s4706_s28, %s6183_s2 }
   0x5   :  { %p4712_p2 = pnand %p4710_p1, %p4707_p0 }
   0x7   :  { %4715 = shalt.err (!%p4712_p2)
}
   0x8   :  { %s4716_s10 = scalar_lea.vmem %s24_s25, 24576  ;;  %p4721_p4 = scmp.lt.s32.totalorder %s24_s25, %s24_s25 }
   0x9   :  { %p4717_p3 = scmp.ne.s32.totalorder %s24_s25, %s4716_s10  ;;  %p4722_p5 = scmp.lt.s32.totalorder %s4716_s10, %s4716_s10 }
   0xb   :  { %p4723_p6 = por %p4722_p5, %p4721_p4 }
   0xd   :  { %p4724_p7 = pnand %p4723_p6, %p4717_p3 }
   0xf   :  { %4727 = shalt.err (!%p4724_p7)
}
  0x10   :  { %s4755_s11 = smov 768   ;;  %s4756_s12 = smov 48  }
  0x11   :  { %29 = dma.hbm_to_vmem [thread:$0]  %s6183_s2, 24576, %s24_s25, [#allocation3], %s4755_s11, %s4755_s11, %s4756_s12  }
  0x12   :  { %4750 = dma.done.wait [#allocation3], 24576  }
  0x13   :  { %4751 = vsyncadd [#allocation3], 4294942720  ;;  %v6189_v0 = vmov 0.0   ;;  %v44_v1 = vld [vmem:[%s6182_s1 + $0x8] sm:$0xff]  ;;  %v50_v2 = vld [vmem:[%s6182_s1 + $0x38] sm:$0xff]  ;;  %vm87_vm0 = vcmask 130048  }
  0x14   :  { %158 = vmatprep.mubr.f32.mxu0 %v6189_v0  ;;  %613 = vmatprep.mubr.f32.mxu1 %v6189_v0  ;;  %v326_v3 = vld [vmem:[#allocation2 + $0x8] sm:$0xff]  ;;  %v2961_v4 = vpack.c.bf16 %v50_v2, %v44_v1  ;;  %v332_v5 = vld [vmem:[#allocation2 + $0x38] sm:$0xff]  ;;  %v43_v6 = vld [vmem:[%s6182_s1] sm:$0xff]  ;;  %s4758_s27 = smov [#allocation5]   ;;  %vm2870_vm1 = vcmask 74752  }
  0x15   :  { %v49_v7 = vld [vmem:[%s6182_s1 + $0x30] sm:$0xff]  ;;  %v4825_v8 = vpack.c.bf16 %v332_v5, %v326_v3  ;;  %v325_v10 = vld [vmem:[#allocation2] sm:$0xff]  ;;  %v338_v13 = vld [vmem:[#allocation2 + $0x68] sm:$0xff]  ;;  %s2878_s28 = sshll.u32 %s4758_s27, 4  ;;  %s2879_s28 = int_to_ptr.vmem [resolvable:$true] %s2878_s28 }
  0x16   :  { %v2963_v9 = vpack.c.bf16 %v49_v7, %v43_v6  ;;  %v331_v11 = vld [vmem:[#allocation2 + $0x30] sm:$0xff]  ;;  %2962 = vmatprep.subr.bf16.mxu0 %v2961_v4  ;;  %v344_v14 = vld [vmem:[#allocation2 + $0x98] sm:$0xff]  ;;  %v337_v15 = vld [vmem:[#allocation2 + $0x60] sm:$0xff]  ;;  %s4728_s29 = scalar_lea.vmem %s2879_s28, 32  ;;  %p4733_p9 = scmp.lt.s32.totalorder %s2879_s28, %s2879_s28 }
  0x17   :  { %6372 = vst [vmem:[#allocation8_spill] sm:$0xff] %v4825_v8  ;;  %v4827_v12 = vpack.c.bf16 %v331_v11, %v325_v10  ;;  %2974 = vmatprep.subr.bf16.mxu1 %v4825_v8  ;;  %v4833_v16 = vld [vmem:[%s6181_s0] sm:$0xff]  ;;  %v4835_v17 = vpack.c.bf16 %v344_v14, %v338_v13  ;;  %v343_v18 = vld [vmem:[#allocation2 + $0x90] sm:$0xff]  ;;  %v46_v19 = vld [vmem:[%s6182_s1 + $0x18] sm:$0xff]  ;;  %p4729_p8 = scmp.ne.s32.totalorder %s2879_s28, %s4728_s29  ;;  %p4734_p10 = scmp.lt.s32.totalorder %s4728_s29, %s4728_s29 }
  0x18   :  { %2964 = vmatpush1.bf16.msra.mxu0 %v2963_v9  ;;  %v4841_v20 = vpack.c.bf16 %v343_v18, %v337_v15  ;;  %v52_v21 = vld [vmem:[%s6182_s1 + $0x48] sm:$0xff]  ;;  %v356_v23 = vld [vmem:[#allocation2 + $0xf8] sm:$0xff]  ;;  %v45_v26 = vld [vmem:[%s6182_s1 + $0x10] sm:$0xff] }
  0x19   :  { %2976 = vmatpush1.bf16.msra.mxu1 %v4827_v12  ;;  %v350_v22 = vld [vmem:[#allocation2 + $0xc8] sm:$0xff]  ;;  %v2965_v24 = vpack.c.bf16 %v52_v21, %v46_v19  ;;  %v51_v27 = vld [vmem:[%s6182_s1 + $0x40] sm:$0xff]  ;;  %v355_v30 = vld [vmem:[#allocation2 + $0xf0] sm:$0xff]  ;;  %p4735_p11 = por %p4734_p10, %p4733_p9 }
  0x1a   :  { %2978 = vmatprep.subr.bf16.mxu1 %v4835_v17  ;;  %v4847_v25 = vpack.c.bf16 %v356_v23, %v350_v22  ;;  %v349_v28 = vld [vmem:[#allocation2 + $0xc0] sm:$0xff]  ;;  %v2967_v29 = vpack.c.bf16 %v51_v27, %v45_v26  ;;  %v362_v31 = vld [vmem:[#allocation2 + $0x128] sm:$0xff]  ;;  %v368_v32 = vld [vmem:[#allocation2 + $0x158] sm:$0xff] }
  0x1b   :  { %2887 = vmatmul.mubr.msk.f32.vlgmr.msra.gmra.mrb[0].mxu0 %vm87_vm0, %v4833_v16  ;;  %v4861_v33 = vld [vmem:[%s6181_s0 + $0x8] sm:$0xff]  ;;  %2966 = vmatprep.subr.bf16.mxu0 %v2965_v24  ;;  %v4867_v35 = vpack.c.bf16 %v355_v30, %v349_v28  ;;  %v54_v36 = vld [vmem:[%s6182_s1 + $0x58] sm:$0xff]  ;;  %v47_v37 = vld [vmem:[%s6182_s1 + $0x20] sm:$0xff]  ;;  %v4879_v39 = vpack.c.bf16 %v368_v32, %v362_v31  ;;  %p4736_p12 = pnand %p4735_p11, %p4729_p8 }
  0x1c   :  { %164 = vmatprep.mubr.f32.mxu0 %v6189_v0  ;;  %v48_v34 = vld [vmem:[%s6182_s1 + $0x28] sm:$0xff]  ;;  %2968 = vmatpush1.bf16.msra.mxu0 %v2967_v29  ;;  %v53_v38 = vld [vmem:[%s6182_s1 + $0x50] sm:$0xff]  ;;  %v361_v40 = vld [vmem:[#allocation2 + $0x120] sm:$0xff] }
  0x1d   :  { %2980 = vmatpush1.bf16.msra.mxu1 %v4841_v20  ;;  %v367_v41 = vld [vmem:[#allocation2 + $0x150] sm:$0xff]  ;;  %v2969_v42 = vpack.c.bf16 %v54_v36, %v48_v34  ;;  %v374_v43 = vld [vmem:[#allocation2 + $0x188] sm:$0xff]  ;;  %v380_v44 = vld [vmem:[#allocation2 + $0x1b8] sm:$0xff]  ;;  %v2971_v47 = vpack.c.bf16 %v53_v38, %v47_v37 }
  0x1e   :  { %2982 = vmatprep.subr.bf16.mxu1 %v4847_v25  ;;  %v328_v45 = vld [vmem:[#allocation2 + $0x18] sm:$0xff]  ;;  %v334_v46 = vld [vmem:[#allocation2 + $0x48] sm:$0xff]  ;;  %v4885_v48 = vpack.c.bf16 %v367_v41, %v361_v40  ;;  %v4890_v50 = vpack.c.bf16 %v380_v44, %v374_v43  ;;  %v373_v51 = vld [vmem:[#allocation2 + $0x180] sm:$0xff] }
  0x1f   :  { %2888 = vmatmul.mubr.msk.f32.gmra.mrb[2].mxu0 %vm87_vm0, %v4861_v33  ;;  %2970 = vmatprep.subr.bf16.mxu0 %v2969_v42  ;;  %v4887_v49 = vpack.c.bf16 %v334_v46, %v328_v45  ;;  %v379_v52 = vld [vmem:[#allocation2 + $0x1b0] sm:$0xff]  ;;  %v386_v53 = vld [vmem:[#allocation2 + $0x1e8] sm:$0xff]  ;;  %v392_v54 = vld [vmem:[#allocation2 + $0x218] sm:$0xff] }
  0x20   :  { %235 = vmatprep.mubr.f32.mxu0 %v6189_v0  ;;  %v4896_v55 = vpack.c.bf16 %v379_v52, %v373_v51  ;;  %v327_v56 = vld [vmem:[#allocation2 + $0x10] sm:$0xff]  ;;  %v333_v57 = vld [vmem:[#allocation2 + $0x40] sm:$0xff]  ;;  %v4900_v59 = vpack.c.bf16 %v392_v54, %v386_v53  ;;  %v340_v61 = vld [vmem:[#allocation2 + $0x78] sm:$0xff] }
  0x21   :  { %2984 = vmatpush1.bf16.msra.mxu1 %v4867_v35  ;;  %6373 = vst [vmem:[#allocation9_spill] sm:$0xff] %v4887_v49  ;;  %v385_v58 = vld [vmem:[#allocation2 + $0x1e0] sm:$0xff]  ;;  %v391_v60 = vld [vmem:[#allocation2 + $0x210] sm:$0xff]  ;;  %v346_v62 = vld [vmem:[#allocation2 + $0xa8] sm:$0xff]  ;;  %v4905_v2 = vpack.c.bf16 %v333_v57, %v327_v56 }
  0x22   :  { %2986 = vmatprep.subr.bf16.mxu1 %v4879_v39  ;;  %v398_v63 = vld [vmem:[#allocation2 + $0x248] sm:$0xff]  ;;  %v404_v1 = vld [vmem:[#allocation2 + $0x278] sm:$0xff]  ;;  %v4908_v3 = vpack.c.bf16 %v391_v60, %v385_v58  ;;  %v4910_v4 = vpack.c.bf16 %v346_v62, %v340_v61  ;;  %v339_v5 = vld [vmem:[#allocation2 + $0x70] sm:$0xff] }
  0x23   :  { %2889 = vmatmul.mubr.msk.f32.vlgmr.msra.gmra.mrb[4].mxu0 %vm87_vm0, %v4833_v16  ;;  %6374 = vst [vmem:[#allocation10_spill] sm:$0xff] %v4905_v2  ;;  %v345_v6 = vld [vmem:[#allocation2 + $0xa0] sm:$0xff]  ;;  %v4913_v9 = vpack.c.bf16 %v404_v1, %v398_v63  ;;  %v403_v10 = vld [vmem:[#allocation2 + $0x270] sm:$0xff]  ;;  %v352_v11 = vld [vmem:[#allocation2 + $0xd8] sm:$0xff] }
  0x24   :  { %241 = vmatprep.mubr.f32.mxu0 %v6189_v0  ;;  %2972 = vmatpush1.bf16.msra.mxu0 %v2971_v47  ;;  %6375 = vst [vmem:[#allocation11_spill] sm:$0xff] %v4910_v4  ;;  %v397_v7 = vld [vmem:[#allocation2 + $0x240] sm:$0xff]  ;;  %v358_v13 = vld [vmem:[#allocation2 + $0x108] sm:$0xff]  ;;  %v416_v15 = vld [vmem:[#allocation2 + $0x2d8] sm:$0xff]  ;;  %v4918_v18 = vpack.c.bf16 %v345_v6, %v339_v5 }
  0x25   :  { %2988 = vmatpush1.bf16.msra.mxu1 %v4885_v48  ;;  %3038 = vmatprep.subr.bf16.mxu0 %v4887_v49  ;;  %v410_v14 = vld [vmem:[#allocation2 + $0x2a8] sm:$0xff]  ;;  %v4923_v19 = vpack.c.bf16 %v403_v10, %v397_v7  ;;  %v4925_v21 = vpack.c.bf16 %v358_v13, %v352_v11  ;;  %v351_v22 = vld [vmem:[#allocation2 + $0xd0] sm:$0xff]  ;;  %v357_v23 = vld [vmem:[#allocation2 + $0x100] sm:$0xff] }
  0x26   :  { %2990 = vmatprep.subr.bf16.mxu1 %v4890_v50  ;;  %6376 = vst [vmem:[#allocation12_spill] sm:$0xff] %v4918_v18  ;;  %v409_v24 = vld [vmem:[#allocation2 + $0x2a0] sm:$0xff]  ;;  %v415_v26 = vld [vmem:[#allocation2 + $0x2d0] sm:$0xff]  ;;  %v364_v27 = vld [vmem:[#allocation2 + $0x138] sm:$0xff]  ;;  %v4933_v31 = vpack.c.bf16 %v357_v23, %v351_v22 }
  0x27   :  { %2890 = vmatmul.mubr.msk.f32.gmra.mrb[6].mxu0 %vm87_vm0, %v4861_v33  ;;  %6377 = vst [vmem:[#allocation13_spill] sm:$0xff] %v4925_v21  ;;  %v370_v28 = vld [vmem:[#allocation2 + $0x168] sm:$0xff]  ;;  %v428_v30 = vld [vmem:[#allocation2 + $0x338] sm:$0xff]  ;;  %v4938_v32 = vpack.c.bf16 %v415_v26, %v409_v24  ;;  %v363_v36 = vld [vmem:[#allocation2 + $0x130] sm:$0xff] }
  0x28   :  { %312 = vmatprep.mubr.f32.mxu0 %v6189_v0  ;;  %v422_v29 = vld [vmem:[#allocation2 + $0x308] sm:$0xff]  ;;  %6378 = vst [vmem:[#allocation14_spill] sm:$0xff] %v4933_v31  ;;  %v4940_v34 = vpack.c.bf16 %v370_v28, %v364_v27  ;;  %v369_v37 = vld [vmem:[#allocation2 + $0x160] sm:$0xff]  ;;  %v427_v40 = vld [vmem:[#allocation2 + $0x330] sm:$0xff] }
  0x29   :  { %2992 = vmatpush1.bf16.msra.mxu1 %v4896_v55  ;;  %v421_v38 = vld [vmem:[#allocation2 + $0x300] sm:$0xff]  ;;  %v376_v41 = vld [vmem:[#allocation2 + $0x198] sm:$0xff]  ;;  %v382_v42 = vld [vmem:[#allocation2 + $0x1c8] sm:$0xff]  ;;  %v4946_v45 = vpack.c.bf16 %v369_v37, %v363_v36 }
  0x2a   :  { %2994 = vmatprep.subr.bf16.mxu1 %v4900_v59  ;;  %6379 = vst [vmem:[#allocation15_spill] sm:$0xff] %v4940_v34  ;;  %v434_v43 = vld [vmem:[#allocation2 + $0x368] sm:$0xff]  ;;  %v440_v44 = vld [vmem:[#allocation2 + $0x398] sm:$0xff]  ;;  %v4950_v46 = vpack.c.bf16 %v427_v40, %v421_v38  ;;  %v4952_v47 = vpack.c.bf16 %v382_v42, %v376_v41  ;;  %v375_v51 = vld [vmem:[#allocation2 + $0x190] sm:$0xff] }
  0x2b   :  { %2891 = vmatmul.mubr.msk.f32.vlgmr.msra.gmra.mrb[8].mxu0 %vm87_vm0, %v4833_v16  ;;  %v4928_v16 = vpack.c.bf16 %v416_v15, %v410_v14  ;;  %6380 = vst [vmem:[#allocation16_spill] sm:$0xff] %v4946_v45  ;;  %v381_v52 = vld [vmem:[#allocation2 + $0x1c0] sm:$0xff]  ;;  %v4955_v54 = vpack.c.bf16 %v440_v44, %v434_v43  ;;  %v439_v56 = vld [vmem:[#allocation2 + $0x390] sm:$0xff]  ;;  %v388_v57 = vld [vmem:[#allocation2 + $0x1f8] sm:$0xff] }
  0x2c   :  { %3040 = vmatpush1.bf16.msra.mxu0 %v4905_v2  ;;  %318 = vmatprep.mubr.f32.mxu0 %v6189_v0  ;;  %6381 = vst [vmem:[#allocation17_spill] sm:$0xff] %v4950_v46  ;;  %6382 = vst [vmem:[#allocation18_spill] sm:$0xff] %v4952_v47  ;;  %v433_v53 = vld [vmem:[#allocation2 + $0x360] sm:$0xff]  ;;  %v394_v58 = vld [vmem:[#allocation2 + $0x228] sm:$0xff]  ;;  %v4958_v62 = vpack.c.bf16 %v381_v52, %v375_v51 }
  0x2d   :  { %2996 = vmatpush1.bf16.msra.mxu1 %v4908_v3  ;;  %3042 = vmatprep.subr.bf16.mxu0 %v4910_v4  ;;  %6383 = vst [vmem:[#allocation19_spill] sm:$0xff] %v4955_v54  ;;  %v446_v60 = vld [vmem:[#allocation2 + $0x3c8] sm:$0xff]  ;;  %v452_v61 = vld [vmem:[#allocation2 + $0x3f8] sm:$0xff]  ;;  %v4962_v63 = vpack.c.bf16 %v439_v56, %v433_v53  ;;  %v4964_v1 = vpack.c.bf16 %v394_v58, %v388_v57  ;;  %v387_v5 = vld [vmem:[#allocation2 + $0x1f0] sm:$0xff] }
  0x2e   :  { %2998 = vmatprep.subr.bf16.mxu1 %v4913_v9  ;;  %6384 = vst [vmem:[#allocation20_spill] sm:$0xff] %v4958_v62  ;;  %v393_v6 = vld [vmem:[#allocation2 + $0x220] sm:$0xff]  ;;  %v4967_v10 = vpack.c.bf16 %v452_v61, %v446_v60  ;;  %v451_v11 = vld [vmem:[#allocation2 + $0x3f0] sm:$0xff]  ;;  %v400_v13 = vld [vmem:[#allocation2 + $0x258] sm:$0xff] }
  0x2f   :  { %2892 = vmatmul.mubr.msk.f32.gmra.mrb[10].mxu0 %vm87_vm0, %v4861_v33  ;;  %v4943_v33 = vpack.c.bf16 %v428_v30, %v422_v29  ;;  %6385 = vst [vmem:[#allocation21_spill] sm:$0xff] %v4962_v63  ;;  %6386 = vst [vmem:[#allocation22_spill] sm:$0xff] %v4964_v1  ;;  %v445_v7 = vld [vmem:[#allocation2 + $0x3c0] sm:$0xff]  ;;  %v406_v14 = vld [vmem:[#allocation2 + $0x288] sm:$0xff]  ;;  %v4970_v23 = vpack.c.bf16 %v393_v6, %v387_v5 }
  0x30   :  { %3044 = vmatpush1.bf16.msra.mxu0 %v4918_v18  ;;  %684 = vmatprep.mubr.f32.mxu0 %v6189_v0  ;;  %6387 = vst [vmem:[#allocation23_spill] sm:$0xff] %v4967_v10  ;;  %v458_v15 = vld [vmem:[#allocation2 + $0x428] sm:$0xff]  ;;  %v464_v22 = vld [vmem:[#allocation2 + $0x458] sm:$0xff]  ;;  %v4974_v24 = vpack.c.bf16 %v451_v11, %v445_v7  ;;  %v4976_v26 = vpack.c.bf16 %v406_v14, %v400_v13  ;;  %v399_v27 = vld [vmem:[#allocation2 + $0x250] sm:$0xff] }
  0x31   :  { %3000 = vmatpush1.bf16.msra.mxu1 %v4923_v19  ;;  %3046 = vmatprep.subr.bf16.mxu0 %v4925_v21  ;;  %6388 = vst [vmem:[#allocation24_spill] sm:$0xff] %v4970_v23  ;;  %v405_v28 = vld [vmem:[#allocation2 + $0x280] sm:$0xff]  ;;  %v4979_v30 = vpack.c.bf16 %v464_v22, %v458_v15  ;;  %v463_v36 = vld [vmem:[#allocation2 + $0x450] sm:$0xff]  ;;  %v412_v37 = vld [vmem:[#allocation2 + $0x2b8] sm:$0xff] }
  0x32   :  { %3002 = vmatprep.subr.bf16.mxu1 %v4928_v16  ;;  %6389 = vst [vmem:[#allocation25_spill] sm:$0xff] %v4974_v24  ;;  %6390 = vst [vmem:[#allocation26_spill] sm:$0xff] %v4976_v26  ;;  %v457_v29 = vld [vmem:[#allocation2 + $0x420] sm:$0xff]  ;;  %v418_v38 = vld [vmem:[#allocation2 + $0x2e8] sm:$0xff]  ;;  %v4982_v42 = vpack.c.bf16 %v405_v28, %v399_v27 }
  0x33   :  { %6391 = vst [vmem:[#allocation27_spill] sm:$0xff] %v4979_v30  ;;  %v470_v40 = vld [vmem:[#allocation2 + $0x488] sm:$0xff]  ;;  %v476_v41 = vld [vmem:[#allocation2 + $0x4b8] sm:$0xff]  ;;  %v4986_v43 = vpack.c.bf16 %v463_v36, %v457_v29  ;;  %v4988_v44 = vpack.c.bf16 %v418_v38, %v412_v37  ;;  %v411_v51 = vld [vmem:[#allocation2 + $0x2b0] sm:$0xff] }
  0x34   :  { %3048 = vmatpush1.bf16.msra.mxu0 %v4933_v31  ;;  %6392 = vst [vmem:[#allocation28_spill] sm:$0xff] %v4982_v42  ;;  %v417_v52 = vld [vmem:[#allocation2 + $0x2e0] sm:$0xff]  ;;  %v4991_v56 = vpack.c.bf16 %v476_v41, %v470_v40  ;;  %v475_v57 = vld [vmem:[#allocation2 + $0x4b0] sm:$0xff]  ;;  %v424_v58 = vld [vmem:[#allocation2 + $0x318] sm:$0xff] }
  0x35   :  { %3004 = vmatpush1.bf16.msra.mxu1 %v4938_v32  ;;  %3050 = vmatprep.subr.bf16.mxu0 %v4940_v34  ;;  %6393 = vst [vmem:[#allocation29_spill] sm:$0xff] %v4986_v43  ;;  %6394 = vst [vmem:[#allocation30_spill] sm:$0xff] %v4988_v44  ;;  %v469_v53 = vld [vmem:[#allocation2 + $0x480] sm:$0xff]  ;;  %v430_v60 = vld [vmem:[#allocation2 + $0x348] sm:$0xff]  ;;  %v4994_v6 = vpack.c.bf16 %v417_v52, %v411_v51 }
  0x36   :  { %3006 = vmatprep.subr.bf16.mxu1 %v4943_v33  ;;  %6395 = vst [vmem:[#allocation31_spill] sm:$0xff] %v4991_v56  ;;  %v482_v61 = vld [vmem:[#allocation2 + $0x4e8] sm:$0xff]  ;;  %v488_v5 = vld [vmem:[#allocation2 + $0x518] sm:$0xff]  ;;  %v4998_v7 = vpack.c.bf16 %v475_v57, %v469_v53  ;;  %v5000_v11 = vpack.c.bf16 %v430_v60, %v424_v58  ;;  %v423_v13 = vld [vmem:[#allocation2 + $0x310] sm:$0xff] }
  0x37   :  { %6396 = vst [vmem:[#allocation32_spill] sm:$0xff] %v4994_v6  ;;  %v429_v14 = vld [vmem:[#allocation2 + $0x340] sm:$0xff]  ;;  %v5003_v22 = vpack.c.bf16 %v488_v5, %v482_v61  ;;  %v487_v27 = vld [vmem:[#allocation2 + $0x510] sm:$0xff]  ;;  %v436_v28 = vld [vmem:[#allocation2 + $0x378] sm:$0xff] }
  0x38   :  { %3052 = vmatpush1.bf16.msra.mxu0 %v4946_v45  ;;  %6397 = vst [vmem:[#allocation33_spill] sm:$0xff] %v4998_v7  ;;  %6398 = vst [vmem:[#allocation34_spill] sm:$0xff] %v5000_v11  ;;  %v481_v15 = vld [vmem:[#allocation2 + $0x4e0] sm:$0xff]  ;;  %v442_v29 = vld [vmem:[#allocation2 + $0x3a8] sm:$0xff]  ;;  %v5006_v38 = vpack.c.bf16 %v429_v14, %v423_v13 }
  0x39   :  { %3008 = vmatpush1.bf16.msra.mxu1 %v4950_v46  ;;  %3054 = vmatprep.subr.bf16.mxu0 %v4952_v47  ;;  %6399 = vst [vmem:[#allocation35_spill] sm:$0xff] %v5003_v22  ;;  %v494_v36 = vld [vmem:[#allocation2 + $0x548] sm:$0xff]  ;;  %v500_v37 = vld [vmem:[#allocation2 + $0x578] sm:$0xff]  ;;  %v5010_v40 = vpack.c.bf16 %v487_v27, %v481_v15  ;;  %v5012_v41 = vpack.c.bf16 %v442_v29, %v436_v28  ;;  %v435_v51 = vld [vmem:[#allocation2 + $0x370] sm:$0xff] }
  0x3a   :  { %3010 = vmatprep.subr.bf16.mxu1 %v4955_v54  ;;  %6400 = vst [vmem:[#allocation36_spill] sm:$0xff] %v5006_v38  ;;  %v441_v52 = vld [vmem:[#allocation2 + $0x3a0] sm:$0xff]  ;;  %v5015_v57 = vpack.c.bf16 %v500_v37, %v494_v36  ;;  %v499_v58 = vld [vmem:[#allocation2 + $0x570] sm:$0xff]  ;;  %v448_v60 = vld [vmem:[#allocation2 + $0x3d8] sm:$0xff] }
  0x3b   :  { %6401 = vst [vmem:[#allocation37_spill] sm:$0xff] %v5010_v40  ;;  %6402 = vst [vmem:[#allocation38_spill] sm:$0xff] %v5012_v41  ;;  %v493_v53 = vld [vmem:[#allocation2 + $0x540] sm:$0xff]  ;;  %v454_v61 = vld [vmem:[#allocation2 + $0x408] sm:$0xff]  ;;  %v5018_v14 = vpack.c.bf16 %v441_v52, %v435_v51 }
  0x3c   :  { %3056 = vmatpush1.bf16.msra.mxu0 %v4958_v62  ;;  %6403 = vst [vmem:[#allocation39_spill] sm:$0xff] %v5015_v57  ;;  %v506_v5 = vld [vmem:[#allocation2 + $0x5a8] sm:$0xff]  ;;  %v512_v13 = vld [vmem:[#allocation2 + $0x5d8] sm:$0xff]  ;;  %v5022_v15 = vpack.c.bf16 %v499_v58, %v493_v53  ;;  %v5024_v27 = vpack.c.bf16 %v454_v61, %v448_v60  ;;  %v447_v28 = vld [vmem:[#allocation2 + $0x3d0] sm:$0xff] }
  0x3d   :  { %3012 = vmatpush1.bf16.msra.mxu1 %v4962_v63  ;;  %3058 = vmatprep.subr.bf16.mxu0 %v4964_v1  ;;  %6404 = vst [vmem:[#allocation40_spill] sm:$0xff] %v5018_v14  ;;  %v453_v29 = vld [vmem:[#allocation2 + $0x400] sm:$0xff]  ;;  %v5027_v37 = vpack.c.bf16 %v512_v13, %v506_v5  ;;  %v511_v0 = vld [vmem:[#allocation2 + $0x5d0] sm:$0xff]  ;;  %v330_v51 = vld [vmem:[#allocation2 + $0x28] sm:$0xff] }
  0x3e   :  { %3014 = vmatprep.subr.bf16.mxu1 %v4967_v10  ;;  %6405 = vst [vmem:[#allocation41_spill] sm:$0xff] %v5022_v15  ;;  %6406 = vst [vmem:[#allocation42_spill] sm:$0xff] %v5024_v27  ;;  %v505_v36 = vld [vmem:[#allocation2 + $0x5a0] sm:$0xff]  ;;  %v336_v52 = vld [vmem:[#allocation2 + $0x58] sm:$0xff] }
  0x3f   :  { %6407 = vst [vmem:[#allocation43_spill] sm:$0xff] %v5027_v37  ;;  %v5034_v53 = vpack.c.bf16 %v511_v0, %v505_v36  ;;  %v459_v60 = vld [vmem:[#allocation2 + $0x430] sm:$0xff]  ;;  %v465_v61 = vld [vmem:[#allocation2 + $0x460] sm:$0xff]  ;;  %v5039_v13 = vpack.c.bf16 %v336_v52, %v330_v51 }
  0x40   :  { %3060 = vmatpush1.bf16.msra.mxu0 %v4970_v23  ;;  %v329_v5 = vld [vmem:[#allocation2 + $0x20] sm:$0xff]  ;;  %v6416_v23 = vmov 0.0   ;;  %v359_v1 = vld [vmem:[#allocation2 + $0x110] sm:$0xff] }
  0x41   :  { %3016 = vmatpush1.bf16.msra.mxu1 %v4974_v24  ;;  %3062 = vmatprep.subr.bf16.mxu0 %v4976_v26  ;;  %6409 = vst [vmem:[#allocation45_spill] sm:$0xff] %v5034_v53  ;;  %6411 = vst [vmem:[#allocation47_spill] sm:$0xff] %v5039_v13  ;;  %v477_v36 = vld [vmem:[#allocation2 + $0x4c0] sm:$0xff]  ;;  %v484_v26 = vld [vmem:[#allocation2 + $0x4f8] sm:$0xff] }
  0x42   :  { %3018 = vmatprep.subr.bf16.mxu1 %v4979_v30  ;;  %v341_v51 = vld [vmem:[#allocation2 + $0x80] sm:$0xff] }
  0x44   :  { %3064 = vmatpush1.bf16.msra.mxu0 %v4982_v42  ;;  %v5042_v42 = vpack.c.bf16 %v465_v61, %v459_v60  ;;  %v354_v60 = vld [vmem:[#allocation2 + $0xe8] sm:$0xff]  ;;  %v360_v61 = vld [vmem:[#allocation2 + $0x118] sm:$0xff] }
  0x45   :  { %3020 = vmatpush1.bf16.msra.mxu1 %v4986_v43  ;;  %3066 = vmatprep.subr.bf16.mxu0 %v4988_v44  ;;  %v472_v44 = vld [vmem:[#allocation2 + $0x498] sm:$0xff] }
  0x46   :  { %3022 = vmatprep.subr.bf16.mxu1 %v4991_v56  ;;  %6412 = vst [vmem:[#allocation48_spill] sm:$0xff] %v5042_v42 }
  0x48   :  { %3068 = vmatpush1.bf16.msra.mxu0 %v4994_v6  ;;  %v5030_v6 = vpack.c.bf16 %v453_v29, %v447_v28  ;;  %v342_v28 = vld [vmem:[#allocation2 + $0x88] sm:$0xff]  ;;  %v348_v29 = vld [vmem:[#allocation2 + $0xb8] sm:$0xff] }
  0x49   :  { %3024 = vmatpush1.bf16.msra.mxu1 %v4998_v7  ;;  %3070 = vmatprep.subr.bf16.mxu0 %v5000_v11  ;;  %v460_v11 = vld [vmem:[#allocation2 + $0x438] sm:$0xff]  ;;  %v5051_v52 = vpack.c.bf16 %v348_v29, %v342_v28  ;;  %v489_v28 = vld [vmem:[#allocation2 + $0x520] sm:$0xff] }
  0x4a   :  { %3026 = vmatprep.subr.bf16.mxu1 %v5003_v22  ;;  %6408 = vst [vmem:[#allocation44_spill] sm:$0xff] %v5030_v6  ;;  %v353_v29 = vld [vmem:[#allocation2 + $0xe0] sm:$0xff] }
  0x4b   :  { %6415 = vst [vmem:[#allocation51_spill] sm:$0xff] %v5051_v52 }
  0x4c   :  { %3072 = vmatpush1.bf16.msra.mxu0 %v5006_v38  ;;  %v466_v38 = vld [vmem:[#allocation2 + $0x468] sm:$0xff] }
  0x4d   :  { %3028 = vmatpush1.bf16.msra.mxu1 %v5010_v40  ;;  %3074 = vmatprep.subr.bf16.mxu0 %v5012_v41  ;;  %v5036_v58 = vpack.c.bf16 %v466_v38, %v460_v11  ;;  %v335_v41 = vld [vmem:[#allocation2 + $0x50] sm:$0xff] }
  0x4e   :  { %3030 = vmatprep.subr.bf16.mxu1 %v5015_v57  ;;  %v5046_v0 = vpack.c.bf16 %v335_v41, %v329_v5  ;;  %v471_v38 = vld [vmem:[#allocation2 + $0x490] sm:$0xff] }
  0x4f   :  { %6410 = vst [vmem:[#allocation46_spill] sm:$0xff] %v5036_v58  ;;  %v5055_v41 = vpack.c.bf16 %v477_v36, %v471_v38  ;;  %v483_v5 = vld [vmem:[#allocation2 + $0x4f0] sm:$0xff]  ;;  %v366_v38 = vld [vmem:[#allocation2 + $0x148] sm:$0xff]  ;;  %v372_v36 = vld [vmem:[#allocation2 + $0x178] sm:$0xff] }
  0x50   :  { %3076 = vmatpush1.bf16.msra.mxu0 %v5018_v14  ;;  %v478_v14 = vld [vmem:[#allocation2 + $0x4c8] sm:$0xff]  ;;  %6413 = vst [vmem:[#allocation49_spill] sm:$0xff] %v5046_v0 }
  0x51   :  { %3032 = vmatpush1.bf16.msra.mxu1 %v5022_v15  ;;  %3078 = vmatprep.subr.bf16.mxu0 %v5024_v27  ;;  %v5048_v11 = vpack.c.bf16 %v478_v14, %v472_v44  ;;  %v347_v27 = vld [vmem:[#allocation2 + $0xb0] sm:$0xff]  ;;  %6417 = vst [vmem:[#allocation52_spill] sm:$0xff] %v5055_v41 }
  0x52   :  { %3034 = vmatprep.subr.bf16.mxu1 %v5027_v37  ;;  %v5059_v44 = vpack.c.bf16 %v347_v27, %v341_v51  ;;  %v5068_v27 = vpack.c.bf16 %v489_v28, %v483_v5  ;;  %v495_v51 = vld [vmem:[#allocation2 + $0x550] sm:$0xff]  ;;  %v378_v5 = vld [vmem:[#allocation2 + $0x1a8] sm:$0xff]  ;;  %v384_v28 = vld [vmem:[#allocation2 + $0x1d8] sm:$0xff] }
  0x53   :  { %6414 = vst [vmem:[#allocation50_spill] sm:$0xff] %v5048_v11 }
  0x54   :  { %3080 = vmatpush1.bf16.msra.mxu0 %v5030_v6  ;;  %v490_v6 = vld [vmem:[#allocation2 + $0x528] sm:$0xff]  ;;  %6418 = vst [vmem:[#allocation53_spill] sm:$0xff] %v5059_v44  ;;  %6421 = vst [vmem:[#allocation56_spill] sm:$0xff] %v5068_v27 }
  0x55   :  { %3036 = vmatpush1.bf16.msra.mxu1 %v5034_v53  ;;  %3082 = vmatprep.subr.bf16.mxu0 %v5036_v58  ;;  %v5061_v14 = vpack.c.bf16 %v490_v6, %v484_v26  ;;  %v5064_v58 = vpack.c.bf16 %v360_v61, %v354_v60  ;;  %v5072_v26 = vpack.c.bf16 %v359_v1, %v353_v29  ;;  %v501_v60 = vld [vmem:[#allocation2 + $0x580] sm:$0xff] }
  0x56   :  { %3102 = vmatprep.subr.bf16.mxu1 %v5039_v13  ;;  %v496_v13 = vld [vmem:[#allocation2 + $0x558] sm:$0xff]  ;;  %v365_v61 = vld [vmem:[#allocation2 + $0x140] sm:$0xff] }
  0x57   :  { %6419 = vst [vmem:[#allocation54_spill] sm:$0xff] %v5061_v14  ;;  %6420 = vst [vmem:[#allocation55_spill] sm:$0xff] %v5064_v58  ;;  %v513_v29 = vld [vmem:[#allocation2 + $0x5e0] sm:$0xff] }
  0x58   :  { %614 = vmatmul.mubr.f32.vlgmr.msra.gmra.mrb[0].mxu1 %v6416_v23  ;;  %3084 = vmatpush1.bf16.msra.mxu0 %v5042_v42  ;;  %v502_v42 = vld [vmem:[#allocation2 + $0x588] sm:$0xff] }
  0x59   :  { %3104 = vmatpush1.bf16.msra.mxu1 %v5046_v0  ;;  %3086 = vmatprep.subr.bf16.mxu0 %v5048_v11  ;;  %v5074_v6 = vpack.c.bf16 %v502_v42, %v496_v13  ;;  %v371_v0 = vld [vmem:[#allocation2 + $0x170] sm:$0xff]  ;;  %v508_v11 = vld [vmem:[#allocation2 + $0x5b8] sm:$0xff] }
  0x5a   :  { %3106 = vmatprep.subr.bf16.mxu1 %v5051_v52  ;;  %755 = vmatprep.mubr.f32.mxu1 %v6416_v23  ;;  %v5077_v52 = vpack.c.bf16 %v372_v36, %v366_v38  ;;  %v5084_v1 = vpack.c.bf16 %v371_v0, %v365_v61  ;;  %v507_v13 = vld [vmem:[#allocation2 + $0x5b0] sm:$0xff]  ;;  %v5089_v38 = vpack.c.bf16 %v384_v28, %v378_v5  ;;  %v377_v36 = vld [vmem:[#allocation2 + $0x1a0] sm:$0xff]  ;;  %v402_v61 = vld [vmem:[#allocation2 + $0x268] sm:$0xff] }
  0x5b   :  { %6422 = vst [vmem:[#allocation57_spill] sm:$0xff] %v5074_v6  ;;  %v408_v5 = vld [vmem:[#allocation2 + $0x298] sm:$0xff] }
  0x5c   :  { %3088 = vmatpush1.bf16.msra.mxu0 %v5055_v41  ;;  %v514_v41 = vld [vmem:[#allocation2 + $0x5e8] sm:$0xff] }
  0x5d   :  { %3108 = vmatpush1.bf16.msra.mxu1 %v5059_v44  ;;  %3090 = vmatprep.subr.bf16.mxu0 %v5061_v14  ;;  %v5080_v44 = vpack.c.bf16 %v501_v60, %v495_v51  ;;  %v5086_v42 = vpack.c.bf16 %v514_v41, %v508_v11  ;;  %v390_v14 = vld [vmem:[#allocation2 + $0x208] sm:$0xff]  ;;  %v5092_v51 = vpack.c.bf16 %v513_v29, %v507_v13  ;;  %v389_v41 = vld [vmem:[#allocation2 + $0x200] sm:$0xff]  ;;  %v395_v60 = vld [vmem:[#allocation2 + $0x230] sm:$0xff] }
  0x5e   :  { %3110 = vmatprep.subr.bf16.mxu1 %v5064_v58  ;;  %v383_v58 = vld [vmem:[#allocation2 + $0x1d0] sm:$0xff]  ;;  %v5103_v28 = vpack.c.bf16 %v395_v60, %v389_v41  ;;  %v401_v13 = vld [vmem:[#allocation2 + $0x260] sm:$0xff] }
  0x5f   :  { %6423 = vst [vmem:[#allocation58_spill] sm:$0xff] %v5080_v44  ;;  %6424 = vst [vmem:[#allocation59_spill] sm:$0xff] %v5086_v42  ;;  %v5096_v0 = vpack.c.bf16 %v383_v58, %v377_v36  ;;  %v5107_v58 = vpack.c.bf16 %v408_v5, %v402_v61  ;;  %v407_v29 = vld [vmem:[#allocation2 + $0x290] sm:$0xff]  ;;  %v413_v60 = vld [vmem:[#allocation2 + $0x2c0] sm:$0xff] }
  0x60   :  { %3092 = vmatpush1.bf16.msra.mxu0 %v5068_v27  ;;  %v396_v27 = vld [vmem:[#allocation2 + $0x238] sm:$0xff]  ;;  %6425 = vst [vmem:[#allocation60_spill] sm:$0xff] %v5092_v51  ;;  %6428 = vst [vmem:[#allocation63_spill] sm:$0xff] %v5103_v28  ;;  %v5112_v36 = vpack.c.bf16 %v407_v29, %v401_v13  ;;  %v419_v61 = vld [vmem:[#allocation2 + $0x2f0] sm:$0xff] }
  0x61   :  { %3112 = vmatpush1.bf16.msra.mxu1 %v5072_v26  ;;  %3094 = vmatprep.subr.bf16.mxu0 %v5074_v6  ;;  %6426 = vst [vmem:[#allocation61_spill] sm:$0xff] %v5096_v0  ;;  %v5099_v11 = vpack.c.bf16 %v396_v27, %v390_v14  ;;  %6429 = vst [vmem:[#allocation64_spill] sm:$0xff] %v5107_v58  ;;  %v414_v14 = vld [vmem:[#allocation2 + $0x2c8] sm:$0xff]  ;;  %v420_v27 = vld [vmem:[#allocation2 + $0x2f8] sm:$0xff] }
  0x62   :  { %3114 = vmatprep.subr.bf16.mxu1 %v5077_v52  ;;  %6430 = vst [vmem:[#allocation65_spill] sm:$0xff] %v5112_v36  ;;  %v5116_v41 = vpack.c.bf16 %v420_v27, %v414_v14  ;;  %v426_v5 = vld [vmem:[#allocation2 + $0x328] sm:$0xff]  ;;  %v425_v29 = vld [vmem:[#allocation2 + $0x320] sm:$0xff]  ;;  %v444_v27 = vld [vmem:[#allocation2 + $0x3b8] sm:$0xff] }
  0x63   :  { %6427 = vst [vmem:[#allocation62_spill] sm:$0xff] %v5099_v11  ;;  %v438_v14 = vld [vmem:[#allocation2 + $0x388] sm:$0xff] }
  0x64   :  { %3096 = vmatpush1.bf16.msra.mxu0 %v5080_v44  ;;  %6431 = vst [vmem:[#allocation66_spill] sm:$0xff] %v5116_v41 }
  0x65   :  { %3116 = vmatpush1.bf16.msra.mxu1 %v5084_v1  ;;  %3098 = vmatprep.subr.bf16.mxu0 %v5086_v42 }
  0x66   :  { %3118 = vmatprep.subr.bf16.mxu1 %v5089_v38 }
  0x68   :  { %3100 = vmatpush1.bf16.msra.mxu0 %v5092_v51 }
  0x69   :  { %3120 = vmatpush1.bf16.msra.mxu1 %v5096_v0  ;;  %3166 = vmatprep.subr.bf16.mxu0 %v4825_v8  ;;  %v5120_v0 = vpack.c.bf16 %v419_v61, %v413_v60  ;;  %v5132_v60 = vpack.c.bf16 %v444_v27, %v438_v14  ;;  %v437_v61 = vld [vmem:[#allocation2 + $0x380] sm:$0xff]  ;;  %v462_v14 = vld [vmem:[#allocation2 + $0x448] sm:$0xff]  ;;  %v468_v27 = vld [vmem:[#allocation2 + $0x478] sm:$0xff] }
  0x6a   :  { %3122 = vmatprep.subr.bf16.mxu1 %v5099_v11  ;;  %v432_v11 = vld [vmem:[#allocation2 + $0x358] sm:$0xff] }
  0x6b   :  { %685 = vmatmul.mubr.f32.vlgmr.msra.gmra.mrb[12].mxu0 %v6416_v23  ;;  %6432 = vst [vmem:[#allocation67_spill] sm:$0xff] %v5120_v0  ;;  %v5124_v13 = vpack.c.bf16 %v432_v11, %v426_v5  ;;  %6435 = vst [vmem:[#allocation70_spill] sm:$0xff] %v5132_v60  ;;  %v450_v11 = vld [vmem:[#allocation2 + $0x3e8] sm:$0xff]  ;;  %v456_v5 = vld [vmem:[#allocation2 + $0x418] sm:$0xff] }
  0x6c   :  { %3168 = vmatpush1.bf16.msra.mxu0 %v4827_v12 }
  0x6d   :  { %3124 = vmatpush1.bf16.msra.mxu1 %v5103_v28  ;;  %3170 = vmatprep.subr.bf16.mxu0 %v4835_v17  ;;  %6433 = vst [vmem:[#allocation68_spill] sm:$0xff] %v5124_v13 }
  0x6e   :  { %3126 = vmatprep.subr.bf16.mxu1 %v5107_v58  ;;  %v431_v58 = vld [vmem:[#allocation2 + $0x350] sm:$0xff] }
  0x6f   :  { %v5128_v28 = vpack.c.bf16 %v431_v58, %v425_v29  ;;  %v5140_v58 = vpack.c.bf16 %v456_v5, %v450_v11  ;;  %v449_v29 = vld [vmem:[#allocation2 + $0x3e0] sm:$0xff]  ;;  %v474_v11 = vld [vmem:[#allocation2 + $0x4a8] sm:$0xff]  ;;  %v480_v5 = vld [vmem:[#allocation2 + $0x4d8] sm:$0xff] }
  0x70   :  { %3172 = vmatpush1.bf16.msra.mxu0 %v4841_v20 }
  0x71   :  { %3128 = vmatpush1.bf16.msra.mxu1 %v5112_v36  ;;  %3174 = vmatprep.subr.bf16.mxu0 %v4847_v25  ;;  %6434 = vst [vmem:[#allocation69_spill] sm:$0xff] %v5128_v28  ;;  %6437 = vst [vmem:[#allocation72_spill] sm:$0xff] %v5140_v58 }
  0x72   :  { %3130 = vmatprep.subr.bf16.mxu1 %v5116_v41  ;;  %v443_v41 = vld [vmem:[#allocation2 + $0x3b0] sm:$0xff] }
  0x73   :  { %v5136_v36 = vpack.c.bf16 %v443_v41, %v437_v61  ;;  %v5148_v41 = vpack.c.bf16 %v468_v27, %v462_v14  ;;  %v461_v61 = vld [vmem:[#allocation2 + $0x440] sm:$0xff]  ;;  %v486_v14 = vld [vmem:[#allocation2 + $0x508] sm:$0xff]  ;;  %v492_v27 = vld [vmem:[#allocation2 + $0x538] sm:$0xff] }
  0x74   :  { %3176 = vmatpush1.bf16.msra.mxu0 %v4867_v35 }
  0x75   :  { %3132 = vmatpush1.bf16.msra.mxu1 %v5120_v0  ;;  %3178 = vmatprep.subr.bf16.mxu0 %v4879_v39  ;;  %6436 = vst [vmem:[#allocation71_spill] sm:$0xff] %v5136_v36  ;;  %6439 = vst [vmem:[#allocation74_spill] sm:$0xff] %v5148_v41 }
  0x76   :  { %3134 = vmatprep.subr.bf16.mxu1 %v5124_v13  ;;  %v455_v13 = vld [vmem:[#allocation2 + $0x410] sm:$0xff] }
  0x77   :  { %v5144_v0 = vpack.c.bf16 %v455_v13, %v449_v29  ;;  %v5156_v13 = vpack.c.bf16 %v480_v5, %v474_v11  ;;  %v473_v29 = vld [vmem:[#allocation2 + $0x4a0] sm:$0xff]  ;;  %v498_v11 = vld [vmem:[#allocation2 + $0x568] sm:$0xff]  ;;  %v504_v5 = vld [vmem:[#allocation2 + $0x598] sm:$0xff] }
  0x78   :  { %3180 = vmatpush1.bf16.msra.mxu0 %v4885_v48 }
  0x79   :  { %3136 = vmatpush1.bf16.msra.mxu1 %v5128_v28  ;;  %3182 = vmatprep.subr.bf16.mxu0 %v4890_v50  ;;  %6438 = vst [vmem:[#allocation73_spill] sm:$0xff] %v5144_v0  ;;  %6441 = vst [vmem:[#allocation76_spill] sm:$0xff] %v5156_v13 }
  0x7a   :  { %3138 = vmatprep.subr.bf16.mxu1 %v5132_v60  ;;  %v467_v60 = vld [vmem:[#allocation2 + $0x470] sm:$0xff] }
  0x7b   :  { %v5152_v28 = vpack.c.bf16 %v467_v60, %v461_v61  ;;  %v5164_v60 = vpack.c.bf16 %v492_v27, %v486_v14  ;;  %v485_v61 = vld [vmem:[#allocation2 + $0x500] sm:$0xff]  ;;  %v510_v14 = vld [vmem:[#allocation2 + $0x5c8] sm:$0xff]  ;;  %v516_v27 = vld [vmem:[#allocation2 + $0x5f8] sm:$0xff] }
  0x7c   :  { %3184 = vmatpush1.bf16.msra.mxu0 %v4896_v55 }
  0x7d   :  { %3140 = vmatpush1.bf16.msra.mxu1 %v5136_v36  ;;  %3186 = vmatprep.subr.bf16.mxu0 %v4900_v59  ;;  %6440 = vst [vmem:[#allocation75_spill] sm:$0xff] %v5152_v28  ;;  %6443 = vst [vmem:[#allocation78_spill] sm:$0xff] %v5164_v60 }
  0x7e   :  { %3142 = vmatprep.subr.bf16.mxu1 %v5140_v58  ;;  %v479_v58 = vld [vmem:[#allocation2 + $0x4d0] sm:$0xff] }
  0x7f   :  { %v5160_v36 = vpack.c.bf16 %v479_v58, %v473_v29  ;;  %v5172_v58 = vpack.c.bf16 %v504_v5, %v498_v11  ;;  %v497_v29 = vld [vmem:[#allocation2 + $0x560] sm:$0xff]  ;;  %v6452_v5 = vld [vmem:[#allocation26_spill] sm:$0xff] }
  0x80   :  { %3188 = vmatpush1.bf16.msra.mxu0 %v4908_v3 }
  0x81   :  { %3144 = vmatpush1.bf16.msra.mxu1 %v5144_v0  ;;  %3190 = vmatprep.subr.bf16.mxu0 %v4913_v9  ;;  %6442 = vst [vmem:[#allocation77_spill] sm:$0xff] %v5160_v36  ;;  %6445 = vst [vmem:[#allocation80_spill] sm:$0xff] %v5172_v58 }
  0x82   :  { %3146 = vmatprep.subr.bf16.mxu1 %v5148_v41  ;;  %v491_v41 = vld [vmem:[#allocation2 + $0x530] sm:$0xff] }
  0x83   :  { %v5168_v0 = vpack.c.bf16 %v491_v41, %v485_v61  ;;  %v5180_v41 = vpack.c.bf16 %v516_v27, %v510_v14  ;;  %v509_v61 = vld [vmem:[#allocation2 + $0x5c0] sm:$0xff]  ;;  %v6454_v14 = vld [vmem:[#allocation30_spill] sm:$0xff] }
  0x84   :  { %3192 = vmatpush1.bf16.msra.mxu0 %v4923_v19  ;;  %v6455_v27 = vld [vmem:[#allocation32_spill] sm:$0xff] }
  0x85   :  { %3148 = vmatpush1.bf16.msra.mxu1 %v5152_v28  ;;  %3194 = vmatprep.subr.bf16.mxu0 %v4928_v16  ;;  %6444 = vst [vmem:[#allocation79_spill] sm:$0xff] %v5168_v0  ;;  %6447 = vst [vmem:[#allocation82_spill] sm:$0xff] %v5180_v41 }
  0x86   :  { %3150 = vmatprep.subr.bf16.mxu1 %v5156_v13  ;;  %v503_v13 = vld [vmem:[#allocation2 + $0x590] sm:$0xff] }
  0x87   :  { %v5176_v28 = vpack.c.bf16 %v503_v13, %v497_v29  ;;  %v6450_v13 = vld [vmem:[#allocation22_spill] sm:$0xff]  ;;  %v6453_v29 = vld [vmem:[#allocation28_spill] sm:$0xff] }
  0x88   :  { %3196 = vmatpush1.bf16.msra.mxu0 %v4938_v32 }
  0x89   :  { %3152 = vmatpush1.bf16.msra.mxu1 %v5160_v36  ;;  %3198 = vmatprep.subr.bf16.mxu0 %v4943_v33  ;;  %6446 = vst [vmem:[#allocation81_spill] sm:$0xff] %v5176_v28 }
  0x8a   :  { %3154 = vmatprep.subr.bf16.mxu1 %v5164_v60  ;;  %v515_v60 = vld [vmem:[#allocation2 + $0x5f0] sm:$0xff] }
  0x8b   :  { %v5184_v11 = vpack.c.bf16 %v515_v60, %v509_v61  ;;  %v6451_v60 = vld [vmem:[#allocation24_spill] sm:$0xff]  ;;  %v6456_v61 = vld [vmem:[#allocation34_spill] sm:$0xff] }
  0x8c   :  { %3200 = vmatpush1.bf16.msra.mxu0 %v4950_v46 }
  0x8d   :  { %3156 = vmatpush1.bf16.msra.mxu1 %v5168_v0  ;;  %3202 = vmatprep.subr.bf16.mxu0 %v4955_v54  ;;  %6448 = vst [vmem:[#allocation83_spill] sm:$0xff] %v5184_v11 }
  0x8e   :  { %3158 = vmatprep.subr.bf16.mxu1 %v5172_v58 }
  0x90   :  { %3204 = vmatpush1.bf16.msra.mxu0 %v4962_v63 }
  0x91   :  { %3160 = vmatpush1.bf16.msra.mxu1 %v5176_v28  ;;  %3206 = vmatprep.subr.bf16.mxu0 %v4967_v10 }
  0x92   :  { %3162 = vmatprep.subr.bf16.mxu1 %v5180_v41 }
  0x94   :  { %3208 = vmatpush1.bf16.msra.mxu0 %v4974_v24 }
  0x95   :  { %3164 = vmatpush1.bf16.msra.mxu1 %v5184_v11  ;;  %3210 = vmatprep.subr.bf16.mxu0 %v4979_v30 }
  0x96   :  { %3230 = vmatprep.subr.bf16.mxu1 %v4887_v49 }
  0x98   :  { %756 = vmatmul.mubr.f32.vlgmr.msra.gmra.mrb[2].mxu1 %v6416_v23  ;;  %3212 = vmatpush1.bf16.msra.mxu0 %v4986_v43  ;;  %v6449_v23 = vld [vmem:[#allocation47_spill] sm:$0xff] }
  0x99   :  { %3232 = vmatpush1.bf16.msra.mxu1 %v4905_v2  ;;  %3214 = vmatprep.subr.bf16.mxu0 %v4991_v56 }
  0x9a   :  { %3234 = vmatprep.subr.bf16.mxu1 %v4910_v4 }
  0x9c   :  { %3216 = vmatpush1.bf16.msra.mxu0 %v4998_v7 }
  0x9d   :  { %3236 = vmatpush1.bf16.msra.mxu1 %v4918_v18  ;;  %3218 = vmatprep.subr.bf16.mxu0 %v5003_v22 }
  0x9e   :  { %3238 = vmatprep.subr.bf16.mxu1 %v4925_v21 }
  0xa0   :  { %3220 = vmatpush1.bf16.msra.mxu0 %v5010_v40 }
  0xa1   :  { %3240 = vmatpush1.bf16.msra.mxu1 %v4933_v31  ;;  %3222 = vmatprep.subr.bf16.mxu0 %v5015_v57 }
  0xa2   :  { %3242 = vmatprep.subr.bf16.mxu1 %v4940_v34  ;;  %v6460_v34 = vld [vmem:[#allocation42_spill] sm:$0xff] }
  0xa4   :  { %3224 = vmatpush1.bf16.msra.mxu0 %v5022_v15 }
  0xa5   :  { %3244 = vmatpush1.bf16.msra.mxu1 %v4946_v45  ;;  %3226 = vmatprep.subr.bf16.mxu0 %v5027_v37  ;;  %v6458_v45 = vld [vmem:[#allocation38_spill] sm:$0xff] }
  0xa6   :  { %3246 = vmatprep.subr.bf16.mxu1 %v4952_v47  ;;  %v6457_v47 = vld [vmem:[#allocation36_spill] sm:$0xff] }
  0xa8   :  { %3228 = vmatpush1.bf16.msra.mxu0 %v5034_v53 }
  0xa9   :  { %3248 = vmatpush1.bf16.msra.mxu1 %v4958_v62  ;;  %3294 = vmatprep.subr.bf16.mxu0 %v6449_v23  ;;  %v6459_v62 = vld [vmem:[#allocation40_spill] sm:$0xff] }
  0xaa   :  { %3250 = vmatprep.subr.bf16.mxu1 %v6450_v13  ;;  %v6461_v13 = vld [vmem:[#allocation44_spill] sm:$0xff] }
  0xad   :  { %3252 = vmatpush1.bf16.msra.mxu1 %v6451_v60  ;;  %v6462_v60 = vld [vmem:[#allocation46_spill] sm:$0xff] }
  0xae   :  { %3254 = vmatprep.subr.bf16.mxu1 %v6452_v5  ;;  %v6463_v5 = vld [vmem:[#allocation48_spill] sm:$0xff] }
  0xb1   :  { %3256 = vmatpush1.bf16.msra.mxu1 %v6453_v29  ;;  %v6464_v29 = vld [vmem:[#allocation50_spill] sm:$0xff] }
  0xb2   :  { %3258 = vmatprep.subr.bf16.mxu1 %v6454_v14  ;;  %v6465_v14 = vld [vmem:[#allocation52_spill] sm:$0xff] }
  0xb5   :  { %3260 = vmatpush1.bf16.msra.mxu1 %v6455_v27  ;;  %v6466_v27 = vld [vmem:[#allocation54_spill] sm:$0xff] }
  0xb6   :  { %3262 = vmatprep.subr.bf16.mxu1 %v6456_v61  ;;  %v6467_v61 = vld [vmem:[#allocation56_spill] sm:$0xff] }
  0xb9   :  { %3264 = vmatpush1.bf16.msra.mxu1 %v6457_v47 }
  0xba   :  { %3266 = vmatprep.subr.bf16.mxu1 %v6458_v45 }
  0xbd   :  { %3268 = vmatpush1.bf16.msra.mxu1 %v6459_v62 }
  0xbe   :  { %3270 = vmatprep.subr.bf16.mxu1 %v6460_v34 }
  0xc1   :  { %3272 = vmatpush1.bf16.msra.mxu1 %v6461_v13 }
  0xc2   :  { %3274 = vmatprep.subr.bf16.mxu1 %v6462_v60  ;;  %v57_v60 = vlaneseq }
  0xc5   :  { %3276 = vmatpush1.bf16.msra.mxu1 %v6463_v5  ;;  %v5235_v5 = vshrl.u32 %v57_v60, 7 }
  0xc6   :  { %3278 = vmatprep.subr.bf16.mxu1 %v6464_v29 }
  0xc7   :  { %v59_v29 = vsub.s32 0, %v5235_v5  ;;  %v67_v60 = vsub.s32 2, %v5235_v5  ;;  %v71_v45 = vsub.s32 3, %v5235_v5 }
  0xc9   :  { %3280 = vmatpush1.bf16.msra.mxu1 %v6465_v14 }
  0xca   :  { %3282 = vmatprep.subr.bf16.mxu1 %v6466_v27  ;;  %v55_v27 = vld [vmem:[%s6184_s3] sm:$0x3f] }
  0xcb   :  { %v68_v31 = vrot.slane %v55_v27, %v67_v60  ;;  %v72_v21 = vrot.slane %v55_v27, %v71_v45 }
  0xcd   :  { %3284 = vmatpush1.bf16.msra.mxu1 %v6467_v61 }
  0xce   :  { %3286 = vmatprep.subr.bf16.mxu1 %v5074_v6  ;;  %v63_v6 = vsub.s32 1, %v5235_v5 }
  0xd0   :  { %v64_v13 = vrot.slane %v55_v27, %v63_v6 }
  0xd1   :  { %3288 = vmatpush1.bf16.msra.mxu1 %v5080_v44  ;;  %v60_v44 = vrot.slane %v55_v27, %v59_v29 }
  0xd2   :  { %3290 = vmatprep.subr.bf16.mxu1 %v5086_v42 }
  0xd5   :  { %3292 = vmatpush1.bf16.msra.mxu1 %v5092_v51 }
  0xd6   :  { %3358 = vmatprep.subr.bf16.mxu1 %v4825_v8 }
  0xee   :  { %v160_v61 = vpop.f32.mrb[0].mxu0 }
  0xef   :  { %v162_v14 = vpop.f32.mrb[1].mxu0 }
  0xf2   :  { %v166_v42 = vpop.f32.mrb[2].mxu0 }
  0xf3   :  { %v5242_v34 = vadd.f32 %v166_v42, %v60_v44  ;;  %v168_v51 = vpop.f32.mrb[3].mxu0  ;;  %v75_v42 = vsub.s32 4, %v5235_v5 }
  0xf4   :  { %v5244_v8 = vadd.f32 %v168_v51, %v64_v13  ;;  %v79_v51 = vsub.s32 5, %v5235_v5 }
  0xf5   :  { %6468 = vst [vmem:[#allocation84_spill] sm:$0xff] %v5242_v34  ;;  %v76_v53 = vrot.slane %v55_v27, %v75_v42 }
  0xf6   :  { %6469 = vst [vmem:[#allocation85_spill] sm:$0xff] %v5244_v8  ;;  %v237_v62 = vpop.f32.mrb[4].mxu0  ;;  %v80_v49 = vrot.slane %v55_v27, %v79_v51 }
  0xf7   :  { %v239_v47 = vpop.f32.mrb[5].mxu0 }
  0xfa   :  { %v243_v18 = vpop.f32.mrb[6].mxu0 }
  0xfb   :  { %v5248_v4 = vadd.f32 %v243_v18, %v68_v31  ;;  %v245_v2 = vpop.f32.mrb[7].mxu0 }
  0xfc   :  { %v5250_v23 = vadd.f32 %v245_v2, %v72_v21  ;;  %v517_v2 = vld [vmem:[%s6185_s4] sm:$0x3f] }
  0xfd   :  { %6470 = vst [vmem:[#allocation86_spill] sm:$0xff] %v5248_v4  ;;  %v5261_v57 = vrot.slane %v517_v2, %v59_v29  ;;  %v5263_v5 = vrot.slane %v517_v2, %v63_v6  ;;  %v5273_v58 = vrot.slane %v517_v2, %v67_v60  ;;  %v5275_v0 = vrot.slane %v517_v2, %v71_v45 }
  0xfe   :  { %6471 = vst [vmem:[#allocation87_spill] sm:$0xff] %v5250_v23  ;;  %v314_v34 = vpop.f32.mrb[8].mxu0 }
  0xff   :  { %v316_v8 = vpop.f32.mrb[9].mxu0  ;;  %6474 = vst [vmem:[#allocation90_spill] sm:$0xff] %v5261_v57  ;;  %6475 = vst [vmem:[#allocation91_spill] sm:$0xff] %v5263_v5 }
 0x100   :  { %6478 = vst [vmem:[#allocation94_spill] sm:$0xff] %v5273_v58  ;;  %6479 = vst [vmem:[#allocation95_spill] sm:$0xff] %v5275_v0 }
 0x102   :  { %v320_v11 = vpop.f32.mrb[10].mxu0 }
 0x103   :  { %v5254_v37 = vadd.f32 %v320_v11, %v76_v53  ;;  %v322_v15 = vpop.f32.mrb[11].mxu0 }
 0x104   :  { %v5256_v41 = vadd.f32 %v322_v15, %v80_v49  ;;  %v5269_v15 = vadd.f32 %v162_v14, %v64_v13 }
 0x105   :  { %6472 = vst [vmem:[#allocation88_spill] sm:$0xff] %v5254_v37  ;;  %v5267_v37 = vadd.f32 %v160_v61, %v60_v44  ;;  %v5281_v44 = vadd.f32 %v239_v47, %v72_v21  ;;  %v5287_v21 = vrot.slane %v517_v2, %v79_v51 }
 0x106   :  { %6473 = vst [vmem:[#allocation89_spill] sm:$0xff] %v5256_v41  ;;  %6477 = vst [vmem:[#allocation93_spill] sm:$0xff] %v5269_v15 }
 0x107   :  { %6476 = vst [vmem:[#allocation92_spill] sm:$0xff] %v5267_v37  ;;  %6481 = vst [vmem:[#allocation97_spill] sm:$0xff] %v5281_v44 }
 0x108   :  { %6483 = vst [vmem:[#allocation99_spill] sm:$0xff] %v5287_v21 }
 0x12b   :  { %v615_v28 = vpop.f32.mrb[0].mxu1 }
 0x12c   :  { %v617_v18 = vpop.f32.mrb[1].mxu1  ;;  %v616_v27 = vadd.f32 %v615_v28, %v5261_v57 }
 0x12d   :  { %v618_v11 = vadd.f32 %v617_v18, %v5263_v5  ;;  %v5279_v18 = vadd.f32 %v237_v62, %v68_v31  ;;  %v5285_v62 = vrot.slane %v517_v2, %v75_v42 }
 0x12e   :  { %v762_v41 = vadd.f32 %v616_v27, %v5267_v37 }
 0x12f   :  { %v763_v40 = vadd.f32 %v618_v11, %v5269_v15  ;;  %6480 = vst [vmem:[#allocation96_spill] sm:$0xff] %v5279_v18  ;;  %6482 = vst [vmem:[#allocation98_spill] sm:$0xff] %v5285_v62 }
 0x130   :  { %v2893_v29 = vmul.f32 -1.442695, %v762_v41 }
 0x131   :  { %v2894_v22 = vmul.f32 -1.442695, %v763_v40 }
 0x132   :  { %4546 = vpow2.f32 %v2893_v29 }
 0x133   :  { %4548 = vpow2.f32 %v2894_v22 }
 0x13c   :  { %v4547_v45 = vpop.eup %4546 }
 0x13d   :  { %v4549_v27 = vpop.eup %4548  ;;  %v770_v40 = vadd.f32 1.0, %v4547_v45 }
 0x13e   :  { %v686_v4 = vpop.f32.mrb[12].mxu0 }
 0x13f   :  { %v688_v23 = vpop.f32.mrb[13].mxu0  ;;  %v687_v6 = vadd.f32 %v686_v4, %v5273_v58  ;;  %v771_v4 = vadd.f32 1.0, %v4549_v27 }
 0x140   :  { %v689_v28 = vadd.f32 %v688_v23, %v5275_v0 }
 0x141   :  { %v776_v13 = vadd.f32 %v687_v6, %v5279_v18 }
 0x142   :  { %v777_v14 = vadd.f32 %v689_v28, %v5281_v44 }
 0x143   :  { %v2895_v61 = vmul.f32 -1.442695, %v776_v13 }
 0x144   :  { %v2896_v60 = vmul.f32 -1.442695, %v777_v14  ;;  %v5291_v14 = vadd.f32 %v314_v34, %v76_v53 }
 0x145   :  { %4550 = vpow2.f32 %v2895_v61 }
 0x146   :  { %4552 = vpow2.f32 %v2896_v60  ;;  %v5293_v60 = vadd.f32 %v316_v8, %v80_v49 }
 0x147   :  { %4554 = vrcp.f32 %v770_v40 }
 0x148   :  { %4556 = vrcp.f32 %v771_v4 }
 0x14f   :  { %v4551_v41 = vpop.eup %4550 }
 0x150   :  { %v4553_v31 = vpop.eup %4552  ;;  %v784_v47 = vadd.f32 1.0, %v4551_v41 }
 0x151   :  { %v785_v22 = vadd.f32 1.0, %v4553_v31  ;;  %v4555_v6 = vpop.eup %4554 }
 0x152   :  { %v4557_v13 = vpop.eup %4556  ;;  %4558 = vrcp.f32 %v784_v47 }
 0x153   :  { %4560 = vrcp.f32 %v785_v22  ;;  %v6484_v22 = vld [vmem:[#allocation49_spill] sm:$0xff] }
 0x15c   :  { %v4559_v45 = vpop.eup %4558 }
 0x15d   :  { %v4561_v27 = vpop.eup %4560  ;;  %v796_v40 = vsub.f32 1.0, %v4559_v45  ;;  %v800_v53 = vmul.f32 0.0, %v4559_v45  ;;  %v6494_v45 = vld [vmem:[#allocation67_spill] sm:$0xff] }
 0x15e   :  { %v797_v41 = vsub.f32 1.0, %v4561_v27 }
 0x16b   :  { %v757_v23 = vpop.f32.mrb[2].mxu1 }
 0x16c   :  { %v758_v11 = vadd.f32 %v757_v23, %v5285_v62  ;;  %v759_v29 = vpop.f32.mrb[3].mxu1  ;;  %v801_v23 = vmul.f32 0.0, %v4561_v27  ;;  %v6495_v27 = vld [vmem:[#allocation68_spill] sm:$0xff] }
 0x16d   :  { %v760_v28 = vadd.f32 %v759_v29, %v5287_v21  ;;  %v6486_v29 = vld [vmem:[#allocation53_spill] sm:$0xff] }
 0x16e   :  { %v790_v61 = vmul.f32 %v4555_v6, %v758_v11  ;;  %v6485_v11 = vld [vmem:[#allocation51_spill] sm:$0xff] }
 0x16f   :  { %v791_v42 = vmul.f32 %v4557_v13, %v760_v28  ;;  %v6487_v6 = vld [vmem:[#allocation55_spill] sm:$0xff]  ;;  %v6488_v28 = vld [vmem:[#allocation61_spill] sm:$0xff]  ;;  %v6489_v13 = vld [vmem:[#allocation62_spill] sm:$0xff] }
 0x170   :  { %v792_v51 = vadd.f32 %v790_v61, %v5291_v14  ;;  %v6490_v61 = vld [vmem:[#allocation63_spill] sm:$0xff] }
 0x171   :  { %v793_v2 = vadd.f32 %v791_v42, %v5293_v60  ;;  %v6491_v42 = vld [vmem:[#allocation64_spill] sm:$0xff] }
 0x172   :  { %4562 = vtanh.f32 %v792_v51  ;;  %v6492_v51 = vld [vmem:[#allocation65_spill] sm:$0xff] }
 0x173   :  { %4564 = vtanh.f32 %v793_v2  ;;  %v6493_v2 = vld [vmem:[#allocation66_spill] sm:$0xff] }
 0x17c   :  { %v4563_v4 = vpop.eup %4562 }
 0x17d   :  { %v4565_v31 = vpop.eup %4564  ;;  %v798_v34 = vmul.f32 %v4563_v4, %v796_v40  ;;  %v6496_v40 = vld [vmem:[#allocation69_spill] sm:$0xff]  ;;  %v6497_v4 = vld [vmem:[#allocation70_spill] sm:$0xff] }
 0x17e   :  { %v799_v47 = vmul.f32 %v4565_v31, %v797_v41  ;;  %v6498_v41 = vld [vmem:[#allocation71_spill] sm:$0xff]  ;;  %v6499_v31 = vld [vmem:[#allocation72_spill] sm:$0xff] }
 0x17f   :  { %v5297_v8 = vadd.f32 %v800_v53, %v798_v34  ;;  %v6500_v34 = vld [vmem:[#allocation73_spill] sm:$0xff]  ;;  %v6501_v53 = vld [vmem:[#allocation74_spill] sm:$0xff] }
 0x180   :  { %v5299_v49 = vadd.f32 %v801_v23, %v799_v47  ;;  %v6502_v47 = vld [vmem:[#allocation75_spill] sm:$0xff]  ;;  %v6503_v23 = vld [vmem:[#allocation76_spill] sm:$0xff] }
 0x182   :  { %868 = vmatprep.mubr.f32.mxu0 %v5299_v49  ;;  %939 = vmatprep.mubr.f32.mxu1 %v5299_v49 }
 0x183   :  { %869 = vmatmul.mubr.f32.vlgmr.msra.gmra.mrb[14].mxu0 %v5297_v8  ;;  %940 = vmatmul.mubr.f32.vlgmr.msra.gmra.mrb[4].mxu1 %v5297_v8 }
 0x184   :  { %3296 = vmatpush1.bf16.msra.mxu0 %v6484_v22  ;;  %1010 = vmatprep.mubr.f32.mxu0 %v5299_v49 }
 0x185   :  { %3298 = vmatprep.subr.bf16.mxu0 %v6485_v11  ;;  %3360 = vmatpush1.bf16.msra.mxu1 %v4827_v12 }
 0x186   :  { %3362 = vmatprep.subr.bf16.mxu1 %v4835_v17 }
 0x188   :  { %3300 = vmatpush1.bf16.msra.mxu0 %v6486_v29 }
 0x189   :  { %3302 = vmatprep.subr.bf16.mxu0 %v6487_v6  ;;  %3364 = vmatpush1.bf16.msra.mxu1 %v4841_v20 }
 0x18a   :  { %3366 = vmatprep.subr.bf16.mxu1 %v4847_v25 }
 0x18c   :  { %3304 = vmatpush1.bf16.msra.mxu0 %v5072_v26 }
 0x18d   :  { %3306 = vmatprep.subr.bf16.mxu0 %v5077_v52  ;;  %3368 = vmatpush1.bf16.msra.mxu1 %v4867_v35 }
 0x18e   :  { %3370 = vmatprep.subr.bf16.mxu1 %v4879_v39 }
 0x190   :  { %3308 = vmatpush1.bf16.msra.mxu0 %v5084_v1 }
 0x191   :  { %3310 = vmatprep.subr.bf16.mxu0 %v5089_v38  ;;  %3372 = vmatpush1.bf16.msra.mxu1 %v4885_v48 }
 0x192   :  { %3374 = vmatprep.subr.bf16.mxu1 %v4890_v50 }
 0x194   :  { %3312 = vmatpush1.bf16.msra.mxu0 %v6488_v28 }
 0x195   :  { %3314 = vmatprep.subr.bf16.mxu0 %v6489_v13  ;;  %3376 = vmatpush1.bf16.msra.mxu1 %v4896_v55 }
 0x196   :  { %3378 = vmatprep.subr.bf16.mxu1 %v4900_v59 }
 0x198   :  { %3316 = vmatpush1.bf16.msra.mxu0 %v6490_v61 }
 0x199   :  { %3318 = vmatprep.subr.bf16.mxu0 %v6491_v42  ;;  %3380 = vmatpush1.bf16.msra.mxu1 %v4908_v3 }
 0x19a   :  { %3382 = vmatprep.subr.bf16.mxu1 %v4913_v9 }
 0x19c   :  { %3320 = vmatpush1.bf16.msra.mxu0 %v6492_v51 }
 0x19d   :  { %3322 = vmatprep.subr.bf16.mxu0 %v6493_v2  ;;  %3384 = vmatpush1.bf16.msra.mxu1 %v4923_v19 }
 0x19e   :  { %3386 = vmatprep.subr.bf16.mxu1 %v4928_v16 }
 0x1a0   :  { %3324 = vmatpush1.bf16.msra.mxu0 %v6494_v45 }
 0x1a1   :  { %3326 = vmatprep.subr.bf16.mxu0 %v6495_v27  ;;  %3388 = vmatpush1.bf16.msra.mxu1 %v4938_v32 }
 0x1a2   :  { %3390 = vmatprep.subr.bf16.mxu1 %v4943_v33 }
 0x1a4   :  { %3328 = vmatpush1.bf16.msra.mxu0 %v6496_v40 }
 0x1a5   :  { %3330 = vmatprep.subr.bf16.mxu0 %v6497_v4  ;;  %3392 = vmatpush1.bf16.msra.mxu1 %v4950_v46 }
 0x1a6   :  { %3394 = vmatprep.subr.bf16.mxu1 %v4955_v54 }
 0x1a8   :  { %3332 = vmatpush1.bf16.msra.mxu0 %v6498_v41 }
 0x1a9   :  { %3334 = vmatprep.subr.bf16.mxu0 %v6499_v31  ;;  %3396 = vmatpush1.bf16.msra.mxu1 %v4962_v63  ;;  %v6504_v63 = vld [vmem:[#allocation78_spill] sm:$0xff] }
 0x1aa   :  { %3398 = vmatprep.subr.bf16.mxu1 %v4967_v10 }
 0x1ac   :  { %3336 = vmatpush1.bf16.msra.mxu0 %v6500_v34  ;;  %v6505_v34 = vld [vmem:[#allocation35_spill] sm:$0xff] }
 0x1ad   :  { %3338 = vmatprep.subr.bf16.mxu0 %v6501_v53  ;;  %3400 = vmatpush1.bf16.msra.mxu1 %v4974_v24  ;;  %v6506_v53 = vld [vmem:[#allocation79_spill] sm:$0xff]  ;;  %v6507_v24 = vld [vmem:[#allocation80_spill] sm:$0xff] }
 0x1ae   :  { %3402 = vmatprep.subr.bf16.mxu1 %v4979_v30  ;;  %v6508_v30 = vld [vmem:[#allocation37_spill] sm:$0xff] }
 0x1b0   :  { %3340 = vmatpush1.bf16.msra.mxu0 %v6502_v47  ;;  %v6509_v47 = vld [vmem:[#allocation39_spill] sm:$0xff] }
 0x1b1   :  { %3342 = vmatprep.subr.bf16.mxu0 %v6503_v23  ;;  %3404 = vmatpush1.bf16.msra.mxu1 %v4986_v43  ;;  %v6510_v23 = vld [vmem:[#allocation81_spill] sm:$0xff]  ;;  %v6511_v43 = vld [vmem:[#allocation82_spill] sm:$0xff] }
 0x1b2   :  { %3406 = vmatprep.subr.bf16.mxu1 %v4991_v56  ;;  %v6512_v56 = vld [vmem:[#allocation41_spill] sm:$0xff] }
 0x1b4   :  { %3344 = vmatpush1.bf16.msra.mxu0 %v5160_v36  ;;  %v6513_v36 = vld [vmem:[#allocation43_spill] sm:$0xff] }
 0x1b5   :  { %3346 = vmatprep.subr.bf16.mxu0 %v6504_v63  ;;  %3408 = vmatpush1.bf16.msra.mxu1 %v4998_v7  ;;  %v6514_v63 = vld [vmem:[#allocation83_spill] sm:$0xff]  ;;  %v6515_v7 = vld [vmem:[#allocation9_spill] sm:$0xff] }
 0x1b6   :  { %3410 = vmatprep.subr.bf16.mxu1 %v6505_v34  ;;  %v6516_v34 = vld [vmem:[#allocation45_spill] sm:$0xff] }
 0x1b8   :  { %3348 = vmatpush1.bf16.msra.mxu0 %v6506_v53  ;;  %v6517_v53 = vld [vmem:[#allocation47_spill] sm:$0xff] }
 0x1b9   :  { %3350 = vmatprep.subr.bf16.mxu0 %v6507_v24  ;;  %3412 = vmatpush1.bf16.msra.mxu1 %v6508_v30  ;;  %v6518_v30 = vld [vmem:[#allocation10_spill] sm:$0xff]  ;;  %v6528_v24 = vld [vmem:[#allocation24_spill] sm:$0xff] }
 0x1ba   :  { %3414 = vmatprep.subr.bf16.mxu1 %v6509_v47  ;;  %v6519_v47 = vld [vmem:[#allocation11_spill] sm:$0xff] }
 0x1bc   :  { %3352 = vmatpush1.bf16.msra.mxu0 %v6510_v23  ;;  %v6520_v23 = vld [vmem:[#allocation12_spill] sm:$0xff] }
 0x1bd   :  { %3354 = vmatprep.subr.bf16.mxu0 %v6511_v43  ;;  %3416 = vmatpush1.bf16.msra.mxu1 %v6512_v56  ;;  %v6521_v43 = vld [vmem:[#allocation13_spill] sm:$0xff]  ;;  %v6522_v56 = vld [vmem:[#allocation14_spill] sm:$0xff] }
 0x1be   :  { %3418 = vmatprep.subr.bf16.mxu1 %v6513_v36  ;;  %v6523_v36 = vld [vmem:[#allocation15_spill] sm:$0xff] }
 0x1c0   :  { %3356 = vmatpush1.bf16.msra.mxu0 %v6514_v63  ;;  %v6524_v63 = vld [vmem:[#allocation16_spill] sm:$0xff] }
 0x1c1   :  { %3422 = vmatprep.subr.bf16.mxu0 %v6515_v7  ;;  %3420 = vmatpush1.bf16.msra.mxu1 %v6516_v34  ;;  %v6525_v7 = vld [vmem:[#allocation18_spill] sm:$0xff]  ;;  %v6526_v34 = vld [vmem:[#allocation20_spill] sm:$0xff] }
 0x1c2   :  { %3486 = vmatprep.subr.bf16.mxu1 %v6517_v53  ;;  %v6527_v53 = vld [vmem:[#allocation22_spill] sm:$0xff] }
 0x1c3   :  { %1011 = vmatmul.mubr.f32.vlgmr.msra.gmra.mrb[16].mxu0 %v5297_v8 }
 0x1c4   :  { %3424 = vmatpush1.bf16.msra.mxu0 %v6518_v30  ;;  %v6529_v30 = vld [vmem:[#allocation26_spill] sm:$0xff] }
 0x1c5   :  { %3426 = vmatprep.subr.bf16.mxu0 %v6519_v47  ;;  %v6530_v47 = vld [vmem:[#allocation28_spill] sm:$0xff] }
 0x1c8   :  { %3428 = vmatpush1.bf16.msra.mxu0 %v6520_v23  ;;  %v6531_v23 = vld [vmem:[#allocation30_spill] sm:$0xff] }
 0x1c9   :  { %3430 = vmatprep.subr.bf16.mxu0 %v6521_v43  ;;  %v6532_v43 = vld [vmem:[#allocation32_spill] sm:$0xff] }
 0x1cc   :  { %3432 = vmatpush1.bf16.msra.mxu0 %v6522_v56  ;;  %v6533_v56 = vld [vmem:[#allocation34_spill] sm:$0xff] }
 0x1cd   :  { %3434 = vmatprep.subr.bf16.mxu0 %v6523_v36  ;;  %v6534_v36 = vld [vmem:[#allocation36_spill] sm:$0xff] }
 0x1d0   :  { %3436 = vmatpush1.bf16.msra.mxu0 %v6524_v63  ;;  %v6535_v63 = vld [vmem:[#allocation38_spill] sm:$0xff] }
 0x1d1   :  { %3438 = vmatprep.subr.bf16.mxu0 %v6525_v7  ;;  %v6536_v7 = vld [vmem:[#allocation40_spill] sm:$0xff] }
 0x1d4   :  { %3440 = vmatpush1.bf16.msra.mxu0 %v6526_v34  ;;  %v6537_v34 = vld [vmem:[#allocation42_spill] sm:$0xff] }
 0x1d5   :  { %3442 = vmatprep.subr.bf16.mxu0 %v6527_v53  ;;  %v6538_v53 = vld [vmem:[#allocation44_spill] sm:$0xff] }
 0x1d8   :  { %3444 = vmatpush1.bf16.msra.mxu0 %v6528_v24  ;;  %v6539_v24 = vld [vmem:[#allocation46_spill] sm:$0xff] }
 0x1d9   :  { %3446 = vmatprep.subr.bf16.mxu0 %v6529_v30  ;;  %v6540_v30 = vld [vmem:[#allocation48_spill] sm:$0xff] }
 0x1dc   :  { %3448 = vmatpush1.bf16.msra.mxu0 %v6530_v47  ;;  %v6541_v47 = vld [vmem:[#allocation50_spill] sm:$0xff] }
 0x1dd   :  { %3450 = vmatprep.subr.bf16.mxu0 %v6531_v23  ;;  %v6542_v23 = vld [vmem:[#allocation52_spill] sm:$0xff] }
 0x1e0   :  { %3452 = vmatpush1.bf16.msra.mxu0 %v6532_v43  ;;  %v6543_v43 = vld [vmem:[#allocation54_spill] sm:$0xff] }
 0x1e1   :  { %3454 = vmatprep.subr.bf16.mxu0 %v6533_v56  ;;  %v6544_v56 = vld [vmem:[#allocation56_spill] sm:$0xff] }
 0x1e4   :  { %3456 = vmatpush1.bf16.msra.mxu0 %v6534_v36  ;;  %v6545_v36 = vld [vmem:[#allocation57_spill] sm:$0xff] }
 0x1e5   :  { %3458 = vmatprep.subr.bf16.mxu0 %v6535_v63  ;;  %v6546_v63 = vld [vmem:[#allocation58_spill] sm:$0xff] }
 0x1e8   :  { %3460 = vmatpush1.bf16.msra.mxu0 %v6536_v7  ;;  %v6547_v7 = vld [vmem:[#allocation59_spill] sm:$0xff] }
 0x1e9   :  { %3462 = vmatprep.subr.bf16.mxu0 %v6537_v34  ;;  %v6548_v34 = vld [vmem:[#allocation60_spill] sm:$0xff] }
 0x1ec   :  { %3464 = vmatpush1.bf16.msra.mxu0 %v6538_v53  ;;  %v6549_v53 = vld [vmem:[#allocation8_spill] sm:$0xff] }
 0x1ed   :  { %3466 = vmatprep.subr.bf16.mxu0 %v6539_v24 }
 0x1f0   :  { %3468 = vmatpush1.bf16.msra.mxu0 %v6540_v30 }
 0x1f1   :  { %3470 = vmatprep.subr.bf16.mxu0 %v6541_v47 }
 0x1f4   :  { %3472 = vmatpush1.bf16.msra.mxu0 %v6542_v23 }
 0x1f5   :  { %3474 = vmatprep.subr.bf16.mxu0 %v6543_v43 }
 0x1f8   :  { %3476 = vmatpush1.bf16.msra.mxu0 %v6544_v56 }
 0x1f9   :  { %3478 = vmatprep.subr.bf16.mxu0 %v6545_v36 }
 0x1fc   :  { %3480 = vmatpush1.bf16.msra.mxu0 %v6546_v63 }
 0x1fd   :  { %3482 = vmatprep.subr.bf16.mxu0 %v6547_v7 }
 0x200   :  { %3484 = vmatpush1.bf16.msra.mxu0 %v6548_v34 }
 0x201   :  { %3550 = vmatprep.subr.bf16.mxu0 %v6549_v53 }
 0x256   :  { %v870_v24 = vpop.f32.mrb[14].mxu0  ;;  %v941_v30 = vpop.f32.mrb[4].mxu1 }
 0x257   :  { %v872_v10 = vpop.f32.mrb[15].mxu0  ;;  %v943_v47 = vpop.f32.mrb[5].mxu1  ;;  %v871_v63 = vadd.f32 %v870_v24, %v5261_v57 }
 0x258   :  { %v944_v23 = vadd.f32 %v943_v47, %v5275_v0  ;;  %v873_v34 = vadd.f32 %v872_v10, %v5263_v5  ;;  %v1076_v47 = vrot.slane %v5299_v49, 6 }
 0x259   :  { %v1019_v7 = vrot.slane %v871_v63, 6 }
 0x25a   :  { %v1040_v31 = vrot.slane %v944_v23, 6  ;;  %v1020_v53 = vrot.slane %v873_v34, 6 }
 0x25b   :  { %v1023_v54 = vadd.f32 %v1019_v7, %v5267_v37 }
 0x25c   :  { %v1044_v43 = vadd.f32 %v1040_v31, %v5281_v44  ;;  %v1024_v46 = vadd.f32 %v1020_v53, %v5269_v15  ;;  %v942_v31 = vadd.f32 %v941_v30, %v5273_v58 }
 0x25e   :  { %v2900_v56 = vmul.f32 -1.442695, %v1044_v43  ;;  %v2898_v44 = vmul.f32 -1.442695, %v1024_v46 }
 0x260   :  { %4566 = vpow2.f32 %v2900_v56  ;;  %v2897_v56 = vmul.f32 -1.442695, %v1023_v54 }
 0x26a   :  { %v4567_v36 = vpop.eup %4566 }
 0x26b   :  { %v1052_v41 = vadd.f32 1.0, %v4567_v36  ;;  %v1039_v36 = vrot.slane %v942_v31, 6 }
 0x26d   :  { %4568 = vrcp.f32 %v1052_v41  ;;  %v1043_v24 = vadd.f32 %v1039_v36, %v5279_v18 }
 0x26e   :  { %4570 = vpow2.f32 %v2897_v56 }
 0x26f   :  { %4572 = vpow2.f32 %v2898_v44  ;;  %v2899_v10 = vmul.f32 -1.442695, %v1043_v24 }
 0x271   :  { %4574 = vpow2.f32 %v2899_v10 }
 0x277   :  { %v4569_v23 = vpop.eup %4568 }
 0x278   :  { %v1080_v43 = vmul.f32 %v4569_v23, %v1076_v47  ;;  %v4571_v63 = vpop.eup %4570 }
 0x279   :  { %v4573_v41 = vpop.eup %4572  ;;  %v1031_v7 = vadd.f32 1.0, %v4571_v63 }
 0x27a   :  { %v1032_v34 = vadd.f32 1.0, %v4573_v41 }
 0x27b   :  { %4576 = vrcp.f32 %v1031_v7  ;;  %v4575_v49 = vpop.eup %4574 }
 0x27c   :  { %4578 = vrcp.f32 %v1032_v34  ;;  %v1051_v15 = vadd.f32 1.0, %v4575_v49  ;;  %v1075_v34 = vrot.slane %v5297_v8, 6  ;;  %v6551_v8 = vld [vmem:[#allocation19_spill] sm:$0xff] }
 0x27e   :  { %4580 = vrcp.f32 %v1051_v15 }
 0x285   :  { %v4577_v44 = vpop.eup %4576 }
 0x286   :  { %v4579_v56 = vpop.eup %4578 }
 0x288   :  { %v4581_v41 = vpop.eup %4580 }
 0x289   :  { %v1069_v7 = vsub.f32 1.0, %v4581_v41 }
 0x296   :  { %v1012_v53 = vpop.f32.mrb[16].mxu0 }
 0x297   :  { %v1013_v30 = vadd.f32 %v1012_v53, %v5285_v62  ;;  %v1014_v54 = vpop.f32.mrb[17].mxu0  ;;  %v1070_v53 = vsub.f32 1.0, %v4569_v23  ;;  %v6552_v23 = vld [vmem:[#allocation71_spill] sm:$0xff] }
 0x298   :  { %v1015_v46 = vadd.f32 %v1014_v54, %v5287_v21  ;;  %v1079_v21 = vmul.f32 %v4581_v41, %v1075_v34  ;;  %v6560_v41 = vld [vmem:[#allocation75_spill] sm:$0xff]  ;;  %v6562_v34 = vld [vmem:[#allocation29_spill] sm:$0xff] }
 0x299   :  { %v1059_v47 = vrot.slane %v1013_v30, 6 }
 0x29a   :  { %v1060_v31 = vrot.slane %v1015_v46, 6 }
 0x29b   :  { %v1063_v36 = vmul.f32 %v4577_v44, %v1059_v47 }
 0x29c   :  { %v1064_v24 = vmul.f32 %v4579_v56, %v1060_v31  ;;  %v6554_v31 = vld [vmem:[#allocation21_spill] sm:$0xff]  ;;  %v6555_v56 = vld [vmem:[#allocation23_spill] sm:$0xff] }
 0x29d   :  { %v1065_v10 = vadd.f32 %v1063_v36, %v5291_v14  ;;  %v6556_v36 = vld [vmem:[#allocation73_spill] sm:$0xff] }
 0x29e   :  { %v1066_v63 = vadd.f32 %v1064_v24, %v5293_v60  ;;  %v6557_v24 = vld [vmem:[#allocation74_spill] sm:$0xff] }
 0x29f   :  { %4582 = vtanh.f32 %v1065_v10  ;;  %v6558_v10 = vld [vmem:[#allocation25_spill] sm:$0xff] }
 0x2a0   :  { %4584 = vtanh.f32 %v1066_v63  ;;  %v6559_v63 = vld [vmem:[#allocation27_spill] sm:$0xff] }
 0x2a9   :  { %v4583_v49 = vpop.eup %4582 }
 0x2aa   :  { %v4585_v54 = vpop.eup %4584  ;;  %v1071_v30 = vmul.f32 %v4583_v49, %v1069_v7  ;;  %v6561_v7 = vld [vmem:[#allocation76_spill] sm:$0xff]  ;;  %v6563_v49 = vld [vmem:[#allocation31_spill] sm:$0xff] }
 0x2ab   :  { %v1072_v46 = vmul.f32 %v4585_v54, %v1070_v53  ;;  %v6564_v53 = vld [vmem:[#allocation77_spill] sm:$0xff]  ;;  %v6565_v54 = vld [vmem:[#allocation78_spill] sm:$0xff] }
 0x2ac   :  { %v5417_v62 = vadd.f32 %v1079_v21, %v1071_v30  ;;  %v6550_v21 = vld [vmem:[#allocation17_spill] sm:$0xff] }
 0x2ad   :  { %v5419_v15 = vadd.f32 %v1080_v43, %v1072_v46  ;;  %v6553_v43 = vld [vmem:[#allocation72_spill] sm:$0xff]  ;;  %v6566_v30 = vld [vmem:[#allocation33_spill] sm:$0xff]  ;;  %v6567_v46 = vld [vmem:[#allocation35_spill] sm:$0xff] }
 0x2ae   :  { %v5423_v44 = vrot.slane %v5417_v62, 2 }
 0x2af   :  { %v1086_v47 = vrot.slane %v5419_v15, 2 }
 0x2b1   :  { %1153 = vmatprep.mubr.f32.mxu1 %v1086_v47  ;;  %1224 = vmatprep.mubr.f32.mxu0 %v1086_v47 }
 0x2b2   :  { %1154 = vmatmul.mubr.f32.vlgmr.msra.gmra.mrb[6].mxu1 %v5423_v44  ;;  %1225 = vmatmul.mubr.f32.vlgmr.msra.gmra.mrb[18].mxu0 %v5423_v44 }
 0x2b3   :  { %3488 = vmatpush1.bf16.msra.mxu1 %v6484_v22  ;;  %1295 = vmatprep.mubr.f32.mxu1 %v1086_v47  ;;  %v6568_v47 = vld [vmem:[#allocation79_spill] sm:$0xff] }
 0x2b4   :  { %3490 = vmatprep.subr.bf16.mxu1 %v6485_v11  ;;  %3552 = vmatpush1.bf16.msra.mxu0 %v4827_v12 }
 0x2b5   :  { %3554 = vmatprep.subr.bf16.mxu0 %v4835_v17 }
 0x2b7   :  { %3492 = vmatpush1.bf16.msra.mxu1 %v6486_v29 }
 0x2b8   :  { %3494 = vmatprep.subr.bf16.mxu1 %v6487_v6  ;;  %3556 = vmatpush1.bf16.msra.mxu0 %v4841_v20 }
 0x2b9   :  { %3558 = vmatprep.subr.bf16.mxu0 %v4847_v25 }
 0x2bb   :  { %3496 = vmatpush1.bf16.msra.mxu1 %v5072_v26 }
 0x2bc   :  { %3498 = vmatprep.subr.bf16.mxu1 %v5077_v52  ;;  %3560 = vmatpush1.bf16.msra.mxu0 %v4867_v35 }
 0x2bd   :  { %3562 = vmatprep.subr.bf16.mxu0 %v4879_v39 }
 0x2bf   :  { %3500 = vmatpush1.bf16.msra.mxu1 %v5084_v1 }
 0x2c0   :  { %3502 = vmatprep.subr.bf16.mxu1 %v5089_v38  ;;  %3564 = vmatpush1.bf16.msra.mxu0 %v4885_v48 }
 0x2c1   :  { %3566 = vmatprep.subr.bf16.mxu0 %v4890_v50 }
 0x2c3   :  { %3504 = vmatpush1.bf16.msra.mxu1 %v6488_v28 }
 0x2c4   :  { %3506 = vmatprep.subr.bf16.mxu1 %v6489_v13  ;;  %3568 = vmatpush1.bf16.msra.mxu0 %v4896_v55 }
 0x2c5   :  { %3570 = vmatprep.subr.bf16.mxu0 %v4900_v59 }
 0x2c7   :  { %3508 = vmatpush1.bf16.msra.mxu1 %v6490_v61 }
 0x2c8   :  { %3510 = vmatprep.subr.bf16.mxu1 %v6491_v42  ;;  %3572 = vmatpush1.bf16.msra.mxu0 %v4908_v3 }
 0x2c9   :  { %3574 = vmatprep.subr.bf16.mxu0 %v4913_v9 }
 0x2cb   :  { %3512 = vmatpush1.bf16.msra.mxu1 %v6492_v51 }
 0x2cc   :  { %3514 = vmatprep.subr.bf16.mxu1 %v6493_v2  ;;  %3576 = vmatpush1.bf16.msra.mxu0 %v4923_v19 }
 0x2cd   :  { %3578 = vmatprep.subr.bf16.mxu0 %v4928_v16 }
 0x2cf   :  { %3516 = vmatpush1.bf16.msra.mxu1 %v6494_v45 }
 0x2d0   :  { %3518 = vmatprep.subr.bf16.mxu1 %v6495_v27  ;;  %3580 = vmatpush1.bf16.msra.mxu0 %v4938_v32 }
 0x2d1   :  { %3582 = vmatprep.subr.bf16.mxu0 %v4943_v33 }
 0x2d3   :  { %3520 = vmatpush1.bf16.msra.mxu1 %v6496_v40 }
 0x2d4   :  { %3522 = vmatprep.subr.bf16.mxu1 %v6497_v4  ;;  %3584 = vmatpush1.bf16.msra.mxu0 %v6550_v21 }
 0x2d5   :  { %3586 = vmatprep.subr.bf16.mxu0 %v6551_v8 }
 0x2d7   :  { %3524 = vmatpush1.bf16.msra.mxu1 %v6552_v23 }
 0x2d8   :  { %3526 = vmatprep.subr.bf16.mxu1 %v6553_v43  ;;  %3588 = vmatpush1.bf16.msra.mxu0 %v6554_v31 }
 0x2d9   :  { %3590 = vmatprep.subr.bf16.mxu0 %v6555_v56 }
 0x2db   :  { %3528 = vmatpush1.bf16.msra.mxu1 %v6556_v36  ;;  %v6612_v36 = vld [vmem:[#allocation97_spill] sm:$0xff] }
 0x2dc   :  { %3530 = vmatprep.subr.bf16.mxu1 %v6557_v24  ;;  %3592 = vmatpush1.bf16.msra.mxu0 %v6558_v10  ;;  %v6569_v10 = vld [vmem:[#allocation80_spill] sm:$0xff] }
 0x2dd   :  { %3594 = vmatprep.subr.bf16.mxu0 %v6559_v63  ;;  %v6570_v63 = vld [vmem:[#allocation37_spill] sm:$0xff] }
 0x2df   :  { %3532 = vmatpush1.bf16.msra.mxu1 %v6560_v41  ;;  %v6571_v41 = vld [vmem:[#allocation39_spill] sm:$0xff] }
 0x2e0   :  { %3534 = vmatprep.subr.bf16.mxu1 %v6561_v7  ;;  %3596 = vmatpush1.bf16.msra.mxu0 %v6562_v34  ;;  %v6572_v7 = vld [vmem:[#allocation81_spill] sm:$0xff]  ;;  %v6573_v34 = vld [vmem:[#allocation82_spill] sm:$0xff] }
 0x2e1   :  { %3598 = vmatprep.subr.bf16.mxu0 %v6563_v49  ;;  %v6574_v49 = vld [vmem:[#allocation41_spill] sm:$0xff] }
 0x2e3   :  { %3536 = vmatpush1.bf16.msra.mxu1 %v6564_v53  ;;  %v6575_v53 = vld [vmem:[#allocation43_spill] sm:$0xff] }
 0x2e4   :  { %3538 = vmatprep.subr.bf16.mxu1 %v6565_v54  ;;  %3600 = vmatpush1.bf16.msra.mxu0 %v6566_v30  ;;  %v6576_v54 = vld [vmem:[#allocation83_spill] sm:$0xff]  ;;  %v6577_v30 = vld [vmem:[#allocation9_spill] sm:$0xff] }
 0x2e5   :  { %3602 = vmatprep.subr.bf16.mxu0 %v6567_v46  ;;  %v6578_v46 = vld [vmem:[#allocation45_spill] sm:$0xff] }
 0x2e7   :  { %3540 = vmatpush1.bf16.msra.mxu1 %v6568_v47  ;;  %v6579_v47 = vld [vmem:[#allocation47_spill] sm:$0xff] }
 0x2e8   :  { %3542 = vmatprep.subr.bf16.mxu1 %v6569_v10  ;;  %3604 = vmatpush1.bf16.msra.mxu0 %v6570_v63  ;;  %v6580_v63 = vld [vmem:[#allocation10_spill] sm:$0xff] }
 0x2e9   :  { %3606 = vmatprep.subr.bf16.mxu0 %v6571_v41  ;;  %v6581_v41 = vld [vmem:[#allocation11_spill] sm:$0xff] }
 0x2eb   :  { %3544 = vmatpush1.bf16.msra.mxu1 %v6572_v7  ;;  %v6582_v7 = vld [vmem:[#allocation12_spill] sm:$0xff] }
 0x2ec   :  { %3546 = vmatprep.subr.bf16.mxu1 %v6573_v34  ;;  %3608 = vmatpush1.bf16.msra.mxu0 %v6574_v49  ;;  %v6583_v34 = vld [vmem:[#allocation13_spill] sm:$0xff]  ;;  %v6584_v49 = vld [vmem:[#allocation14_spill] sm:$0xff] }
 0x2ed   :  { %3610 = vmatprep.subr.bf16.mxu0 %v6575_v53  ;;  %v6585_v53 = vld [vmem:[#allocation15_spill] sm:$0xff] }
 0x2ef   :  { %3548 = vmatpush1.bf16.msra.mxu1 %v6576_v54  ;;  %v6586_v54 = vld [vmem:[#allocation16_spill] sm:$0xff] }
 0x2f0   :  { %3614 = vmatprep.subr.bf16.mxu1 %v6577_v30  ;;  %3612 = vmatpush1.bf16.msra.mxu0 %v6578_v46  ;;  %v6587_v30 = vld [vmem:[#allocation18_spill] sm:$0xff]  ;;  %v6588_v46 = vld [vmem:[#allocation20_spill] sm:$0xff] }
 0x2f1   :  { %3678 = vmatprep.subr.bf16.mxu0 %v6579_v47  ;;  %v6589_v47 = vld [vmem:[#allocation22_spill] sm:$0xff] }
 0x2f2   :  { %1296 = vmatmul.mubr.f32.vlgmr.msra.gmra.mrb[8].mxu1 %v5423_v44  ;;  %v6590_v44 = vld [vmem:[#allocation24_spill] sm:$0xff] }
 0x2f3   :  { %3616 = vmatpush1.bf16.msra.mxu1 %v6580_v63  ;;  %v6591_v63 = vld [vmem:[#allocation26_spill] sm:$0xff] }
 0x2f4   :  { %3618 = vmatprep.subr.bf16.mxu1 %v6581_v41  ;;  %v6592_v41 = vld [vmem:[#allocation28_spill] sm:$0xff] }
 0x2f7   :  { %3620 = vmatpush1.bf16.msra.mxu1 %v6582_v7  ;;  %v6593_v7 = vld [vmem:[#allocation30_spill] sm:$0xff] }
 0x2f8   :  { %3622 = vmatprep.subr.bf16.mxu1 %v6583_v34  ;;  %v6594_v34 = vld [vmem:[#allocation32_spill] sm:$0xff] }
 0x2fb   :  { %3624 = vmatpush1.bf16.msra.mxu1 %v6584_v49  ;;  %v6595_v49 = vld [vmem:[#allocation34_spill] sm:$0xff] }
 0x2fc   :  { %3626 = vmatprep.subr.bf16.mxu1 %v6585_v53  ;;  %v6596_v53 = vld [vmem:[#allocation36_spill] sm:$0xff] }
 0x2ff   :  { %3628 = vmatpush1.bf16.msra.mxu1 %v6586_v54  ;;  %v6597_v54 = vld [vmem:[#allocation38_spill] sm:$0xff] }
 0x300   :  { %3630 = vmatprep.subr.bf16.mxu1 %v6587_v30  ;;  %v6598_v30 = vld [vmem:[#allocation40_spill] sm:$0xff] }
 0x303   :  { %3632 = vmatpush1.bf16.msra.mxu1 %v6588_v46  ;;  %v6599_v46 = vld [vmem:[#allocation42_spill] sm:$0xff] }
 0x304   :  { %3634 = vmatprep.subr.bf16.mxu1 %v6589_v47  ;;  %v6600_v47 = vld [vmem:[#allocation44_spill] sm:$0xff] }
 0x307   :  { %3636 = vmatpush1.bf16.msra.mxu1 %v6590_v44  ;;  %v6601_v44 = vld [vmem:[#allocation46_spill] sm:$0xff] }
 0x308   :  { %3638 = vmatprep.subr.bf16.mxu1 %v6591_v63  ;;  %v6602_v63 = vld [vmem:[#allocation48_spill] sm:$0xff] }
 0x30b   :  { %3640 = vmatpush1.bf16.msra.mxu1 %v6592_v41  ;;  %v6603_v41 = vld [vmem:[#allocation50_spill] sm:$0xff] }
 0x30c   :  { %3642 = vmatprep.subr.bf16.mxu1 %v6593_v7  ;;  %v6604_v7 = vld [vmem:[#allocation52_spill] sm:$0xff] }
 0x30f   :  { %3644 = vmatpush1.bf16.msra.mxu1 %v6594_v34  ;;  %v6605_v34 = vld [vmem:[#allocation54_spill] sm:$0xff] }
 0x310   :  { %3646 = vmatprep.subr.bf16.mxu1 %v6595_v49  ;;  %v6606_v49 = vld [vmem:[#allocation56_spill] sm:$0xff] }
 0x313   :  { %3648 = vmatpush1.bf16.msra.mxu1 %v6596_v53  ;;  %v6607_v53 = vld [vmem:[#allocation57_spill] sm:$0xff] }
 0x314   :  { %3650 = vmatprep.subr.bf16.mxu1 %v6597_v54  ;;  %v6608_v54 = vld [vmem:[#allocation58_spill] sm:$0xff] }
 0x317   :  { %3652 = vmatpush1.bf16.msra.mxu1 %v6598_v30  ;;  %v6609_v30 = vld [vmem:[#allocation59_spill] sm:$0xff] }
 0x318   :  { %3654 = vmatprep.subr.bf16.mxu1 %v6599_v46  ;;  %v6610_v46 = vld [vmem:[#allocation60_spill] sm:$0xff] }
 0x31b   :  { %3656 = vmatpush1.bf16.msra.mxu1 %v6600_v47  ;;  %v6611_v47 = vld [vmem:[#allocation8_spill] sm:$0xff] }
 0x31c   :  { %3658 = vmatprep.subr.bf16.mxu1 %v6601_v44 }
 0x31f   :  { %3660 = vmatpush1.bf16.msra.mxu1 %v6602_v63 }
 0x320   :  { %3662 = vmatprep.subr.bf16.mxu1 %v6603_v41 }
 0x323   :  { %3664 = vmatpush1.bf16.msra.mxu1 %v6604_v7 }
 0x324   :  { %3666 = vmatprep.subr.bf16.mxu1 %v6605_v34 }
 0x327   :  { %3668 = vmatpush1.bf16.msra.mxu1 %v6606_v49 }
 0x328   :  { %3670 = vmatprep.subr.bf16.mxu1 %v6607_v53 }
 0x32b   :  { %3672 = vmatpush1.bf16.msra.mxu1 %v6608_v54 }
 0x32c   :  { %3674 = vmatprep.subr.bf16.mxu1 %v6609_v30 }
 0x32f   :  { %3676 = vmatpush1.bf16.msra.mxu1 %v6610_v46 }
 0x330   :  { %3742 = vmatprep.subr.bf16.mxu1 %v6611_v47 }
 0x385   :  { %v1155_v44 = vpop.f32.mrb[6].mxu1  ;;  %v1226_v63 = vpop.f32.mrb[18].mxu0 }
 0x386   :  { %v1227_v41 = vadd.f32 %v1226_v63, %v5273_v58  ;;  %v1157_v10 = vpop.f32.mrb[7].mxu1  ;;  %v1228_v7 = vpop.f32.mrb[19].mxu0  ;;  %v1156_v63 = vadd.f32 %v1155_v44, %v5261_v57 }
 0x387   :  { %v1229_v34 = vadd.f32 %v1228_v7, %v5275_v0  ;;  %v1158_v7 = vadd.f32 %v1157_v10, %v5263_v5 }
 0x388   :  { %v1324_v24 = vrot.slane %v1227_v41, 4  ;;  %v1304_v41 = vrot.slane %v1156_v63, 4 }
 0x389   :  { %v1325_v49 = vrot.slane %v1229_v34, 4  ;;  %v1305_v34 = vrot.slane %v1158_v7, 4  ;;  %v6614_v7 = vld [vmem:[#allocation98_spill] sm:$0xff] }
 0x38a   :  { %v1328_v53 = vadd.f32 %v1324_v24, %v5279_v18  ;;  %v1358_v24 = vrot.slane %v5417_v62, 6 }
 0x38b   :  { %v1329_v54 = vadd.f32 %v1325_v49, %v6612_v36  ;;  %v1308_v49 = vadd.f32 %v1304_v41, %v5267_v37 }
 0x38c   :  { %v2903_v56 = vmul.f32 -1.442695, %v1328_v53  ;;  %v6613_v53 = vld [vmem:[#allocation93_spill] sm:$0xff] }
 0x38d   :  { %v2904_v30 = vmul.f32 -1.442695, %v1329_v54  ;;  %v1309_v54 = vadd.f32 %v1305_v34, %v6613_v53 }
 0x38e   :  { %4586 = vpow2.f32 %v2903_v56  ;;  %v1359_v56 = vrot.slane %v5419_v15, 6  ;;  %v6615_v15 = vld [vmem:[#allocation99_spill] sm:$0xff] }
 0x38f   :  { %4588 = vpow2.f32 %v2904_v30  ;;  %v2902_v36 = vmul.f32 -1.442695, %v1309_v54 }
 0x398   :  { %v4587_v46 = vpop.eup %4586 }
 0x399   :  { %v1336_v47 = vadd.f32 1.0, %v4587_v46  ;;  %v4589_v31 = vpop.eup %4588 }
 0x39a   :  { %v1337_v43 = vadd.f32 1.0, %v4589_v31  ;;  %v2901_v31 = vmul.f32 -1.442695, %v1308_v49 }
 0x39b   :  { %4590 = vrcp.f32 %v1336_v47 }
 0x39c   :  { %4592 = vrcp.f32 %v1337_v43 }
 0x39d   :  { %4594 = vpow2.f32 %v2901_v31 }
 0x39e   :  { %4596 = vpow2.f32 %v2902_v36 }
 0x3a5   :  { %v4591_v18 = vpop.eup %4590 }
 0x3a6   :  { %v1362_v30 = vmul.f32 %v4591_v18, %v1358_v24  ;;  %v4593_v46 = vpop.eup %4592 }
 0x3a7   :  { %v1363_v47 = vmul.f32 %v4593_v46, %v1359_v56  ;;  %v4595_v43 = vpop.eup %4594 }
 0x3a8   :  { %v4597_v10 = vpop.eup %4596  ;;  %v1316_v44 = vadd.f32 1.0, %v4595_v43  ;;  %v1354_v43 = vsub.f32 1.0, %v4591_v18  ;;  %v6616_v18 = vld [vmem:[#allocation72_spill] sm:$0xff] }
 0x3a9   :  { %v1317_v63 = vadd.f32 1.0, %v4597_v10 }
 0x3aa   :  { %4598 = vrcp.f32 %v1316_v44  ;;  %v1355_v44 = vsub.f32 1.0, %v4593_v46  ;;  %v6618_v46 = vld [vmem:[#allocation23_spill] sm:$0xff] }
 0x3ab   :  { %4600 = vrcp.f32 %v1317_v63 }
 0x3b4   :  { %v4599_v24 = vpop.eup %4598 }
 0x3b5   :  { %v4601_v56 = vpop.eup %4600 }
 0x3c5   :  { %v1297_v62 = vpop.f32.mrb[8].mxu1 }
 0x3c6   :  { %v1298_v41 = vadd.f32 %v1297_v62, %v6614_v7  ;;  %v1299_v37 = vpop.f32.mrb[9].mxu1 }
 0x3c7   :  { %v1300_v5 = vadd.f32 %v1299_v37, %v6615_v15 }
 0x3c8   :  { %v1344_v34 = vrot.slane %v1298_v41, 4  ;;  %v6621_v41 = vld [vmem:[#allocation25_spill] sm:$0xff] }
 0x3c9   :  { %v1345_v53 = vrot.slane %v1300_v5, 4 }
 0x3ca   :  { %v1348_v49 = vmul.f32 %v4599_v24, %v1344_v34  ;;  %v6622_v34 = vld [vmem:[#allocation27_spill] sm:$0xff] }
 0x3cb   :  { %v1349_v54 = vmul.f32 %v4601_v56, %v1345_v53  ;;  %v6623_v24 = vld [vmem:[#allocation75_spill] sm:$0xff]  ;;  %v6624_v56 = vld [vmem:[#allocation76_spill] sm:$0xff] }
 0x3cc   :  { %v1350_v36 = vadd.f32 %v1348_v49, %v5291_v14  ;;  %v6625_v49 = vld [vmem:[#allocation29_spill] sm:$0xff] }
 0x3cd   :  { %v1351_v31 = vadd.f32 %v1349_v54, %v5293_v60  ;;  %v6626_v54 = vld [vmem:[#allocation31_spill] sm:$0xff] }
 0x3ce   :  { %4602 = vtanh.f32 %v1350_v36  ;;  %v6627_v36 = vld [vmem:[#allocation77_spill] sm:$0xff] }
 0x3cf   :  { %4604 = vtanh.f32 %v1351_v31  ;;  %v6628_v31 = vld [vmem:[#allocation78_spill] sm:$0xff] }
 0x3d8   :  { %v4603_v10 = vpop.eup %4602 }
 0x3d9   :  { %v4605_v63 = vpop.eup %4604  ;;  %v1356_v62 = vmul.f32 %v4603_v10, %v1354_v43  ;;  %v6629_v43 = vld [vmem:[#allocation33_spill] sm:$0xff]  ;;  %v6630_v10 = vld [vmem:[#allocation35_spill] sm:$0xff] }
 0x3da   :  { %v1357_v7 = vmul.f32 %v4605_v63, %v1355_v44  ;;  %v6631_v44 = vld [vmem:[#allocation79_spill] sm:$0xff]  ;;  %v6632_v63 = vld [vmem:[#allocation80_spill] sm:$0xff] }
 0x3db   :  { %v5538_v57 = vadd.f32 %v1362_v30, %v1356_v62  ;;  %v6617_v30 = vld [vmem:[#allocation21_spill] sm:$0xff] }
 0x3dc   :  { %v5540_v37 = vadd.f32 %v1363_v47, %v1357_v7  ;;  %v6619_v47 = vld [vmem:[#allocation73_spill] sm:$0xff]  ;;  %v6620_v7 = vld [vmem:[#allocation74_spill] sm:$0xff] }
 0x3dd   :  { %v5544_v53 = vrot.slane %v5538_v57, 4  ;;  %v6633_v62 = vld [vmem:[#allocation37_spill] sm:$0xff] }
 0x3de   :  { %v1369_v5 = vrot.slane %v5540_v37, 4 }
 0x3e0   :  { %1436 = vmatprep.mubr.f32.mxu0 %v1369_v5  ;;  %1507 = vmatprep.mubr.f32.mxu1 %v1369_v5 }
 0x3e1   :  { %1437 = vmatmul.mubr.f32.vlgmr.msra.gmra.mrb[20].mxu0 %v5544_v53  ;;  %1508 = vmatmul.mubr.f32.vlgmr.msra.gmra.mrb[10].mxu1 %v5544_v53 }
 0x3e2   :  { %3680 = vmatpush1.bf16.msra.mxu0 %v6484_v22  ;;  %1578 = vmatprep.mubr.f32.mxu0 %v1369_v5  ;;  %v6634_v5 = vld [vmem:[#allocation39_spill] sm:$0xff] }
 0x3e3   :  { %3682 = vmatprep.subr.bf16.mxu0 %v6485_v11  ;;  %3744 = vmatpush1.bf16.msra.mxu1 %v4827_v12 }
 0x3e4   :  { %3746 = vmatprep.subr.bf16.mxu1 %v4835_v17 }
 0x3e6   :  { %3684 = vmatpush1.bf16.msra.mxu0 %v6486_v29 }
 0x3e7   :  { %3686 = vmatprep.subr.bf16.mxu0 %v6487_v6  ;;  %3748 = vmatpush1.bf16.msra.mxu1 %v4841_v20 }
 0x3e8   :  { %3750 = vmatprep.subr.bf16.mxu1 %v4847_v25 }
 0x3ea   :  { %3688 = vmatpush1.bf16.msra.mxu0 %v5072_v26 }
 0x3eb   :  { %3690 = vmatprep.subr.bf16.mxu0 %v5077_v52  ;;  %3752 = vmatpush1.bf16.msra.mxu1 %v4867_v35 }
 0x3ec   :  { %3754 = vmatprep.subr.bf16.mxu1 %v4879_v39 }
 0x3ee   :  { %3692 = vmatpush1.bf16.msra.mxu0 %v5084_v1 }
 0x3ef   :  { %3694 = vmatprep.subr.bf16.mxu0 %v5089_v38  ;;  %3756 = vmatpush1.bf16.msra.mxu1 %v4885_v48 }
 0x3f0   :  { %3758 = vmatprep.subr.bf16.mxu1 %v4890_v50 }
 0x3f2   :  { %3696 = vmatpush1.bf16.msra.mxu0 %v6488_v28 }
 0x3f3   :  { %3698 = vmatprep.subr.bf16.mxu0 %v6489_v13  ;;  %3760 = vmatpush1.bf16.msra.mxu1 %v4896_v55 }
 0x3f4   :  { %3762 = vmatprep.subr.bf16.mxu1 %v4900_v59 }
 0x3f6   :  { %3700 = vmatpush1.bf16.msra.mxu0 %v6490_v61 }
 0x3f7   :  { %3702 = vmatprep.subr.bf16.mxu0 %v6491_v42  ;;  %3764 = vmatpush1.bf16.msra.mxu1 %v4908_v3 }
 0x3f8   :  { %3766 = vmatprep.subr.bf16.mxu1 %v4913_v9 }
 0x3fa   :  { %3704 = vmatpush1.bf16.msra.mxu0 %v6492_v51 }
 0x3fb   :  { %3706 = vmatprep.subr.bf16.mxu0 %v6493_v2  ;;  %3768 = vmatpush1.bf16.msra.mxu1 %v4923_v19 }
 0x3fc   :  { %3770 = vmatprep.subr.bf16.mxu1 %v4928_v16 }
 0x3fe   :  { %3708 = vmatpush1.bf16.msra.mxu0 %v6494_v45 }
 0x3ff   :  { %3710 = vmatprep.subr.bf16.mxu0 %v6495_v27  ;;  %3772 = vmatpush1.bf16.msra.mxu1 %v4938_v32 }
 0x400   :  { %3774 = vmatprep.subr.bf16.mxu1 %v4943_v33 }
 0x402   :  { %3712 = vmatpush1.bf16.msra.mxu0 %v6496_v40 }
 0x403   :  { %3714 = vmatprep.subr.bf16.mxu0 %v6497_v4  ;;  %3776 = vmatpush1.bf16.msra.mxu1 %v6550_v21 }
 0x404   :  { %3778 = vmatprep.subr.bf16.mxu1 %v6551_v8 }
 0x406   :  { %3716 = vmatpush1.bf16.msra.mxu0 %v6552_v23 }
 0x407   :  { %3718 = vmatprep.subr.bf16.mxu0 %v6616_v18  ;;  %3780 = vmatpush1.bf16.msra.mxu1 %v6617_v30  ;;  %v6678_v30 = vld [vmem:[#allocation91_spill] sm:$0xff] }
 0x408   :  { %3782 = vmatprep.subr.bf16.mxu1 %v6618_v46 }
 0x40a   :  { %3720 = vmatpush1.bf16.msra.mxu0 %v6619_v47 }
 0x40b   :  { %3722 = vmatprep.subr.bf16.mxu0 %v6620_v7  ;;  %3784 = vmatpush1.bf16.msra.mxu1 %v6621_v41  ;;  %v6676_v41 = vld [vmem:[#allocation97_spill] sm:$0xff] }
 0x40c   :  { %3786 = vmatprep.subr.bf16.mxu1 %v6622_v34  ;;  %v6675_v34 = vld [vmem:[#allocation96_spill] sm:$0xff] }
 0x40e   :  { %3724 = vmatpush1.bf16.msra.mxu0 %v6623_v24 }
 0x40f   :  { %3726 = vmatprep.subr.bf16.mxu0 %v6624_v56  ;;  %3788 = vmatpush1.bf16.msra.mxu1 %v6625_v49  ;;  %v6635_v56 = vld [vmem:[#allocation81_spill] sm:$0xff]  ;;  %v6636_v49 = vld [vmem:[#allocation82_spill] sm:$0xff] }
 0x410   :  { %3790 = vmatprep.subr.bf16.mxu1 %v6626_v54  ;;  %v6637_v54 = vld [vmem:[#allocation41_spill] sm:$0xff] }
 0x412   :  { %3728 = vmatpush1.bf16.msra.mxu0 %v6627_v36  ;;  %v6638_v36 = vld [vmem:[#allocation43_spill] sm:$0xff] }
 0x413   :  { %3730 = vmatprep.subr.bf16.mxu0 %v6628_v31  ;;  %3792 = vmatpush1.bf16.msra.mxu1 %v6629_v43  ;;  %v6639_v31 = vld [vmem:[#allocation83_spill] sm:$0xff]  ;;  %v6640_v43 = vld [vmem:[#allocation9_spill] sm:$0xff] }
 0x414   :  { %3794 = vmatprep.subr.bf16.mxu1 %v6630_v10  ;;  %v6641_v10 = vld [vmem:[#allocation45_spill] sm:$0xff] }
 0x416   :  { %3732 = vmatpush1.bf16.msra.mxu0 %v6631_v44  ;;  %v6642_v44 = vld [vmem:[#allocation47_spill] sm:$0xff] }
 0x417   :  { %3734 = vmatprep.subr.bf16.mxu0 %v6632_v63  ;;  %3796 = vmatpush1.bf16.msra.mxu1 %v6633_v62  ;;  %v6643_v62 = vld [vmem:[#allocation10_spill] sm:$0xff] }
 0x418   :  { %3798 = vmatprep.subr.bf16.mxu1 %v6634_v5  ;;  %v6644_v5 = vld [vmem:[#allocation11_spill] sm:$0xff] }
 0x41a   :  { %3736 = vmatpush1.bf16.msra.mxu0 %v6635_v56  ;;  %v6645_v56 = vld [vmem:[#allocation12_spill] sm:$0xff] }
 0x41b   :  { %3738 = vmatprep.subr.bf16.mxu0 %v6636_v49  ;;  %3800 = vmatpush1.bf16.msra.mxu1 %v6637_v54  ;;  %v6646_v49 = vld [vmem:[#allocation13_spill] sm:$0xff]  ;;  %v6647_v54 = vld [vmem:[#allocation14_spill] sm:$0xff] }
 0x41c   :  { %3802 = vmatprep.subr.bf16.mxu1 %v6638_v36  ;;  %v6648_v36 = vld [vmem:[#allocation15_spill] sm:$0xff] }
 0x41e   :  { %3740 = vmatpush1.bf16.msra.mxu0 %v6639_v31  ;;  %v6649_v31 = vld [vmem:[#allocation16_spill] sm:$0xff] }
 0x41f   :  { %3806 = vmatprep.subr.bf16.mxu0 %v6640_v43  ;;  %3804 = vmatpush1.bf16.msra.mxu1 %v6641_v10  ;;  %v6650_v43 = vld [vmem:[#allocation18_spill] sm:$0xff]  ;;  %v6651_v10 = vld [vmem:[#allocation20_spill] sm:$0xff] }
 0x420   :  { %3870 = vmatprep.subr.bf16.mxu1 %v6642_v44  ;;  %v6652_v44 = vld [vmem:[#allocation22_spill] sm:$0xff] }
 0x421   :  { %1579 = vmatmul.mubr.f32.vlgmr.msra.gmra.mrb[22].mxu0 %v5544_v53  ;;  %v6653_v53 = vld [vmem:[#allocation24_spill] sm:$0xff] }
 0x422   :  { %3808 = vmatpush1.bf16.msra.mxu0 %v6643_v62  ;;  %v6654_v62 = vld [vmem:[#allocation26_spill] sm:$0xff] }
 0x423   :  { %3810 = vmatprep.subr.bf16.mxu0 %v6644_v5  ;;  %v6655_v5 = vld [vmem:[#allocation28_spill] sm:$0xff] }
 0x426   :  { %3812 = vmatpush1.bf16.msra.mxu0 %v6645_v56  ;;  %v6656_v56 = vld [vmem:[#allocation30_spill] sm:$0xff] }
 0x427   :  { %3814 = vmatprep.subr.bf16.mxu0 %v6646_v49  ;;  %v6657_v49 = vld [vmem:[#allocation32_spill] sm:$0xff] }
 0x42a   :  { %3816 = vmatpush1.bf16.msra.mxu0 %v6647_v54  ;;  %v6658_v54 = vld [vmem:[#allocation34_spill] sm:$0xff] }
 0x42b   :  { %3818 = vmatprep.subr.bf16.mxu0 %v6648_v36  ;;  %v6659_v36 = vld [vmem:[#allocation36_spill] sm:$0xff] }
 0x42e   :  { %3820 = vmatpush1.bf16.msra.mxu0 %v6649_v31  ;;  %v6660_v31 = vld [vmem:[#allocation38_spill] sm:$0xff] }
 0x42f   :  { %3822 = vmatprep.subr.bf16.mxu0 %v6650_v43  ;;  %v6661_v43 = vld [vmem:[#allocation40_spill] sm:$0xff] }
 0x432   :  { %3824 = vmatpush1.bf16.msra.mxu0 %v6651_v10  ;;  %v6662_v10 = vld [vmem:[#allocation42_spill] sm:$0xff] }
 0x433   :  { %3826 = vmatprep.subr.bf16.mxu0 %v6652_v44  ;;  %v6663_v44 = vld [vmem:[#allocation44_spill] sm:$0xff] }
 0x436   :  { %3828 = vmatpush1.bf16.msra.mxu0 %v6653_v53  ;;  %v6664_v53 = vld [vmem:[#allocation46_spill] sm:$0xff] }
 0x437   :  { %3830 = vmatprep.subr.bf16.mxu0 %v6654_v62  ;;  %v6665_v62 = vld [vmem:[#allocation48_spill] sm:$0xff] }
 0x43a   :  { %3832 = vmatpush1.bf16.msra.mxu0 %v6655_v5  ;;  %v6666_v5 = vld [vmem:[#allocation50_spill] sm:$0xff] }
 0x43b   :  { %3834 = vmatprep.subr.bf16.mxu0 %v6656_v56  ;;  %v6667_v56 = vld [vmem:[#allocation52_spill] sm:$0xff] }
 0x43e   :  { %3836 = vmatpush1.bf16.msra.mxu0 %v6657_v49  ;;  %v6668_v49 = vld [vmem:[#allocation54_spill] sm:$0xff] }
 0x43f   :  { %3838 = vmatprep.subr.bf16.mxu0 %v6658_v54  ;;  %v6669_v54 = vld [vmem:[#allocation56_spill] sm:$0xff] }
 0x442   :  { %3840 = vmatpush1.bf16.msra.mxu0 %v6659_v36  ;;  %v6670_v36 = vld [vmem:[#allocation57_spill] sm:$0xff] }
 0x443   :  { %3842 = vmatprep.subr.bf16.mxu0 %v6660_v31  ;;  %v6671_v31 = vld [vmem:[#allocation58_spill] sm:$0xff] }
 0x446   :  { %3844 = vmatpush1.bf16.msra.mxu0 %v6661_v43  ;;  %v6672_v43 = vld [vmem:[#allocation59_spill] sm:$0xff] }
 0x447   :  { %3846 = vmatprep.subr.bf16.mxu0 %v6662_v10  ;;  %v6673_v10 = vld [vmem:[#allocation60_spill] sm:$0xff] }
 0x44a   :  { %3848 = vmatpush1.bf16.msra.mxu0 %v6663_v44  ;;  %v6674_v44 = vld [vmem:[#allocation8_spill] sm:$0xff] }
 0x44b   :  { %3850 = vmatprep.subr.bf16.mxu0 %v6664_v53 }
 0x44e   :  { %3852 = vmatpush1.bf16.msra.mxu0 %v6665_v62 }
 0x44f   :  { %3854 = vmatprep.subr.bf16.mxu0 %v6666_v5 }
 0x452   :  { %3856 = vmatpush1.bf16.msra.mxu0 %v6667_v56 }
 0x453   :  { %3858 = vmatprep.subr.bf16.mxu0 %v6668_v49 }
 0x456   :  { %3860 = vmatpush1.bf16.msra.mxu0 %v6669_v54 }
 0x457   :  { %3862 = vmatprep.subr.bf16.mxu0 %v6670_v36 }
 0x45a   :  { %3864 = vmatpush1.bf16.msra.mxu0 %v6671_v31 }
 0x45b   :  { %3866 = vmatprep.subr.bf16.mxu0 %v6672_v43 }
 0x45e   :  { %3868 = vmatpush1.bf16.msra.mxu0 %v6673_v10 }
 0x45f   :  { %3934 = vmatprep.subr.bf16.mxu0 %v6674_v44 }
 0x4b4   :  { %v1438_v53 = vpop.f32.mrb[20].mxu0  ;;  %v1509_v62 = vpop.f32.mrb[10].mxu1 }
 0x4b5   :  { %v1510_v5 = vadd.f32 %v1509_v62, %v5273_v58  ;;  %v1440_v63 = vpop.f32.mrb[21].mxu0  ;;  %v1511_v56 = vpop.f32.mrb[11].mxu1  ;;  %v6677_v62 = vld [vmem:[#allocation90_spill] sm:$0xff] }
 0x4b6   :  { %v1512_v49 = vadd.f32 %v1511_v56, %v5275_v0  ;;  %v1439_v58 = vadd.f32 %v1438_v53, %v6677_v62  ;;  %v1441_v56 = vadd.f32 %v1440_v63, %v6678_v30 }
 0x4b7   :  { %v1607_v24 = vrot.slane %v1510_v5, 2 }
 0x4b8   :  { %v1608_v54 = vrot.slane %v1512_v49, 2  ;;  %v1587_v5 = vrot.slane %v1439_v58, 2  ;;  %v1588_v49 = vrot.slane %v1441_v56, 2  ;;  %v6681_v56 = vld [vmem:[#allocation98_spill] sm:$0xff] }
 0x4b9   :  { %v1611_v36 = vadd.f32 %v1607_v24, %v6675_v34  ;;  %v1641_v34 = vrot.slane %v5538_v57, 6 }
 0x4ba   :  { %v1612_v31 = vadd.f32 %v1608_v54, %v6676_v41  ;;  %v6679_v41 = vld [vmem:[#allocation92_spill] sm:$0xff] }
 0x4bb   :  { %v2907_v7 = vmul.f32 -1.442695, %v1611_v36  ;;  %v1591_v54 = vadd.f32 %v1587_v5, %v6679_v41  ;;  %v6680_v36 = vld [vmem:[#allocation93_spill] sm:$0xff] }
 0x4bc   :  { %v2908_v43 = vmul.f32 -1.442695, %v1612_v31  ;;  %v1592_v31 = vadd.f32 %v1588_v49, %v6680_v36 }
 0x4bd   :  { %4606 = vpow2.f32 %v2907_v7  ;;  %v1642_v7 = vrot.slane %v5540_v37, 6 }
 0x4be   :  { %4608 = vpow2.f32 %v2908_v43  ;;  %v2906_v0 = vmul.f32 -1.442695, %v1592_v31 }
 0x4c7   :  { %v4607_v10 = vpop.eup %4606 }
 0x4c8   :  { %v1619_v44 = vadd.f32 1.0, %v4607_v10  ;;  %v4609_v47 = vpop.eup %4608 }
 0x4c9   :  { %v1620_v46 = vadd.f32 1.0, %v4609_v47  ;;  %v2905_v47 = vmul.f32 -1.442695, %v1591_v54 }
 0x4ca   :  { %4610 = vrcp.f32 %v1619_v44 }
 0x4cb   :  { %4612 = vrcp.f32 %v1620_v46 }
 0x4cc   :  { %4614 = vpow2.f32 %v2905_v47 }
 0x4cd   :  { %4616 = vpow2.f32 %v2906_v0 }
 0x4d4   :  { %v4611_v24 = vpop.eup %4610 }
 0x4d5   :  { %v1645_v43 = vmul.f32 %v4611_v24, %v1641_v34  ;;  %v4613_v10 = vpop.eup %4612 }
 0x4d6   :  { %v1646_v44 = vmul.f32 %v4613_v10, %v1642_v7  ;;  %v4615_v46 = vpop.eup %4614 }
 0x4d7   :  { %v4617_v63 = vpop.eup %4616  ;;  %v1599_v58 = vadd.f32 1.0, %v4615_v46  ;;  %v1637_v46 = vsub.f32 1.0, %v4611_v24  ;;  %v6685_v24 = vld [vmem:[#allocation74_spill] sm:$0xff] }
 0x4d8   :  { %v1600_v53 = vadd.f32 1.0, %v4617_v63 }
 0x4d9   :  { %4618 = vrcp.f32 %v1599_v58  ;;  %v1638_v58 = vsub.f32 1.0, %v4613_v10  ;;  %v6687_v10 = vld [vmem:[#allocation27_spill] sm:$0xff] }
 0x4da   :  { %4620 = vrcp.f32 %v1600_v53 }
 0x4e3   :  { %v4619_v34 = vpop.eup %4618 }
 0x4e4   :  { %v4621_v7 = vpop.eup %4620 }
 0x4f4   :  { %v1580_v57 = vpop.f32.mrb[22].mxu0 }
 0x4f5   :  { %v1581_v5 = vadd.f32 %v1580_v57, %v6681_v56  ;;  %v1582_v41 = vpop.f32.mrb[23].mxu0 }
 0x4f6   :  { %v1583_v37 = vadd.f32 %v1582_v41, %v6615_v15 }
 0x4f7   :  { %v1627_v49 = vrot.slane %v1581_v5, 2 }
 0x4f8   :  { %v1628_v36 = vrot.slane %v1583_v37, 2 }
 0x4f9   :  { %v1631_v54 = vmul.f32 %v4619_v34, %v1627_v49  ;;  %v6690_v49 = vld [vmem:[#allocation29_spill] sm:$0xff]  ;;  %v6691_v34 = vld [vmem:[#allocation31_spill] sm:$0xff] }
 0x4fa   :  { %v1632_v31 = vmul.f32 %v4621_v7, %v1628_v36  ;;  %v6692_v36 = vld [vmem:[#allocation77_spill] sm:$0xff]  ;;  %v6693_v7 = vld [vmem:[#allocation78_spill] sm:$0xff] }
 0x4fb   :  { %v1633_v0 = vadd.f32 %v1631_v54, %v5291_v14  ;;  %v6682_v14 = vld [vmem:[#allocation21_spill] sm:$0xff] }
 0x4fc   :  { %v1634_v47 = vadd.f32 %v1632_v31, %v5293_v60  ;;  %v6683_v60 = vld [vmem:[#allocation23_spill] sm:$0xff]  ;;  %v6694_v54 = vld [vmem:[#allocation33_spill] sm:$0xff] }
 0x4fd   :  { %4622 = vtanh.f32 %v1633_v0  ;;  %v6695_v31 = vld [vmem:[#allocation35_spill] sm:$0xff] }
 0x4fe   :  { %4624 = vtanh.f32 %v1634_v47  ;;  %v6696_v0 = vld [vmem:[#allocation79_spill] sm:$0xff]  ;;  %v6697_v47 = vld [vmem:[#allocation80_spill] sm:$0xff] }
 0x507   :  { %v4623_v63 = vpop.eup %4622 }
 0x508   :  { %v4625_v53 = vpop.eup %4624  ;;  %v1639_v57 = vmul.f32 %v4623_v63, %v1637_v46  ;;  %v6698_v46 = vld [vmem:[#allocation37_spill] sm:$0xff]  ;;  %v6699_v63 = vld [vmem:[#allocation39_spill] sm:$0xff] }
 0x509   :  { %v1640_v56 = vmul.f32 %v4625_v53, %v1638_v58  ;;  %v6700_v58 = vld [vmem:[#allocation81_spill] sm:$0xff]  ;;  %v6701_v53 = vld [vmem:[#allocation82_spill] sm:$0xff] }
 0x50a   :  { %v1647_v30 = vadd.f32 %v1645_v43, %v1639_v57  ;;  %v6686_v43 = vld [vmem:[#allocation25_spill] sm:$0xff] }
 0x50b   :  { %v1648_v41 = vadd.f32 %v1646_v44, %v1640_v56  ;;  %v6688_v44 = vld [vmem:[#allocation75_spill] sm:$0xff]  ;;  %v6689_v56 = vld [vmem:[#allocation76_spill] sm:$0xff]  ;;  %v6702_v57 = vld [vmem:[#allocation41_spill] sm:$0xff] }
 0x50c   :  { %v5661_v37 = vrot.slane %v1647_v30, 6  ;;  %v6684_v30 = vld [vmem:[#allocation73_spill] sm:$0xff] }
 0x50d   :  { %v5659_v5 = vrot.slane %v1648_v41, 6  ;;  %v6703_v41 = vld [vmem:[#allocation43_spill] sm:$0xff] }
 0x50f   :  { %1719 = vmatprep.mubr.f32.mxu1 %v5659_v5  ;;  %1790 = vmatprep.mubr.f32.mxu0 %v5659_v5 }
 0x510   :  { %1720 = vmatmul.mubr.f32.vlgmr.msra.gmra.mrb[12].mxu1 %v5661_v37  ;;  %1791 = vmatmul.mubr.f32.vlgmr.msra.gmra.mrb[24].mxu0 %v5661_v37 }
 0x511   :  { %3872 = vmatpush1.bf16.msra.mxu1 %v6484_v22  ;;  %1861 = vmatprep.mubr.f32.mxu1 %v5659_v5 }
 0x512   :  { %3874 = vmatprep.subr.bf16.mxu1 %v6485_v11  ;;  %3936 = vmatpush1.bf16.msra.mxu0 %v4827_v12 }
 0x513   :  { %3938 = vmatprep.subr.bf16.mxu0 %v4835_v17 }
 0x515   :  { %3876 = vmatpush1.bf16.msra.mxu1 %v6486_v29 }
 0x516   :  { %3878 = vmatprep.subr.bf16.mxu1 %v6487_v6  ;;  %3940 = vmatpush1.bf16.msra.mxu0 %v4841_v20 }
 0x517   :  { %3942 = vmatprep.subr.bf16.mxu0 %v4847_v25 }
 0x519   :  { %3880 = vmatpush1.bf16.msra.mxu1 %v5072_v26 }
 0x51a   :  { %3882 = vmatprep.subr.bf16.mxu1 %v5077_v52  ;;  %3944 = vmatpush1.bf16.msra.mxu0 %v4867_v35 }
 0x51b   :  { %3946 = vmatprep.subr.bf16.mxu0 %v4879_v39 }
 0x51d   :  { %3884 = vmatpush1.bf16.msra.mxu1 %v5084_v1 }
 0x51e   :  { %3886 = vmatprep.subr.bf16.mxu1 %v5089_v38  ;;  %3948 = vmatpush1.bf16.msra.mxu0 %v4885_v48 }
 0x51f   :  { %3950 = vmatprep.subr.bf16.mxu0 %v4890_v50 }
 0x521   :  { %3888 = vmatpush1.bf16.msra.mxu1 %v6488_v28 }
 0x522   :  { %3890 = vmatprep.subr.bf16.mxu1 %v6489_v13  ;;  %3952 = vmatpush1.bf16.msra.mxu0 %v4896_v55 }
 0x523   :  { %3954 = vmatprep.subr.bf16.mxu0 %v4900_v59 }
 0x525   :  { %3892 = vmatpush1.bf16.msra.mxu1 %v6490_v61 }
 0x526   :  { %3894 = vmatprep.subr.bf16.mxu1 %v6491_v42  ;;  %3956 = vmatpush1.bf16.msra.mxu0 %v4908_v3 }
 0x527   :  { %3958 = vmatprep.subr.bf16.mxu0 %v4913_v9 }
 0x529   :  { %3896 = vmatpush1.bf16.msra.mxu1 %v6492_v51 }
 0x52a   :  { %3898 = vmatprep.subr.bf16.mxu1 %v6493_v2  ;;  %3960 = vmatpush1.bf16.msra.mxu0 %v4923_v19 }
 0x52b   :  { %3962 = vmatprep.subr.bf16.mxu0 %v4928_v16 }
 0x52d   :  { %3900 = vmatpush1.bf16.msra.mxu1 %v6494_v45 }
 0x52e   :  { %3902 = vmatprep.subr.bf16.mxu1 %v6495_v27  ;;  %3964 = vmatpush1.bf16.msra.mxu0 %v4938_v32 }
 0x52f   :  { %3966 = vmatprep.subr.bf16.mxu0 %v4943_v33 }
 0x531   :  { %3904 = vmatpush1.bf16.msra.mxu1 %v6496_v40 }
 0x532   :  { %3906 = vmatprep.subr.bf16.mxu1 %v6497_v4  ;;  %3968 = vmatpush1.bf16.msra.mxu0 %v6550_v21 }
 0x533   :  { %3970 = vmatprep.subr.bf16.mxu0 %v6551_v8 }
 0x535   :  { %3908 = vmatpush1.bf16.msra.mxu1 %v6552_v23 }
 0x536   :  { %3910 = vmatprep.subr.bf16.mxu1 %v6616_v18  ;;  %3972 = vmatpush1.bf16.msra.mxu0 %v6682_v14 }
 0x537   :  { %3974 = vmatprep.subr.bf16.mxu0 %v6683_v60 }
 0x539   :  { %3912 = vmatpush1.bf16.msra.mxu1 %v6684_v30  ;;  %v6746_v30 = vld [vmem:[#allocation87_spill] sm:$0xff] }
 0x53a   :  { %3914 = vmatprep.subr.bf16.mxu1 %v6685_v24  ;;  %3976 = vmatpush1.bf16.msra.mxu0 %v6686_v43 }
 0x53b   :  { %3978 = vmatprep.subr.bf16.mxu0 %v6687_v10  ;;  %v6743_v10 = vld [vmem:[#allocation94_spill] sm:$0xff] }
 0x53d   :  { %3916 = vmatpush1.bf16.msra.mxu1 %v6688_v44 }
 0x53e   :  { %3918 = vmatprep.subr.bf16.mxu1 %v6689_v56  ;;  %3980 = vmatpush1.bf16.msra.mxu0 %v6690_v49  ;;  %v6741_v49 = vld [vmem:[#allocation84_spill] sm:$0xff]  ;;  %v6742_v56 = vld [vmem:[#allocation85_spill] sm:$0xff] }
 0x53f   :  { %3982 = vmatprep.subr.bf16.mxu0 %v6691_v34  ;;  %v6740_v34 = vld [vmem:[#allocation91_spill] sm:$0xff] }
 0x541   :  { %3920 = vmatpush1.bf16.msra.mxu1 %v6692_v36 }
 0x542   :  { %3922 = vmatprep.subr.bf16.mxu1 %v6693_v7  ;;  %3984 = vmatpush1.bf16.msra.mxu0 %v6694_v54  ;;  %v6704_v7 = vld [vmem:[#allocation83_spill] sm:$0xff]  ;;  %v6705_v54 = vld [vmem:[#allocation9_spill] sm:$0xff] }
 0x543   :  { %3986 = vmatprep.subr.bf16.mxu0 %v6695_v31  ;;  %v6706_v31 = vld [vmem:[#allocation45_spill] sm:$0xff] }
 0x545   :  { %3924 = vmatpush1.bf16.msra.mxu1 %v6696_v0  ;;  %v6707_v0 = vld [vmem:[#allocation47_spill] sm:$0xff] }
 0x546   :  { %3926 = vmatprep.subr.bf16.mxu1 %v6697_v47  ;;  %3988 = vmatpush1.bf16.msra.mxu0 %v6698_v46  ;;  %v6708_v46 = vld [vmem:[#allocation10_spill] sm:$0xff]  ;;  %v6718_v47 = vld [vmem:[#allocation24_spill] sm:$0xff] }
 0x547   :  { %3990 = vmatprep.subr.bf16.mxu0 %v6699_v63  ;;  %v6709_v63 = vld [vmem:[#allocation11_spill] sm:$0xff] }
 0x549   :  { %3928 = vmatpush1.bf16.msra.mxu1 %v6700_v58  ;;  %v6710_v58 = vld [vmem:[#allocation12_spill] sm:$0xff] }
 0x54a   :  { %3930 = vmatprep.subr.bf16.mxu1 %v6701_v53  ;;  %3992 = vmatpush1.bf16.msra.mxu0 %v6702_v57  ;;  %v6711_v53 = vld [vmem:[#allocation13_spill] sm:$0xff]  ;;  %v6712_v57 = vld [vmem:[#allocation14_spill] sm:$0xff] }
 0x54b   :  { %3994 = vmatprep.subr.bf16.mxu0 %v6703_v41  ;;  %v6713_v41 = vld [vmem:[#allocation15_spill] sm:$0xff] }
 0x54d   :  { %3932 = vmatpush1.bf16.msra.mxu1 %v6704_v7  ;;  %v6714_v7 = vld [vmem:[#allocation16_spill] sm:$0xff] }
 0x54e   :  { %3998 = vmatprep.subr.bf16.mxu1 %v6705_v54  ;;  %3996 = vmatpush1.bf16.msra.mxu0 %v6706_v31  ;;  %v6715_v54 = vld [vmem:[#allocation18_spill] sm:$0xff]  ;;  %v6716_v31 = vld [vmem:[#allocation20_spill] sm:$0xff] }
 0x54f   :  { %4062 = vmatprep.subr.bf16.mxu0 %v6707_v0  ;;  %v6717_v0 = vld [vmem:[#allocation22_spill] sm:$0xff] }
 0x550   :  { %1862 = vmatmul.mubr.f32.vlgmr.msra.gmra.mrb[14].mxu1 %v5661_v37 }
 0x551   :  { %4000 = vmatpush1.bf16.msra.mxu1 %v6708_v46  ;;  %v6719_v46 = vld [vmem:[#allocation26_spill] sm:$0xff] }
 0x552   :  { %4002 = vmatprep.subr.bf16.mxu1 %v6709_v63  ;;  %v6720_v63 = vld [vmem:[#allocation28_spill] sm:$0xff] }
 0x555   :  { %4004 = vmatpush1.bf16.msra.mxu1 %v6710_v58  ;;  %v6721_v58 = vld [vmem:[#allocation30_spill] sm:$0xff] }
 0x556   :  { %4006 = vmatprep.subr.bf16.mxu1 %v6711_v53  ;;  %v6722_v53 = vld [vmem:[#allocation32_spill] sm:$0xff] }
 0x559   :  { %4008 = vmatpush1.bf16.msra.mxu1 %v6712_v57  ;;  %v6723_v57 = vld [vmem:[#allocation34_spill] sm:$0xff] }
 0x55a   :  { %4010 = vmatprep.subr.bf16.mxu1 %v6713_v41  ;;  %v6724_v41 = vld [vmem:[#allocation36_spill] sm:$0xff] }
 0x55d   :  { %4012 = vmatpush1.bf16.msra.mxu1 %v6714_v7  ;;  %v6725_v7 = vld [vmem:[#allocation38_spill] sm:$0xff] }
 0x55e   :  { %4014 = vmatprep.subr.bf16.mxu1 %v6715_v54  ;;  %v6726_v54 = vld [vmem:[#allocation40_spill] sm:$0xff] }
 0x561   :  { %4016 = vmatpush1.bf16.msra.mxu1 %v6716_v31  ;;  %v6727_v31 = vld [vmem:[#allocation42_spill] sm:$0xff] }
 0x562   :  { %4018 = vmatprep.subr.bf16.mxu1 %v6717_v0  ;;  %v6728_v0 = vld [vmem:[#allocation44_spill] sm:$0xff] }
 0x565   :  { %4020 = vmatpush1.bf16.msra.mxu1 %v6718_v47  ;;  %v6729_v47 = vld [vmem:[#allocation46_spill] sm:$0xff] }
 0x566   :  { %4022 = vmatprep.subr.bf16.mxu1 %v6719_v46  ;;  %v6730_v46 = vld [vmem:[#allocation48_spill] sm:$0xff] }
 0x569   :  { %4024 = vmatpush1.bf16.msra.mxu1 %v6720_v63  ;;  %v6731_v63 = vld [vmem:[#allocation50_spill] sm:$0xff] }
 0x56a   :  { %4026 = vmatprep.subr.bf16.mxu1 %v6721_v58  ;;  %v6732_v58 = vld [vmem:[#allocation52_spill] sm:$0xff] }
 0x56d   :  { %4028 = vmatpush1.bf16.msra.mxu1 %v6722_v53  ;;  %v6733_v53 = vld [vmem:[#allocation54_spill] sm:$0xff] }
 0x56e   :  { %4030 = vmatprep.subr.bf16.mxu1 %v6723_v57  ;;  %v6734_v57 = vld [vmem:[#allocation56_spill] sm:$0xff] }
 0x571   :  { %4032 = vmatpush1.bf16.msra.mxu1 %v6724_v41  ;;  %v6735_v41 = vld [vmem:[#allocation57_spill] sm:$0xff] }
 0x572   :  { %4034 = vmatprep.subr.bf16.mxu1 %v6725_v7  ;;  %v6736_v7 = vld [vmem:[#allocation58_spill] sm:$0xff] }
 0x575   :  { %4036 = vmatpush1.bf16.msra.mxu1 %v6726_v54  ;;  %v6737_v54 = vld [vmem:[#allocation59_spill] sm:$0xff] }
 0x576   :  { %4038 = vmatprep.subr.bf16.mxu1 %v6727_v31  ;;  %v6738_v31 = vld [vmem:[#allocation60_spill] sm:$0xff] }
 0x579   :  { %4040 = vmatpush1.bf16.msra.mxu1 %v6728_v0  ;;  %v6739_v0 = vld [vmem:[#allocation8_spill] sm:$0xff] }
 0x57a   :  { %4042 = vmatprep.subr.bf16.mxu1 %v6729_v47 }
 0x57d   :  { %4044 = vmatpush1.bf16.msra.mxu1 %v6730_v46 }
 0x57e   :  { %4046 = vmatprep.subr.bf16.mxu1 %v6731_v63 }
 0x581   :  { %4048 = vmatpush1.bf16.msra.mxu1 %v6732_v58 }
 0x582   :  { %4050 = vmatprep.subr.bf16.mxu1 %v6733_v53 }
 0x585   :  { %4052 = vmatpush1.bf16.msra.mxu1 %v6734_v57 }
 0x586   :  { %4054 = vmatprep.subr.bf16.mxu1 %v6735_v41 }
 0x589   :  { %4056 = vmatpush1.bf16.msra.mxu1 %v6736_v7 }
 0x58a   :  { %4058 = vmatprep.subr.bf16.mxu1 %v6737_v54 }
 0x58d   :  { %4060 = vmatpush1.bf16.msra.mxu1 %v6738_v31  ;;  %v6744_v31 = vld [vmem:[#allocation95_spill] sm:$0xff] }
 0x58e   :  { %4126 = vmatprep.subr.bf16.mxu1 %v6739_v0  ;;  %v6745_v0 = vld [vmem:[#allocation86_spill] sm:$0xff] }
 0x5e3   :  { %v1721_v47 = vpop.f32.mrb[12].mxu1  ;;  %v1792_v46 = vpop.f32.mrb[24].mxu0 }
 0x5e4   :  { %v1723_v36 = vpop.f32.mrb[13].mxu1  ;;  %v1794_v63 = vpop.f32.mrb[25].mxu0  ;;  %v1722_v58 = vadd.f32 %v1721_v47, %v6677_v62  ;;  %v1793_v54 = vadd.f32 %v1792_v46, %v6743_v10 }
 0x5e5   :  { %v1724_v53 = vadd.f32 %v1723_v36, %v6740_v34  ;;  %v1795_v43 = vadd.f32 %v1794_v63, %v6744_v31 }
 0x5e6   :  { %v1868_v57 = vadd.f32 %v1722_v58, %v6741_v49  ;;  %v1882_v24 = vadd.f32 %v1793_v54, %v6745_v0 }
 0x5e7   :  { %v1869_v41 = vadd.f32 %v1724_v53, %v6742_v56  ;;  %v1883_v60 = vadd.f32 %v1795_v43, %v6746_v30 }
 0x5e8   :  { %v2909_v44 = vmul.f32 -1.442695, %v1868_v57  ;;  %v2911_v14 = vmul.f32 -1.442695, %v1882_v24 }
 0x5e9   :  { %v2910_v7 = vmul.f32 -1.442695, %v1869_v41  ;;  %v2912_v47 = vmul.f32 -1.442695, %v1883_v60 }
 0x5ea   :  { %4626 = vpow2.f32 %v2909_v44 }
 0x5eb   :  { %4628 = vpow2.f32 %v2910_v7  ;;  %v6747_v7 = vld [vmem:[#allocation98_spill] sm:$0xff] }
 0x5ec   :  { %4630 = vpow2.f32 %v2911_v14 }
 0x5ed   :  { %4632 = vpow2.f32 %v2912_v47 }
 0x5f4   :  { %v4627_v62 = vpop.eup %4626 }
 0x5f5   :  { %v4629_v36 = vpop.eup %4628  ;;  %v1876_v58 = vadd.f32 1.0, %v4627_v62  ;;  %v6748_v62 = vld [vmem:[#allocation88_spill] sm:$0xff] }
 0x5f6   :  { %v1877_v53 = vadd.f32 1.0, %v4629_v36  ;;  %v4631_v57 = vpop.eup %4630  ;;  %v6749_v36 = vld [vmem:[#allocation89_spill] sm:$0xff] }
 0x5f7   :  { %4634 = vrcp.f32 %v1876_v58  ;;  %v4633_v46 = vpop.eup %4632  ;;  %v1890_v44 = vadd.f32 1.0, %v4631_v57 }
 0x5f8   :  { %4636 = vrcp.f32 %v1877_v53  ;;  %v1891_v41 = vadd.f32 1.0, %v4633_v46 }
 0x5f9   :  { %4638 = vrcp.f32 %v1890_v44 }
 0x5fa   :  { %4640 = vrcp.f32 %v1891_v41  ;;  %v6755_v41 = vld [vmem:[#allocation27_spill] sm:$0xff] }
 0x601   :  { %v4635_v0 = vpop.eup %4634 }
 0x602   :  { %v4637_v60 = vpop.eup %4636 }
 0x603   :  { %v4639_v53 = vpop.eup %4638 }
 0x604   :  { %v4641_v57 = vpop.eup %4640  ;;  %v1902_v46 = vsub.f32 1.0, %v4639_v53 }
 0x623   :  { %v1863_v63 = vpop.f32.mrb[14].mxu1 }
 0x624   :  { %v1864_v10 = vadd.f32 %v1863_v63, %v6747_v7  ;;  %v1865_v54 = vpop.f32.mrb[15].mxu1  ;;  %v1903_v63 = vsub.f32 1.0, %v4641_v57 }
 0x625   :  { %v1866_v24 = vadd.f32 %v1865_v54, %v6615_v15  ;;  %v1906_v54 = vmul.f32 %v4639_v53, %v5661_v37  ;;  %v6752_v37 = vld [vmem:[#allocation73_spill] sm:$0xff]  ;;  %v6763_v53 = vld [vmem:[#allocation35_spill] sm:$0xff] }
 0x626   :  { %v1896_v43 = vmul.f32 %v4635_v0, %v1864_v10  ;;  %v1907_v10 = vmul.f32 %v4641_v57, %v5659_v5  ;;  %v6751_v5 = vld [vmem:[#allocation23_spill] sm:$0xff] }
 0x627   :  { %v1897_v14 = vmul.f32 %v4637_v60, %v1866_v24  ;;  %v6757_v24 = vld [vmem:[#allocation76_spill] sm:$0xff]  ;;  %v6758_v60 = vld [vmem:[#allocation29_spill] sm:$0xff]  ;;  %v6764_v57 = vld [vmem:[#allocation79_spill] sm:$0xff] }
 0x628   :  { %v1898_v47 = vadd.f32 %v1896_v43, %v6748_v62  ;;  %v6759_v43 = vld [vmem:[#allocation31_spill] sm:$0xff] }
 0x629   :  { %v1899_v58 = vadd.f32 %v1897_v14, %v6749_v36  ;;  %v6760_v14 = vld [vmem:[#allocation77_spill] sm:$0xff] }
 0x62a   :  { %4642 = vtanh.f32 %v1898_v47  ;;  %v6761_v47 = vld [vmem:[#allocation78_spill] sm:$0xff] }
 0x62b   :  { %4644 = vtanh.f32 %v1899_v58  ;;  %v6762_v58 = vld [vmem:[#allocation33_spill] sm:$0xff] }
 0x634   :  { %v4643_v56 = vpop.eup %4642 }
 0x635   :  { %v4645_v7 = vpop.eup %4644  ;;  %v1904_v49 = vmul.f32 %v4643_v56, %v1902_v46  ;;  %v6753_v56 = vld [vmem:[#allocation74_spill] sm:$0xff]  ;;  %v6765_v46 = vld [vmem:[#allocation80_spill] sm:$0xff] }
 0x636   :  { %v1905_v15 = vmul.f32 %v4645_v7, %v1903_v63  ;;  %v6756_v7 = vld [vmem:[#allocation75_spill] sm:$0xff]  ;;  %v6766_v63 = vld [vmem:[#allocation37_spill] sm:$0xff] }
 0x637   :  { %v5779_v0 = vadd.f32 %v1906_v54, %v1904_v49  ;;  %v6754_v49 = vld [vmem:[#allocation25_spill] sm:$0xff]  ;;  %v6767_v54 = vld [vmem:[#allocation39_spill] sm:$0xff] }
 0x638   :  { %v5781_v44 = vadd.f32 %v1907_v10, %v1905_v15  ;;  %v6750_v15 = vld [vmem:[#allocation21_spill] sm:$0xff] }
 0x639   :  { %v6768_v10 = vld [vmem:[#allocation81_spill] sm:$0xff] }
 0x63a   :  { %1974 = vmatprep.mubr.f32.mxu0 %v5781_v44  ;;  %2045 = vmatprep.mubr.f32.mxu1 %v5781_v44 }
 0x63b   :  { %1975 = vmatmul.mubr.f32.vlgmr.msra.gmra.mrb[26].mxu0 %v5779_v0  ;;  %2046 = vmatmul.mubr.f32.vlgmr.msra.gmra.mrb[16].mxu1 %v5779_v0 }
 0x63c   :  { %4064 = vmatpush1.bf16.msra.mxu0 %v6484_v22  ;;  %2116 = vmatprep.mubr.f32.mxu0 %v5781_v44 }
 0x63d   :  { %4066 = vmatprep.subr.bf16.mxu0 %v6485_v11  ;;  %4128 = vmatpush1.bf16.msra.mxu1 %v4827_v12 }
 0x63e   :  { %4130 = vmatprep.subr.bf16.mxu1 %v4835_v17 }
 0x640   :  { %4068 = vmatpush1.bf16.msra.mxu0 %v6486_v29 }
 0x641   :  { %4070 = vmatprep.subr.bf16.mxu0 %v6487_v6  ;;  %4132 = vmatpush1.bf16.msra.mxu1 %v4841_v20 }
 0x642   :  { %4134 = vmatprep.subr.bf16.mxu1 %v4847_v25 }
 0x644   :  { %4072 = vmatpush1.bf16.msra.mxu0 %v5072_v26 }
 0x645   :  { %4074 = vmatprep.subr.bf16.mxu0 %v5077_v52  ;;  %4136 = vmatpush1.bf16.msra.mxu1 %v4867_v35 }
 0x646   :  { %4138 = vmatprep.subr.bf16.mxu1 %v4879_v39 }
 0x648   :  { %4076 = vmatpush1.bf16.msra.mxu0 %v5084_v1 }
 0x649   :  { %4078 = vmatprep.subr.bf16.mxu0 %v5089_v38  ;;  %4140 = vmatpush1.bf16.msra.mxu1 %v4885_v48 }
 0x64a   :  { %4142 = vmatprep.subr.bf16.mxu1 %v4890_v50 }
 0x64c   :  { %4080 = vmatpush1.bf16.msra.mxu0 %v6488_v28 }
 0x64d   :  { %4082 = vmatprep.subr.bf16.mxu0 %v6489_v13  ;;  %4144 = vmatpush1.bf16.msra.mxu1 %v4896_v55 }
 0x64e   :  { %4146 = vmatprep.subr.bf16.mxu1 %v4900_v59 }
 0x650   :  { %4084 = vmatpush1.bf16.msra.mxu0 %v6490_v61 }
 0x651   :  { %4086 = vmatprep.subr.bf16.mxu0 %v6491_v42  ;;  %4148 = vmatpush1.bf16.msra.mxu1 %v4908_v3 }
 0x652   :  { %4150 = vmatprep.subr.bf16.mxu1 %v4913_v9 }
 0x654   :  { %4088 = vmatpush1.bf16.msra.mxu0 %v6492_v51 }
 0x655   :  { %4090 = vmatprep.subr.bf16.mxu0 %v6493_v2  ;;  %4152 = vmatpush1.bf16.msra.mxu1 %v4923_v19 }
 0x656   :  { %4154 = vmatprep.subr.bf16.mxu1 %v4928_v16 }
 0x658   :  { %4092 = vmatpush1.bf16.msra.mxu0 %v6494_v45 }
 0x659   :  { %4094 = vmatprep.subr.bf16.mxu0 %v6495_v27  ;;  %4156 = vmatpush1.bf16.msra.mxu1 %v4938_v32 }
 0x65a   :  { %4158 = vmatprep.subr.bf16.mxu1 %v4943_v33 }
 0x65c   :  { %4096 = vmatpush1.bf16.msra.mxu0 %v6496_v40 }
 0x65d   :  { %4098 = vmatprep.subr.bf16.mxu0 %v6497_v4  ;;  %4160 = vmatpush1.bf16.msra.mxu1 %v6550_v21 }
 0x65e   :  { %4162 = vmatprep.subr.bf16.mxu1 %v6551_v8 }
 0x660   :  { %4100 = vmatpush1.bf16.msra.mxu0 %v6552_v23 }
 0x661   :  { %4102 = vmatprep.subr.bf16.mxu0 %v6616_v18  ;;  %4164 = vmatpush1.bf16.msra.mxu1 %v6750_v15 }
 0x662   :  { %4166 = vmatprep.subr.bf16.mxu1 %v6751_v5  ;;  %v6810_v5 = vld [vmem:[#allocation85_spill] sm:$0xff] }
 0x664   :  { %4104 = vmatpush1.bf16.msra.mxu0 %v6752_v37 }
 0x665   :  { %4106 = vmatprep.subr.bf16.mxu0 %v6753_v56  ;;  %4168 = vmatpush1.bf16.msra.mxu1 %v6754_v49  ;;  %v6809_v56 = vld [vmem:[#allocation84_spill] sm:$0xff] }
 0x666   :  { %4170 = vmatprep.subr.bf16.mxu1 %v6755_v41 }
 0x668   :  { %4108 = vmatpush1.bf16.msra.mxu0 %v6756_v7 }
 0x669   :  { %4110 = vmatprep.subr.bf16.mxu0 %v6757_v24  ;;  %4172 = vmatpush1.bf16.msra.mxu1 %v6758_v60  ;;  %v6769_v60 = vld [vmem:[#allocation82_spill] sm:$0xff] }
 0x66a   :  { %4174 = vmatprep.subr.bf16.mxu1 %v6759_v43  ;;  %v6770_v43 = vld [vmem:[#allocation41_spill] sm:$0xff] }
 0x66c   :  { %4112 = vmatpush1.bf16.msra.mxu0 %v6760_v14  ;;  %v6771_v14 = vld [vmem:[#allocation43_spill] sm:$0xff] }
 0x66d   :  { %4114 = vmatprep.subr.bf16.mxu0 %v6761_v47  ;;  %4176 = vmatpush1.bf16.msra.mxu1 %v6762_v58  ;;  %v6772_v47 = vld [vmem:[#allocation83_spill] sm:$0xff]  ;;  %v6773_v58 = vld [vmem:[#allocation9_spill] sm:$0xff] }
 0x66e   :  { %4178 = vmatprep.subr.bf16.mxu1 %v6763_v53  ;;  %v6774_v53 = vld [vmem:[#allocation45_spill] sm:$0xff] }
 0x670   :  { %4116 = vmatpush1.bf16.msra.mxu0 %v6764_v57  ;;  %v6775_v57 = vld [vmem:[#allocation47_spill] sm:$0xff] }
 0x671   :  { %4118 = vmatprep.subr.bf16.mxu0 %v6765_v46  ;;  %4180 = vmatpush1.bf16.msra.mxu1 %v6766_v63  ;;  %v6776_v63 = vld [vmem:[#allocation10_spill] sm:$0xff]  ;;  %v6786_v46 = vld [vmem:[#allocation24_spill] sm:$0xff] }
 0x672   :  { %4182 = vmatprep.subr.bf16.mxu1 %v6767_v54  ;;  %v6777_v54 = vld [vmem:[#allocation11_spill] sm:$0xff] }
 0x674   :  { %4120 = vmatpush1.bf16.msra.mxu0 %v6768_v10  ;;  %v6778_v10 = vld [vmem:[#allocation12_spill] sm:$0xff] }
 0x675   :  { %4122 = vmatprep.subr.bf16.mxu0 %v6769_v60  ;;  %4184 = vmatpush1.bf16.msra.mxu1 %v6770_v43  ;;  %v6779_v60 = vld [vmem:[#allocation13_spill] sm:$0xff]  ;;  %v6780_v43 = vld [vmem:[#allocation14_spill] sm:$0xff] }
 0x676   :  { %4186 = vmatprep.subr.bf16.mxu1 %v6771_v14  ;;  %v6781_v14 = vld [vmem:[#allocation15_spill] sm:$0xff] }
 0x678   :  { %4124 = vmatpush1.bf16.msra.mxu0 %v6772_v47  ;;  %v6782_v47 = vld [vmem:[#allocation16_spill] sm:$0xff] }
 0x679   :  { %4190 = vmatprep.subr.bf16.mxu0 %v6773_v58  ;;  %4188 = vmatpush1.bf16.msra.mxu1 %v6774_v53  ;;  %v6783_v58 = vld [vmem:[#allocation18_spill] sm:$0xff]  ;;  %v6784_v53 = vld [vmem:[#allocation20_spill] sm:$0xff] }
 0x67a   :  { %4254 = vmatprep.subr.bf16.mxu1 %v6775_v57  ;;  %v6785_v57 = vld [vmem:[#allocation22_spill] sm:$0xff] }
 0x67b   :  { %2117 = vmatmul.mubr.f32.vlgmr.msra.gmra.mrb[28].mxu0 %v5779_v0 }
 0x67c   :  { %4192 = vmatpush1.bf16.msra.mxu0 %v6776_v63  ;;  %v6787_v63 = vld [vmem:[#allocation26_spill] sm:$0xff] }
 0x67d   :  { %4194 = vmatprep.subr.bf16.mxu0 %v6777_v54  ;;  %v6788_v54 = vld [vmem:[#allocation28_spill] sm:$0xff] }
 0x680   :  { %4196 = vmatpush1.bf16.msra.mxu0 %v6778_v10  ;;  %v6789_v10 = vld [vmem:[#allocation30_spill] sm:$0xff] }
 0x681   :  { %4198 = vmatprep.subr.bf16.mxu0 %v6779_v60  ;;  %v6790_v60 = vld [vmem:[#allocation32_spill] sm:$0xff] }
 0x684   :  { %4200 = vmatpush1.bf16.msra.mxu0 %v6780_v43  ;;  %v6791_v43 = vld [vmem:[#allocation34_spill] sm:$0xff] }
 0x685   :  { %4202 = vmatprep.subr.bf16.mxu0 %v6781_v14  ;;  %v6792_v14 = vld [vmem:[#allocation36_spill] sm:$0xff] }
 0x688   :  { %4204 = vmatpush1.bf16.msra.mxu0 %v6782_v47  ;;  %v6793_v47 = vld [vmem:[#allocation38_spill] sm:$0xff] }
 0x689   :  { %4206 = vmatprep.subr.bf16.mxu0 %v6783_v58  ;;  %v6794_v58 = vld [vmem:[#allocation40_spill] sm:$0xff] }
 0x68c   :  { %4208 = vmatpush1.bf16.msra.mxu0 %v6784_v53  ;;  %v6795_v53 = vld [vmem:[#allocation42_spill] sm:$0xff] }
 0x68d   :  { %4210 = vmatprep.subr.bf16.mxu0 %v6785_v57  ;;  %v6796_v57 = vld [vmem:[#allocation44_spill] sm:$0xff] }
 0x690   :  { %4212 = vmatpush1.bf16.msra.mxu0 %v6786_v46  ;;  %v6797_v46 = vld [vmem:[#allocation46_spill] sm:$0xff] }
 0x691   :  { %4214 = vmatprep.subr.bf16.mxu0 %v6787_v63  ;;  %v6798_v63 = vld [vmem:[#allocation48_spill] sm:$0xff] }
 0x694   :  { %4216 = vmatpush1.bf16.msra.mxu0 %v6788_v54  ;;  %v6799_v54 = vld [vmem:[#allocation50_spill] sm:$0xff] }
 0x695   :  { %4218 = vmatprep.subr.bf16.mxu0 %v6789_v10  ;;  %v6800_v10 = vld [vmem:[#allocation52_spill] sm:$0xff] }
 0x698   :  { %4220 = vmatpush1.bf16.msra.mxu0 %v6790_v60  ;;  %v6801_v60 = vld [vmem:[#allocation54_spill] sm:$0xff] }
 0x699   :  { %4222 = vmatprep.subr.bf16.mxu0 %v6791_v43  ;;  %v6802_v43 = vld [vmem:[#allocation56_spill] sm:$0xff] }
 0x69c   :  { %4224 = vmatpush1.bf16.msra.mxu0 %v6792_v14  ;;  %v6803_v14 = vld [vmem:[#allocation57_spill] sm:$0xff] }
 0x69d   :  { %4226 = vmatprep.subr.bf16.mxu0 %v6793_v47  ;;  %v6804_v47 = vld [vmem:[#allocation58_spill] sm:$0xff] }
 0x6a0   :  { %4228 = vmatpush1.bf16.msra.mxu0 %v6794_v58  ;;  %v6805_v58 = vld [vmem:[#allocation59_spill] sm:$0xff] }
 0x6a1   :  { %4230 = vmatprep.subr.bf16.mxu0 %v6795_v53  ;;  %v6806_v53 = vld [vmem:[#allocation60_spill] sm:$0xff] }
 0x6a4   :  { %4232 = vmatpush1.bf16.msra.mxu0 %v6796_v57  ;;  %v6807_v57 = vld [vmem:[#allocation8_spill] sm:$0xff] }
 0x6a5   :  { %4234 = vmatprep.subr.bf16.mxu0 %v6797_v46 }
 0x6a8   :  { %4236 = vmatpush1.bf16.msra.mxu0 %v6798_v63 }
 0x6a9   :  { %4238 = vmatprep.subr.bf16.mxu0 %v6799_v54 }
 0x6ac   :  { %4240 = vmatpush1.bf16.msra.mxu0 %v6800_v10 }
 0x6ad   :  { %4242 = vmatprep.subr.bf16.mxu0 %v6801_v60 }
 0x6b0   :  { %4244 = vmatpush1.bf16.msra.mxu0 %v6802_v43 }
 0x6b1   :  { %4246 = vmatprep.subr.bf16.mxu0 %v6803_v14 }
 0x6b4   :  { %4248 = vmatpush1.bf16.msra.mxu0 %v6804_v47  ;;  %v6808_v47 = vld [vmem:[#allocation90_spill] sm:$0xff] }
 0x6b5   :  { %4250 = vmatprep.subr.bf16.mxu0 %v6805_v58 }
 0x6b8   :  { %4252 = vmatpush1.bf16.msra.mxu0 %v6806_v53 }
 0x6b9   :  { %4318 = vmatprep.subr.bf16.mxu0 %v6807_v57 }
 0x70e   :  { %v1976_v46 = vpop.f32.mrb[26].mxu0  ;;  %v2047_v63 = vpop.f32.mrb[16].mxu1 }
 0x70f   :  { %v1978_v24 = vpop.f32.mrb[27].mxu0  ;;  %v2049_v54 = vpop.f32.mrb[17].mxu1  ;;  %v1977_v49 = vadd.f32 %v1976_v46, %v6808_v47 }
 0x710   :  { %v2050_v10 = vadd.f32 %v2049_v54, %v6744_v31  ;;  %v1979_v53 = vadd.f32 %v1978_v24, %v6740_v34  ;;  %v2182_v54 = vrot.slane %v5781_v44, 6  ;;  %v6811_v31 = vld [vmem:[#allocation94_spill] sm:$0xff] }
 0x711   :  { %v2125_v58 = vrot.slane %v1977_v49, 6 }
 0x712   :  { %v2146_v7 = vrot.slane %v2050_v10, 6  ;;  %v2126_v57 = vrot.slane %v1979_v53, 6 }
 0x713   :  { %v2129_v37 = vadd.f32 %v2125_v58, %v6809_v56 }
 0x714   :  { %v2150_v60 = vadd.f32 %v2146_v7, %v6746_v30  ;;  %v2130_v15 = vadd.f32 %v2126_v57, %v6810_v5  ;;  %v2048_v7 = vadd.f32 %v2047_v63, %v6811_v31  ;;  %v6813_v63 = vld [vmem:[#allocation98_spill] sm:$0xff] }
 0x716   :  { %v2916_v43 = vmul.f32 -1.442695, %v2150_v60  ;;  %v2914_v30 = vmul.f32 -1.442695, %v2130_v15  ;;  %v6814_v15 = vld [vmem:[#allocation99_spill] sm:$0xff] }
 0x718   :  { %4646 = vpow2.f32 %v2916_v43  ;;  %v2913_v43 = vmul.f32 -1.442695, %v2129_v37 }
 0x722   :  { %v4647_v14 = vpop.eup %4646 }
 0x723   :  { %v2158_v41 = vadd.f32 1.0, %v4647_v14  ;;  %v2145_v14 = vrot.slane %v2048_v7, 6 }
 0x725   :  { %4648 = vrcp.f32 %v2158_v41  ;;  %v6812_v41 = vld [vmem:[#allocation86_spill] sm:$0xff] }
 0x726   :  { %4650 = vpow2.f32 %v2913_v43  ;;  %v2149_v46 = vadd.f32 %v2145_v14, %v6812_v41 }
 0x727   :  { %4652 = vpow2.f32 %v2914_v30 }
 0x728   :  { %v2915_v24 = vmul.f32 -1.442695, %v2149_v46 }
 0x72a   :  { %4654 = vpow2.f32 %v2915_v24 }
 0x72f   :  { %v4649_v10 = vpop.eup %4648 }
 0x730   :  { %v2186_v60 = vmul.f32 %v4649_v10, %v2182_v54  ;;  %v4651_v49 = vpop.eup %4650 }
 0x731   :  { %v4653_v53 = vpop.eup %4652  ;;  %v2137_v58 = vadd.f32 1.0, %v4651_v49 }
 0x732   :  { %v2138_v56 = vadd.f32 1.0, %v4653_v53 }
 0x733   :  { %4656 = vrcp.f32 %v2137_v58  ;;  %v2181_v58 = vrot.slane %v5779_v0, 6  ;;  %v6833_v0 = vld [vmem:[#allocation81_spill] sm:$0xff] }
 0x734   :  { %4658 = vrcp.f32 %v2138_v56  ;;  %v4655_v44 = vpop.eup %4654 }
 0x735   :  { %v2157_v5 = vadd.f32 1.0, %v4655_v44 }
 0x737   :  { %4660 = vrcp.f32 %v2157_v5 }
 0x73d   :  { %v4657_v30 = vpop.eup %4656 }
 0x73e   :  { %v4659_v14 = vpop.eup %4658 }
 0x741   :  { %v4661_v56 = vpop.eup %4660 }
 0x742   :  { %v2175_v53 = vsub.f32 1.0, %v4661_v56 }
 0x74e   :  { %v2118_v57 = vpop.f32.mrb[28].mxu0 }
 0x74f   :  { %v2119_v54 = vadd.f32 %v2118_v57, %v6813_v63  ;;  %v2120_v37 = vpop.f32.mrb[29].mxu0  ;;  %v2176_v57 = vsub.f32 1.0, %v4649_v10  ;;  %v6834_v10 = vld [vmem:[#allocation82_spill] sm:$0xff] }
 0x750   :  { %v2121_v7 = vadd.f32 %v2120_v37, %v6814_v15  ;;  %v2185_v15 = vmul.f32 %v4661_v56, %v2181_v58  ;;  %v6843_v56 = vld [vmem:[#allocation12_spill] sm:$0xff]  ;;  %v6845_v58 = vld [vmem:[#allocation14_spill] sm:$0xff] }
 0x751   :  { %v2165_v43 = vrot.slane %v2119_v54, 6 }
 0x752   :  { %v2166_v34 = vrot.slane %v2121_v7, 6 }
 0x753   :  { %v2169_v46 = vmul.f32 %v4657_v30, %v2165_v43  ;;  %v6837_v43 = vld [vmem:[#allocation83_spill] sm:$0xff]  ;;  %v6838_v30 = vld [vmem:[#allocation9_spill] sm:$0xff] }
 0x754   :  { %v2170_v47 = vmul.f32 %v4659_v14, %v2166_v34  ;;  %v6839_v14 = vld [vmem:[#allocation45_spill] sm:$0xff] }
 0x755   :  { %v2171_v24 = vadd.f32 %v2169_v46, %v6748_v62  ;;  %v6840_v46 = vld [vmem:[#allocation47_spill] sm:$0xff] }
 0x756   :  { %v2172_v49 = vadd.f32 %v2170_v47, %v6749_v36 }
 0x757   :  { %4662 = vtanh.f32 %v2171_v24  ;;  %v6841_v24 = vld [vmem:[#allocation10_spill] sm:$0xff] }
 0x758   :  { %4664 = vtanh.f32 %v2172_v49  ;;  %v6842_v49 = vld [vmem:[#allocation11_spill] sm:$0xff] }
 0x761   :  { %v4663_v44 = vpop.eup %4662 }
 0x762   :  { %v4665_v37 = vpop.eup %4664  ;;  %v2177_v54 = vmul.f32 %v4663_v44, %v2175_v53  ;;  %v6844_v53 = vld [vmem:[#allocation13_spill] sm:$0xff]  ;;  %v6846_v44 = vld [vmem:[#allocation15_spill] sm:$0xff] }
 0x763   :  { %v2178_v7 = vmul.f32 %v4665_v37, %v2176_v57  ;;  %v6847_v57 = vld [vmem:[#allocation16_spill] sm:$0xff]  ;;  %v6848_v37 = vld [vmem:[#allocation18_spill] sm:$0xff] }
 0x764   :  { %v5899_v63 = vadd.f32 %v2185_v15, %v2177_v54  ;;  %v6836_v15 = vld [vmem:[#allocation43_spill] sm:$0xff]  ;;  %v6849_v54 = vld [vmem:[#allocation20_spill] sm:$0xff] }
 0x765   :  { %v5901_v5 = vadd.f32 %v2186_v60, %v2178_v7  ;;  %v6835_v60 = vld [vmem:[#allocation41_spill] sm:$0xff]  ;;  %v6850_v7 = vld [vmem:[#allocation22_spill] sm:$0xff] }
 0x766   :  { %v5905_v47 = vrot.slane %v5899_v63, 2 }
 0x767   :  { %v2192_v34 = vrot.slane %v5901_v5, 2 }
 0x769   :  { %2259 = vmatprep.mubr.f32.mxu1 %v2192_v34  ;;  %2330 = vmatprep.mubr.f32.mxu0 %v2192_v34 }
 0x76a   :  { %2260 = vmatmul.mubr.f32.vlgmr.msra.gmra.mrb[18].mxu1 %v5905_v47  ;;  %2331 = vmatmul.mubr.f32.vlgmr.msra.gmra.mrb[30].mxu0 %v5905_v47 }
 0x76b   :  { %4256 = vmatpush1.bf16.msra.mxu1 %v6484_v22  ;;  %2401 = vmatprep.mubr.f32.mxu1 %v2192_v34  ;;  %v6851_v34 = vld [vmem:[#allocation24_spill] sm:$0xff] }
 0x76c   :  { %4258 = vmatprep.subr.bf16.mxu1 %v6485_v11  ;;  %4320 = vmatpush1.bf16.msra.mxu0 %v4827_v12  ;;  %v6815_v12 = vld [vmem:[#allocation21_spill] sm:$0xff] }
 0x76d   :  { %4322 = vmatprep.subr.bf16.mxu0 %v4835_v17  ;;  %v6816_v17 = vld [vmem:[#allocation23_spill] sm:$0xff] }
 0x76f   :  { %4260 = vmatpush1.bf16.msra.mxu1 %v6486_v29 }
 0x770   :  { %4262 = vmatprep.subr.bf16.mxu1 %v6487_v6  ;;  %4324 = vmatpush1.bf16.msra.mxu0 %v4841_v20  ;;  %v6817_v20 = vld [vmem:[#allocation73_spill] sm:$0xff] }
 0x771   :  { %4326 = vmatprep.subr.bf16.mxu0 %v4847_v25  ;;  %v6818_v25 = vld [vmem:[#allocation74_spill] sm:$0xff] }
 0x773   :  { %4264 = vmatpush1.bf16.msra.mxu1 %v5072_v26 }
 0x774   :  { %4266 = vmatprep.subr.bf16.mxu1 %v5077_v52  ;;  %4328 = vmatpush1.bf16.msra.mxu0 %v4867_v35  ;;  %v6819_v35 = vld [vmem:[#allocation25_spill] sm:$0xff] }
 0x775   :  { %4330 = vmatprep.subr.bf16.mxu0 %v4879_v39  ;;  %v6820_v39 = vld [vmem:[#allocation27_spill] sm:$0xff] }
 0x777   :  { %4268 = vmatpush1.bf16.msra.mxu1 %v5084_v1 }
 0x778   :  { %4270 = vmatprep.subr.bf16.mxu1 %v5089_v38  ;;  %4332 = vmatpush1.bf16.msra.mxu0 %v4885_v48  ;;  %v6821_v48 = vld [vmem:[#allocation75_spill] sm:$0xff] }
 0x779   :  { %4334 = vmatprep.subr.bf16.mxu0 %v4890_v50  ;;  %v6822_v50 = vld [vmem:[#allocation76_spill] sm:$0xff] }
 0x77b   :  { %4272 = vmatpush1.bf16.msra.mxu1 %v6488_v28 }
 0x77c   :  { %4274 = vmatprep.subr.bf16.mxu1 %v6489_v13  ;;  %4336 = vmatpush1.bf16.msra.mxu0 %v4896_v55  ;;  %v6823_v55 = vld [vmem:[#allocation29_spill] sm:$0xff] }
 0x77d   :  { %4338 = vmatprep.subr.bf16.mxu0 %v4900_v59  ;;  %v6824_v59 = vld [vmem:[#allocation31_spill] sm:$0xff] }
 0x77f   :  { %4276 = vmatpush1.bf16.msra.mxu1 %v6490_v61 }
 0x780   :  { %4278 = vmatprep.subr.bf16.mxu1 %v6491_v42  ;;  %4340 = vmatpush1.bf16.msra.mxu0 %v4908_v3  ;;  %v6825_v3 = vld [vmem:[#allocation77_spill] sm:$0xff] }
 0x781   :  { %4342 = vmatprep.subr.bf16.mxu0 %v4913_v9  ;;  %v6826_v9 = vld [vmem:[#allocation78_spill] sm:$0xff] }
 0x783   :  { %4280 = vmatpush1.bf16.msra.mxu1 %v6492_v51 }
 0x784   :  { %4282 = vmatprep.subr.bf16.mxu1 %v6493_v2  ;;  %4344 = vmatpush1.bf16.msra.mxu0 %v4923_v19  ;;  %v6827_v19 = vld [vmem:[#allocation33_spill] sm:$0xff] }
 0x785   :  { %4346 = vmatprep.subr.bf16.mxu0 %v4928_v16  ;;  %v6828_v16 = vld [vmem:[#allocation35_spill] sm:$0xff] }
 0x787   :  { %4284 = vmatpush1.bf16.msra.mxu1 %v6494_v45 }
 0x788   :  { %4286 = vmatprep.subr.bf16.mxu1 %v6495_v27  ;;  %4348 = vmatpush1.bf16.msra.mxu0 %v4938_v32  ;;  %v6829_v32 = vld [vmem:[#allocation79_spill] sm:$0xff] }
 0x789   :  { %4350 = vmatprep.subr.bf16.mxu0 %v4943_v33  ;;  %v6830_v33 = vld [vmem:[#allocation80_spill] sm:$0xff] }
 0x78b   :  { %4288 = vmatpush1.bf16.msra.mxu1 %v6496_v40 }
 0x78c   :  { %4290 = vmatprep.subr.bf16.mxu1 %v6497_v4  ;;  %4352 = vmatpush1.bf16.msra.mxu0 %v6550_v21  ;;  %v6831_v21 = vld [vmem:[#allocation37_spill] sm:$0xff] }
 0x78d   :  { %4354 = vmatprep.subr.bf16.mxu0 %v6551_v8  ;;  %v6832_v8 = vld [vmem:[#allocation39_spill] sm:$0xff] }
 0x78f   :  { %4292 = vmatpush1.bf16.msra.mxu1 %v6552_v23 }
 0x790   :  { %4294 = vmatprep.subr.bf16.mxu1 %v6616_v18  ;;  %4356 = vmatpush1.bf16.msra.mxu0 %v6815_v12  ;;  %v6853_v12 = vld [vmem:[#allocation28_spill] sm:$0xff] }
 0x791   :  { %4358 = vmatprep.subr.bf16.mxu0 %v6816_v17  ;;  %v6854_v17 = vld [vmem:[#allocation30_spill] sm:$0xff] }
 0x793   :  { %4296 = vmatpush1.bf16.msra.mxu1 %v6817_v20 }
 0x794   :  { %4298 = vmatprep.subr.bf16.mxu1 %v6818_v25  ;;  %4360 = vmatpush1.bf16.msra.mxu0 %v6819_v35  ;;  %v6855_v35 = vld [vmem:[#allocation32_spill] sm:$0xff] }
 0x795   :  { %4362 = vmatprep.subr.bf16.mxu0 %v6820_v39  ;;  %v6856_v39 = vld [vmem:[#allocation34_spill] sm:$0xff] }
 0x797   :  { %4300 = vmatpush1.bf16.msra.mxu1 %v6821_v48 }
 0x798   :  { %4302 = vmatprep.subr.bf16.mxu1 %v6822_v50  ;;  %4364 = vmatpush1.bf16.msra.mxu0 %v6823_v55  ;;  %v6857_v55 = vld [vmem:[#allocation36_spill] sm:$0xff] }
 0x799   :  { %4366 = vmatprep.subr.bf16.mxu0 %v6824_v59  ;;  %v6858_v59 = vld [vmem:[#allocation38_spill] sm:$0xff] }
 0x79b   :  { %4304 = vmatpush1.bf16.msra.mxu1 %v6825_v3 }
 0x79c   :  { %4306 = vmatprep.subr.bf16.mxu1 %v6826_v9  ;;  %4368 = vmatpush1.bf16.msra.mxu0 %v6827_v19  ;;  %v6859_v19 = vld [vmem:[#allocation40_spill] sm:$0xff] }
 0x79d   :  { %4370 = vmatprep.subr.bf16.mxu0 %v6828_v16  ;;  %v6860_v16 = vld [vmem:[#allocation42_spill] sm:$0xff] }
 0x79f   :  { %4308 = vmatpush1.bf16.msra.mxu1 %v6829_v32 }
 0x7a0   :  { %4310 = vmatprep.subr.bf16.mxu1 %v6830_v33  ;;  %4372 = vmatpush1.bf16.msra.mxu0 %v6831_v21  ;;  %v6861_v21 = vld [vmem:[#allocation44_spill] sm:$0xff] }
 0x7a1   :  { %4374 = vmatprep.subr.bf16.mxu0 %v6832_v8  ;;  %v6862_v8 = vld [vmem:[#allocation46_spill] sm:$0xff] }
 0x7a3   :  { %4312 = vmatpush1.bf16.msra.mxu1 %v6833_v0 }
 0x7a4   :  { %4314 = vmatprep.subr.bf16.mxu1 %v6834_v10  ;;  %4376 = vmatpush1.bf16.msra.mxu0 %v6835_v60  ;;  %v6863_v60 = vld [vmem:[#allocation48_spill] sm:$0xff] }
 0x7a5   :  { %4378 = vmatprep.subr.bf16.mxu0 %v6836_v15  ;;  %v6864_v15 = vld [vmem:[#allocation50_spill] sm:$0xff] }
 0x7a7   :  { %4316 = vmatpush1.bf16.msra.mxu1 %v6837_v43 }
 0x7a8   :  { %4382 = vmatprep.subr.bf16.mxu1 %v6838_v30  ;;  %4380 = vmatpush1.bf16.msra.mxu0 %v6839_v14  ;;  %v6865_v30 = vld [vmem:[#allocation52_spill] sm:$0xff]  ;;  %v6866_v14 = vld [vmem:[#allocation54_spill] sm:$0xff] }
 0x7a9   :  { %4446 = vmatprep.subr.bf16.mxu0 %v6840_v46  ;;  %v6867_v46 = vld [vmem:[#allocation56_spill] sm:$0xff] }
 0x7aa   :  { %2402 = vmatmul.mubr.f32.vlgmr.msra.gmra.mrb[20].mxu1 %v5905_v47  ;;  %v6852_v47 = vld [vmem:[#allocation26_spill] sm:$0xff] }
 0x7ab   :  { %4384 = vmatpush1.bf16.msra.mxu1 %v6841_v24  ;;  %v6868_v24 = vld [vmem:[#allocation57_spill] sm:$0xff] }
 0x7ac   :  { %4386 = vmatprep.subr.bf16.mxu1 %v6842_v49  ;;  %v6869_v49 = vld [vmem:[#allocation58_spill] sm:$0xff] }
 0x7af   :  { %4388 = vmatpush1.bf16.msra.mxu1 %v6843_v56  ;;  %v6870_v56 = vld [vmem:[#allocation59_spill] sm:$0xff] }
 0x7b0   :  { %4390 = vmatprep.subr.bf16.mxu1 %v6844_v53  ;;  %v6871_v53 = vld [vmem:[#allocation60_spill] sm:$0xff] }
 0x7b3   :  { %4392 = vmatpush1.bf16.msra.mxu1 %v6845_v58 }
 0x7b4   :  { %4394 = vmatprep.subr.bf16.mxu1 %v6846_v44 }
 0x7b7   :  { %4396 = vmatpush1.bf16.msra.mxu1 %v6847_v57 }
 0x7b8   :  { %4398 = vmatprep.subr.bf16.mxu1 %v6848_v37 }
 0x7bb   :  { %4400 = vmatpush1.bf16.msra.mxu1 %v6849_v54 }
 0x7bc   :  { %4402 = vmatprep.subr.bf16.mxu1 %v6850_v7  ;;  %v6872_v7 = vld [vmem:[#allocation95_spill] sm:$0xff] }
 0x7bf   :  { %4404 = vmatpush1.bf16.msra.mxu1 %v6851_v34 }
 0x7c0   :  { %4406 = vmatprep.subr.bf16.mxu1 %v6852_v47 }
 0x7c3   :  { %4408 = vmatpush1.bf16.msra.mxu1 %v6853_v12 }
 0x7c4   :  { %4410 = vmatprep.subr.bf16.mxu1 %v6854_v17 }
 0x7c7   :  { %4412 = vmatpush1.bf16.msra.mxu1 %v6855_v35  ;;  %v6873_v35 = vld [vmem:[#allocation87_spill] sm:$0xff] }
 0x7c8   :  { %4414 = vmatprep.subr.bf16.mxu1 %v6856_v39 }
 0x7cb   :  { %4416 = vmatpush1.bf16.msra.mxu1 %v6857_v55 }
 0x7cc   :  { %4418 = vmatprep.subr.bf16.mxu1 %v6858_v59 }
 0x7cf   :  { %4420 = vmatpush1.bf16.msra.mxu1 %v6859_v19 }
 0x7d0   :  { %4422 = vmatprep.subr.bf16.mxu1 %v6860_v16 }
 0x7d3   :  { %4424 = vmatpush1.bf16.msra.mxu1 %v6861_v21 }
 0x7d4   :  { %4426 = vmatprep.subr.bf16.mxu1 %v6862_v8 }
 0x7d7   :  { %4428 = vmatpush1.bf16.msra.mxu1 %v6863_v60  ;;  %v6874_v60 = vld [vmem:[#allocation90_spill] sm:$0xff] }
 0x7d8   :  { %4430 = vmatprep.subr.bf16.mxu1 %v6864_v15 }
 0x7db   :  { %4432 = vmatpush1.bf16.msra.mxu1 %v6865_v30  ;;  %v6875_v30 = vld [vmem:[#allocation91_spill] sm:$0xff] }
 0x7dc   :  { %4434 = vmatprep.subr.bf16.mxu1 %v6866_v14 }
 0x7df   :  { %4436 = vmatpush1.bf16.msra.mxu1 %v6867_v46 }
 0x7e0   :  { %4438 = vmatprep.subr.bf16.mxu1 %v6868_v24 }
 0x7e3   :  { %4440 = vmatpush1.bf16.msra.mxu1 %v6869_v49  ;;  %v2464_v49 = vrot.slane %v5899_v63, 6 }
 0x7e4   :  { %4442 = vmatprep.subr.bf16.mxu1 %v6870_v56 }
 0x7e7   :  { %4444 = vmatpush1.bf16.msra.mxu1 %v6871_v53  ;;  %v6876_v53 = vld [vmem:[#allocation84_spill] sm:$0xff] }
 0x83d   :  { %v2261_v58 = vpop.f32.mrb[18].mxu1  ;;  %v2332_v44 = vpop.f32.mrb[30].mxu0 }
 0x83e   :  { %v2333_v57 = vadd.f32 %v2332_v44, %v6811_v31  ;;  %v2263_v37 = vpop.f32.mrb[19].mxu1  ;;  %v2334_v54 = vpop.f32.mrb[31].mxu0  ;;  %v2262_v15 = vadd.f32 %v2261_v58, %v6874_v60 }
 0x83f   :  { %v2335_v34 = vadd.f32 %v2334_v54, %v6872_v7  ;;  %v2264_v14 = vadd.f32 %v2263_v37, %v6875_v30  ;;  %v6877_v54 = vld [vmem:[#allocation85_spill] sm:$0xff] }
 0x840   :  { %v2430_v47 = vrot.slane %v2333_v57, 4  ;;  %v2410_v46 = vrot.slane %v2262_v15, 4  ;;  %v2465_v57 = vrot.slane %v5901_v5, 6  ;;  %v6879_v5 = vld [vmem:[#allocation99_spill] sm:$0xff] }
 0x841   :  { %v2431_v12 = vrot.slane %v2335_v34, 4  ;;  %v2411_v24 = vrot.slane %v2264_v14, 4 }
 0x842   :  { %v2434_v17 = vadd.f32 %v2430_v47, %v6812_v41  ;;  %v2414_v44 = vadd.f32 %v2410_v46, %v6876_v53 }
 0x843   :  { %v2435_v39 = vadd.f32 %v2431_v12, %v6873_v35  ;;  %v2415_v34 = vadd.f32 %v2411_v24, %v6877_v54 }
 0x844   :  { %v2919_v55 = vmul.f32 -1.442695, %v2434_v17 }
 0x845   :  { %v2920_v59 = vmul.f32 -1.442695, %v2435_v39  ;;  %v2917_v39 = vmul.f32 -1.442695, %v2414_v44 }
 0x846   :  { %4666 = vpow2.f32 %v2919_v55  ;;  %v2918_v55 = vmul.f32 -1.442695, %v2415_v34 }
 0x847   :  { %4668 = vpow2.f32 %v2920_v59 }
 0x850   :  { %v4667_v19 = vpop.eup %4666 }
 0x851   :  { %v2442_v16 = vadd.f32 1.0, %v4667_v19  ;;  %v4669_v21 = vpop.eup %4668 }
 0x852   :  { %v2443_v8 = vadd.f32 1.0, %v4669_v21 }
 0x853   :  { %4670 = vrcp.f32 %v2442_v16  ;;  %v6878_v16 = vld [vmem:[#allocation98_spill] sm:$0xff] }
 0x854   :  { %4672 = vrcp.f32 %v2443_v8 }
 0x855   :  { %4674 = vpow2.f32 %v2917_v39 }
 0x856   :  { %4676 = vpow2.f32 %v2918_v55 }
 0x85d   :  { %v4671_v56 = vpop.eup %4670 }
 0x85e   :  { %v2468_v47 = vmul.f32 %v4671_v56, %v2464_v49  ;;  %v4673_v12 = vpop.eup %4672  ;;  %v2460_v55 = vsub.f32 1.0, %v4671_v56 }
 0x85f   :  { %v2469_v17 = vmul.f32 %v4673_v12, %v2465_v57  ;;  %v4675_v58 = vpop.eup %4674 }
 0x860   :  { %v4677_v37 = vpop.eup %4676  ;;  %v2422_v59 = vadd.f32 1.0, %v4675_v58 }
 0x861   :  { %v2423_v19 = vadd.f32 1.0, %v4677_v37  ;;  %v2461_v37 = vsub.f32 1.0, %v4673_v12  ;;  %v2765_v12 = vld [vmem:[%s6186_s5 + $0x50] sm:$0xff] }
 0x862   :  { %4678 = vrcp.f32 %v2422_v59 }
 0x863   :  { %4680 = vrcp.f32 %v2423_v19 }
 0x86c   :  { %v4679_v46 = vpop.eup %4678 }
 0x86d   :  { %v4681_v49 = vpop.eup %4680 }
 0x87d   :  { %v2403_v63 = vpop.f32.mrb[20].mxu1 }
 0x87e   :  { %v2404_v21 = vadd.f32 %v2403_v63, %v6878_v16  ;;  %v2405_v8 = vpop.f32.mrb[21].mxu1 }
 0x87f   :  { %v2406_v15 = vadd.f32 %v2405_v8, %v6879_v5 }
 0x880   :  { %v2450_v14 = vrot.slane %v2404_v21, 4 }
 0x881   :  { %v2451_v24 = vrot.slane %v2406_v15, 4 }
 0x882   :  { %v2454_v44 = vmul.f32 %v4679_v46, %v2450_v14  ;;  %v2783_v14 = vld [vmem:[%s6186_s5 + $0xe0] sm:$0xff]  ;;  %v2784_v46 = vld [vmem:[%s6186_s5 + $0xe8] sm:$0xff] }
 0x883   :  { %v2455_v57 = vmul.f32 %v4681_v49, %v2451_v24  ;;  %v4533_v49 = vpack.c.bf16 %v2784_v46, %v2783_v14 }
 0x884   :  { %v2456_v34 = vadd.f32 %v2454_v44, %v6748_v62  ;;  %v2767_v44 = vld [vmem:[%s6186_s5 + $0x60] sm:$0xff] }
 0x885   :  { %v2457_v39 = vadd.f32 %v2455_v57, %v6749_v36  ;;  %v2768_v57 = vld [vmem:[%s6186_s5 + $0x68] sm:$0xff] }
 0x886   :  { %4682 = vtanh.f32 %v2456_v34  ;;  %v2785_v34 = vld [vmem:[%s6186_s5 + $0xf0] sm:$0xff] }
 0x887   :  { %4684 = vtanh.f32 %v2457_v39  ;;  %v2786_v39 = vld [vmem:[%s6186_s5 + $0xf8] sm:$0xff] }
 0x890   :  { %v4683_v58 = vpop.eup %4682 }
 0x891   :  { %v4685_v59 = vpop.eup %4684  ;;  %v2462_v19 = vmul.f32 %v4683_v58, %v2460_v55  ;;  %v4535_v55 = vpack.c.bf16 %v2768_v57, %v2767_v44  ;;  %v4537_v58 = vpack.c.bf16 %v2786_v39, %v2785_v34 }
 0x892   :  { %v2463_v63 = vmul.f32 %v4685_v59, %v2461_v37  ;;  %v2769_v37 = vld [vmem:[%s6186_s5 + $0x70] sm:$0xff]  ;;  %v2770_v59 = vld [vmem:[%s6186_s5 + $0x78] sm:$0xff] }
 0x893   :  { %v6019_v16 = vadd.f32 %v2468_v47, %v2462_v19  ;;  %v4539_v19 = vpack.c.bf16 %v2770_v59, %v2769_v37 }
 0x894   :  { %v6021_v21 = vadd.f32 %v2469_v17, %v2463_v63  ;;  %v2766_v17 = vld [vmem:[%s6186_s5 + $0x58] sm:$0xff] }
 0x895   :  { %v2474_v15 = vrot.slane %v6019_v16, 4  ;;  %v4531_v24 = vpack.c.bf16 %v2766_v17, %v2765_v12 }
 0x896   :  { %v2475_v8 = vrot.slane %v6021_v21, 4 }
 0x898   :  { %2542 = vmatprep.mubr.f32.mxu0 %v2475_v8  ;;  %2613 = vmatprep.mubr.f32.mxu1 %v2475_v8 }
 0x899   :  { %2543 = vmatmul.mubr.f32.vlgmr.msra.gmra.mrb[32].mxu0 %v2474_v15  ;;  %2614 = vmatmul.mubr.f32.vlgmr.msra.gmra.mrb[22].mxu1 %v2474_v15 }
 0x89a   :  { %4448 = vmatpush1.bf16.msra.mxu0 %v6484_v22  ;;  %2684 = vmatprep.mubr.f32.mxu0 %v2475_v8  ;;  %v2756_v22 = vld [vmem:[%s6186_s5 + $0x8] sm:$0xff] }
 0x89b   :  { %4450 = vmatprep.subr.bf16.mxu0 %v6485_v11 }
 0x89e   :  { %4452 = vmatpush1.bf16.msra.mxu0 %v6486_v29  ;;  %v2773_v29 = vld [vmem:[%s6186_s5 + $0x90] sm:$0xff] }
 0x89f   :  { %4454 = vmatprep.subr.bf16.mxu0 %v6487_v6  ;;  %v2774_v6 = vld [vmem:[%s6186_s5 + $0x98] sm:$0xff] }
 0x8a2   :  { %4456 = vmatpush1.bf16.msra.mxu0 %v5072_v26  ;;  %v2772_v26 = vld [vmem:[%s6186_s5 + $0x88] sm:$0xff] }
 0x8a3   :  { %4458 = vmatprep.subr.bf16.mxu0 %v5077_v52  ;;  %v2771_v52 = vld [vmem:[%s6186_s5 + $0x80] sm:$0xff] }
 0x8a6   :  { %4460 = vmatpush1.bf16.msra.mxu0 %v5084_v1  ;;  %v2755_v1 = vld [vmem:[%s6186_s5] sm:$0xff] }
 0x8a7   :  { %4462 = vmatprep.subr.bf16.mxu0 %v5089_v38  ;;  %v4509_v38 = vpack.c.bf16 %v2772_v26, %v2771_v52  ;;  %v4511_v11 = vpack.c.bf16 %v2756_v22, %v2755_v1 }
 0x8a9   :  { %4510 = vmatprep.subr.bf16.mxu1 %v4509_v38 }
 0x8aa   :  { %4464 = vmatpush1.bf16.msra.mxu0 %v6488_v28  ;;  %4512 = vmatpush3.bf16.msra.mxu1 %v4511_v11  ;;  %v4513_v28 = vpack.c.bf16 %v2774_v6, %v2773_v29 }
 0x8ab   :  { %4466 = vmatprep.subr.bf16.mxu0 %v6489_v13  ;;  %v2757_v13 = vld [vmem:[%s6186_s5 + $0x10] sm:$0xff] }
 0x8ac   :  { %4514 = vmatprep.subr.bf16.mxu1 %v4513_v28 }
 0x8ae   :  { %4468 = vmatpush1.bf16.msra.mxu0 %v6490_v61  ;;  %v2758_v61 = vld [vmem:[%s6186_s5 + $0x18] sm:$0xff] }
 0x8af   :  { %4470 = vmatprep.subr.bf16.mxu0 %v6491_v42  ;;  %v4515_v42 = vpack.c.bf16 %v2758_v61, %v2757_v13 }
 0x8b1   :  { %4516 = vmatpush3.bf16.msra.mxu1 %v4515_v42 }
 0x8b2   :  { %4472 = vmatpush1.bf16.msra.mxu0 %v6492_v51  ;;  %v2775_v51 = vld [vmem:[%s6186_s5 + $0xa0] sm:$0xff] }
 0x8b3   :  { %4474 = vmatprep.subr.bf16.mxu0 %v6493_v2  ;;  %v2776_v2 = vld [vmem:[%s6186_s5 + $0xa8] sm:$0xff] }
 0x8b6   :  { %4476 = vmatpush1.bf16.msra.mxu0 %v6494_v45  ;;  %v4517_v45 = vpack.c.bf16 %v2776_v2, %v2775_v51 }
 0x8b7   :  { %4478 = vmatprep.subr.bf16.mxu0 %v6495_v27  ;;  %v2759_v27 = vld [vmem:[%s6186_s5 + $0x20] sm:$0xff] }
 0x8b8   :  { %4518 = vmatprep.subr.bf16.mxu1 %v4517_v45 }
 0x8ba   :  { %4480 = vmatpush1.bf16.msra.mxu0 %v6496_v40  ;;  %v2760_v40 = vld [vmem:[%s6186_s5 + $0x28] sm:$0xff] }
 0x8bb   :  { %4482 = vmatprep.subr.bf16.mxu0 %v6497_v4  ;;  %v4519_v4 = vpack.c.bf16 %v2760_v40, %v2759_v27  ;;  %v2748_v40 = vrot.slane %v6021_v21, 6 }
 0x8bd   :  { %4520 = vmatpush3.bf16.msra.mxu1 %v4519_v4 }
 0x8be   :  { %4484 = vmatpush1.bf16.msra.mxu0 %v6552_v23  ;;  %v2777_v23 = vld [vmem:[%s6186_s5 + $0xb0] sm:$0xff] }
 0x8bf   :  { %4486 = vmatprep.subr.bf16.mxu0 %v6616_v18  ;;  %v2778_v18 = vld [vmem:[%s6186_s5 + $0xb8] sm:$0xff] }
 0x8c2   :  { %4488 = vmatpush1.bf16.msra.mxu0 %v6817_v20  ;;  %v4521_v20 = vpack.c.bf16 %v2778_v18, %v2777_v23 }
 0x8c3   :  { %4490 = vmatprep.subr.bf16.mxu0 %v6818_v25  ;;  %v2761_v25 = vld [vmem:[%s6186_s5 + $0x30] sm:$0xff] }
 0x8c4   :  { %4522 = vmatprep.subr.bf16.mxu1 %v4521_v20 }
 0x8c6   :  { %4492 = vmatpush1.bf16.msra.mxu0 %v6821_v48  ;;  %v2762_v48 = vld [vmem:[%s6186_s5 + $0x38] sm:$0xff] }
 0x8c7   :  { %4494 = vmatprep.subr.bf16.mxu0 %v6822_v50  ;;  %v4523_v50 = vpack.c.bf16 %v2762_v48, %v2761_v25 }
 0x8c9   :  { %4524 = vmatpush3.bf16.msra.mxu1 %v4523_v50 }
 0x8ca   :  { %4496 = vmatpush1.bf16.msra.mxu0 %v6825_v3  ;;  %v2779_v3 = vld [vmem:[%s6186_s5 + $0xc0] sm:$0xff] }
 0x8cb   :  { %4498 = vmatprep.subr.bf16.mxu0 %v6826_v9  ;;  %v2780_v9 = vld [vmem:[%s6186_s5 + $0xc8] sm:$0xff] }
 0x8ce   :  { %4500 = vmatpush1.bf16.msra.mxu0 %v6829_v32  ;;  %v2763_v32 = vld [vmem:[%s6186_s5 + $0x40] sm:$0xff] }
 0x8cf   :  { %4502 = vmatprep.subr.bf16.mxu0 %v6830_v33  ;;  %v4525_v33 = vpack.c.bf16 %v2780_v9, %v2779_v3  ;;  %v6880_v9 = vld [vmem:[#allocation98_spill] sm:$0xff] }
 0x8d1   :  { %4526 = vmatprep.subr.bf16.mxu1 %v4525_v33 }
 0x8d2   :  { %4504 = vmatpush1.bf16.msra.mxu0 %v6833_v0  ;;  %v2764_v0 = vld [vmem:[%s6186_s5 + $0x48] sm:$0xff] }
 0x8d3   :  { %4506 = vmatprep.subr.bf16.mxu0 %v6834_v10  ;;  %v2781_v10 = vld [vmem:[%s6186_s5 + $0xd0] sm:$0xff]  ;;  %v4527_v56 = vpack.c.bf16 %v2764_v0, %v2763_v32 }
 0x8d5   :  { %4528 = vmatpush3.bf16.msra.mxu1 %v4527_v56 }
 0x8d6   :  { %4508 = vmatpush1.bf16.msra.mxu0 %v6837_v43  ;;  %v2782_v43 = vld [vmem:[%s6186_s5 + $0xd8] sm:$0xff] }
 0x8d7   :  { %v4529_v47 = vpack.c.bf16 %v2782_v43, %v2781_v10 }
 0x8d9   :  { %2685 = vmatmul.mubr.f32.vlgmr.msra.gmra.mrb[34].mxu0 %v2474_v15  ;;  %4530 = vmatprep.subr.bf16.mxu1 %v4529_v47 }
 0x8da   :  { %4532 = vmatpush3.bf16.msra.mxu1 %v4531_v24 }
 0x8db   :  { %4534 = vmatprep.subr.bf16.mxu1 %v4533_v49 }
 0x8de   :  { %4536 = vmatpush3.bf16.msra.mxu1 %v4535_v55 }
 0x8df   :  { %4538 = vmatprep.subr.bf16.mxu1 %v4537_v58 }
 0x8e2   :  { %4540 = vmatpush3.bf16.msra.mxu1 %v4539_v19 }
 0x96c   :  { %v2544_v63 = vpop.f32.mrb[32].mxu0  ;;  %v2615_v8 = vpop.f32.mrb[22].mxu1 }
 0x96d   :  { %v2616_v15 = vadd.f32 %v2615_v8, %v6811_v31  ;;  %v2546_v52 = vpop.f32.mrb[33].mxu0  ;;  %v2617_v26 = vpop.f32.mrb[23].mxu1  ;;  %v2545_v31 = vadd.f32 %v2544_v63, %v6874_v60 }
 0x96e   :  { %v2618_v1 = vadd.f32 %v2617_v26, %v6872_v7  ;;  %v2547_v7 = vadd.f32 %v2546_v52, %v6875_v30 }
 0x96f   :  { %v2713_v38 = vrot.slane %v2616_v15, 2  ;;  %v2693_v2 = vrot.slane %v2545_v31, 2 }
 0x970   :  { %v2714_v22 = vrot.slane %v2618_v1, 2  ;;  %v2694_v45 = vrot.slane %v2547_v7, 2 }
 0x971   :  { %v2717_v11 = vadd.f32 %v2713_v38, %v6812_v41  ;;  %v2747_v41 = vrot.slane %v6019_v16, 6 }
 0x972   :  { %v2718_v29 = vadd.f32 %v2714_v22, %v6873_v35  ;;  %v2697_v35 = vadd.f32 %v2693_v2, %v6876_v53  ;;  %v2698_v4 = vadd.f32 %v2694_v45, %v6877_v54 }
 0x973   :  { %v2923_v6 = vmul.f32 -1.442695, %v2717_v11 }
 0x974   :  { %v2924_v28 = vmul.f32 -1.442695, %v2718_v29  ;;  %v2921_v25 = vmul.f32 -1.442695, %v2697_v35  ;;  %v2922_v48 = vmul.f32 -1.442695, %v2698_v4 }
 0x975   :  { %4686 = vpow2.f32 %v2923_v6 }
 0x976   :  { %4688 = vpow2.f32 %v2924_v28 }
 0x97f   :  { %v4687_v13 = vpop.eup %4686 }
 0x980   :  { %v2725_v61 = vadd.f32 1.0, %v4687_v13  ;;  %v4689_v42 = vpop.eup %4688 }
 0x981   :  { %v2726_v51 = vadd.f32 1.0, %v4689_v42 }
 0x982   :  { %4690 = vrcp.f32 %v2725_v61 }
 0x983   :  { %4692 = vrcp.f32 %v2726_v51 }
 0x984   :  { %4694 = vpow2.f32 %v2921_v25 }
 0x985   :  { %4696 = vpow2.f32 %v2922_v48 }
 0x98c   :  { %v4691_v27 = vpop.eup %4690 }
 0x98d   :  { %v2751_v23 = vmul.f32 %v4691_v27, %v2747_v41  ;;  %v4693_v18 = vpop.eup %4692  ;;  %v2743_v17 = vsub.f32 1.0, %v4691_v27 }
 0x98e   :  { %v2752_v20 = vmul.f32 %v4693_v18, %v2748_v40  ;;  %v4695_v60 = vpop.eup %4694  ;;  %v2744_v46 = vsub.f32 1.0, %v4693_v18 }
 0x98f   :  { %v4697_v30 = vpop.eup %4696  ;;  %v2705_v50 = vadd.f32 1.0, %v4695_v60 }
 0x990   :  { %v2706_v3 = vadd.f32 1.0, %v4697_v30 }
 0x991   :  { %4698 = vrcp.f32 %v2705_v50 }
 0x992   :  { %4700 = vrcp.f32 %v2706_v3 }
 0x99b   :  { %v4699_v33 = vpop.eup %4698 }
 0x99c   :  { %v4701_v10 = vpop.eup %4700 }
 0x9ac   :  { %v2686_v16 = vpop.f32.mrb[34].mxu0 }
 0x9ad   :  { %v2687_v53 = vadd.f32 %v2686_v16, %v6880_v9  ;;  %v2688_v32 = vpop.f32.mrb[35].mxu0 }
 0x9ae   :  { %v2689_v21 = vadd.f32 %v2688_v32, %v6879_v5 }
 0x9af   :  { %v2733_v54 = vrot.slane %v2687_v53, 2 }
 0x9b0   :  { %v2734_v0 = vrot.slane %v2689_v21, 2 }
 0x9b1   :  { %v2737_v43 = vmul.f32 %v4699_v33, %v2733_v54 }
 0x9b2   :  { %v2738_v56 = vmul.f32 %v4701_v10, %v2734_v0 }
 0x9b3   :  { %v2739_v47 = vadd.f32 %v2737_v43, %v6748_v62  ;;  %v2925_v62 = vld [vmem:[%s6187_s6] ss:$0 sm:$0xff] }
 0x9b4   :  { %v2740_v12 = vadd.f32 %v2738_v56, %v6749_v36 }
 0x9b5   :  { %4702 = vtanh.f32 %v2739_v47 }
 0x9b6   :  { %4704 = vtanh.f32 %v2740_v12 }
 0x9bf   :  { %v4703_v14 = vpop.eup %4702 }
 0x9c0   :  { %v4705_v24 = vpop.eup %4704  ;;  %v2745_v49 = vmul.f32 %v4703_v14, %v2743_v17 }
 0x9c1   :  { %v2746_v44 = vmul.f32 %v4705_v24, %v2744_v46 }
 0x9c2   :  { %v2753_v57 = vadd.f32 %v2751_v23, %v2745_v49 }
 0x9c3   :  { %v2754_v5 = vadd.f32 %v2752_v20, %v2746_v44 }
 0x9c4   :  { %v2796_v39 = vrot.slane %v2753_v57, 6 }
 0x9c5   :  { %v2797_v34 = vrot.slane %v2754_v5, 6 }
 0x9c7   :  { %2864 = vmatprep.mubr.f32.mxu1 %v2797_v34 }
 0x9c8   :  { %2865 = vmatmul.mubr.f32.vlgmr.msra.gmra.mrb[24].mxu1 %v2796_v39 }
 0xa9b   :  { %v2958_v55 = vpop.f32.mrb[24].mxu1 }
 0xa9c   :  { %v2959_v36 = vpop.f32.mrb[25].mxu1 }
 0xa9d   :  { %v2960_v58 = vadd.f32 %v2959_v36, %v2958_v55 }
 0xa9f   :  { %v2867_v37 = vadd.f32 %v2960_v58, %v2925_v62 }
 0xaa1   :  { %2871 = vst.msk [vmem:[#allocation5] sm:$0x3] %vm2870_vm1, %v2867_v37 }
 0xaa2   :  { %4739 = shalt.err (!%p4736_p12)
}
 0xaa3   :  { %s4740_s9 = scalar_lea.hbm %s6188_s7, 32 }
 0xaa4   :  { %p4741_p13 = scmp.ne.s32.totalorder %s6188_s7, %s4740_s9  ;;  %p4744_p0 = scmp.lt.u32.totalorder %s4740_s9, %s6188_s7 }
 0xaa6   :  { %p4746_p1 = pnand %p4744_p0, %p4741_p13 }
 0xaa8   :  { %4749 = shalt.err (!%p4746_p1)
}
 0xaa9   :  { %2881 = dma.vmem_to_hbm [thread:$0]  %s2879_s28, 32, %s6188_s7, [#allocation4]  }
 0xaaa   :  { %4752 = dma.done.wait [#allocation4], 32  }
 0xaab   :  { %4753 = vsyncadd [#allocation4], 4294967264 }
 0xaac   :  { %2885 = vsyncpa [#allocation3], 1 }
 0xaad   :  { %2886 = vsyncpa [#allocation4], 1 }

</bundles_post_ra>
